<compile_context>
chip_gen: v5e
topology: v5e:2x2
jax: 0.10.0
libtpu: 0.0.40
codegen_flags: <defaults>
</compile_context>

<pallas_src>
import math

import numpy as np
import jax
import jax.numpy as jnp
from jax.experimental import pallas as pl
from jax.experimental.pallas import tpu as pltpu


def _round_up(a, m):
    return ((a + m - 1) // m) * m


# ----------------------------------------------------------------------------
# Fused ASPP kernel (one image per grid step, CHW-flat wide-grid layout)
# ----------------------------------------------------------------------------
def _make_aspp_kernel(dim, dim_p, in_dim, dd, H, W, WG, C0,
                      xin_base, LGI, band2, LG2, L):
    inv_hw = 1.0 / float(H * W)
    K1 = 9 * dim_p                  # stacked contraction depth, stage 1
    K2 = 9 * in_dim                 # stacked contraction depth, branches
    taps = [(ky, kx) for ky in range(3) for kx in range(3)]

    def kernel(x_ref, wdc_ref, w1_ref, wbr_ref, w5_ref, wfc_ref, wf5_ref,
               tdc_ref, tbr_ref, t5_ref, tf_ref, mask_ref, alpha_ref,
               out_ref, xg_ref, xdc_ref, stg_ref, cat_ref):
        f32, bf16 = jnp.float32, jnp.bfloat16

        # ---- in-kernel zero-embedding of the raw image on the wide grid ----
        xg_ref[...] = jnp.zeros((dim_p, LGI), f32)
        for i in range(H):
            dst = xin_base + i * WG + C0
            xg_ref[0:dim, dst:dst + W] = x_ref[0, :, i * W:(i + 1) * W]

        # ---- stage 1: down_conv (3x3, pad 1) as ONE K=9*dim_p matmul --------
        for t, (ky, kx) in enumerate(taps):
            base = xin_base + (ky - 1) * WG + (kx - 1)
            stg_ref[t * dim_p:(t + 1) * dim_p, :] = (
                xg_ref[:, base:base + L].astype(bf16))
        y = jnp.dot(wdc_ref[...], stg_ref[0:K1, :],
                    preferred_element_type=f32) + tdc_ref[...]
        a0 = alpha_ref[0]
        y = jnp.where(y > 0, y, a0 * y)                 # PReLU
        xb = y * mask_ref[...]                          # zero outside HxW
        xcast = xb.astype(bf16)

        # ---- conv5 = global avg pool + 1x1 (rank-1, MXU-free) ---------------
        pooled = jnp.sum(xb, axis=1, keepdims=True) * inv_hw        # (in_dim,1)
        y5 = jnp.sum(w5_ref[...] * pooled, axis=0, keepdims=True) + t5_ref[...]
        a5 = alpha_ref[5]
        c5 = jnp.where(y5 > 0, y5, a5 * y5)                         # (1, dd)
        # fold the broadcast conv5 contribution + fuse bias into one column
        zc = tf_ref[...] + jnp.sum(wf5_ref[...] * c5, axis=1, keepdims=True)

        # ---- persist masked band (bf16) + zero guard rows for dilated taps --
        xdc_ref[:, 0:band2] = jnp.zeros((in_dim, band2), bf16)
        xdc_ref[:, band2:band2 + L] = xcast
        xdc_ref[:, band2 + L:LG2] = jnp.zeros((in_dim, LG2 - band2 - L), bf16)

        # ---- conv1 (1x1) -> concat rows [0, dd) ------------------------------
        c1 = jnp.dot(w1_ref[...], xcast,
                     preferred_element_type=f32) + tbr_ref[0]
        a1 = alpha_ref[1]
        cat_ref[0:dd, :] = jnp.where(c1 > 0, c1, a1 * c1)

        # ---- conv2/3/4 (3x3, dilation 2/4/6): stack 9 taps, ONE matmul each --
        for bi, d in enumerate((2, 4, 6)):
            for t, (ky, kx) in enumerate(taps):
                off = band2 + (ky - 1) * d * WG + (kx - 1) * d
                stg_ref[t * in_dim:(t + 1) * in_dim, :] = (
                    xdc_ref[:, off:off + L])
            cb = jnp.dot(wbr_ref[bi], stg_ref[0:K2, :],
                         preferred_element_type=f32) + tbr_ref[bi + 1]
            ab = alpha_ref[2 + bi]
            cat_ref[(bi + 1) * dd:(bi + 2) * dd, :] = jnp.where(
                cb > 0, cb, ab * cb)

        # ---- fuse: ONE K=4*dd matmul + rank-1 pooled/bias column -------------
        z = jnp.dot(wfc_ref[...], cat_ref[...],
                    preferred_element_type=f32) + zc
        af = alpha_ref[6]
        out_ref[0] = jnp.where(z > 0, z, af * z)

    return kernel


# ----------------------------------------------------------------------------
# Host-side parameter folding + pallas_call wrapper
# ----------------------------------------------------------------------------
def _fold_conv_bn(w, b, scale, shift):
    """y=(conv(x,w)+b)*s+t  ==  conv(x, w*s) + (b*s+t)."""
    return w * scale, b * scale + shift


def _stack_taps(w_f, cin_pad=None):
    """(K,K,Cin,Cout) HWIO -> (Cout, K*K*Cin_pad), tap-major, channel-minor."""
    K1, K2, cin, cout = w_f.shape
    if cin_pad is None:
        cin_pad = cin
    wt = jnp.transpose(w_f, (0, 1, 3, 2)).reshape(K1 * K2, cout, cin)
    if cin_pad != cin:
        wt = jnp.pad(wt, ((0, 0), (0, 0), (0, cin_pad - cin)))
    return jnp.transpose(wt, (1, 0, 2)).reshape(cout, K1 * K2 * cin_pad)


def aspp_forward(x_nchw, params):
    x = x_nchw.astype(jnp.float32)
    N, dim, H, W = x.shape
    in_dim = params["down_conv"][0].shape[-1]
    dd = in_dim // 2
    bf16 = jnp.bfloat16

    # ---- wide-grid geometry (all offsets static) -----------------------------
    P = 6                                   # max branch dilation (conv4)
    C0 = P                                  # first valid column in a band row
    WG = _round_up(W + 2 * P, 8)            # wide row width (lane-friendlier L)
    L = H * WG                              # flattened output band length
    dim_p = _round_up(dim, 16)              # bf16-tile padded input channels

    xin_base = _round_up(WG + 1, 128)       # top guard of the input wide grid
    LGI = _round_up(xin_base + L + WG + 1, 128)
    band2 = _round_up(6 * WG + 6, 128)      # top guard of the xdc wide grid
    LG2 = _round_up(band2 + L + 6 * WG + 6, 128)

    # ---- fold bias + inference BN; restack weights for the big-K matmuls -----
    wdc_f, tdc = _fold_conv_bn(*params["down_conv"][:4])
    w1_f, t1 = _fold_conv_bn(*params["conv1"][:4])
    w2_f, t2 = _fold_conv_bn(*params["conv2"][:4])
    w3_f, t3 = _fold_conv_bn(*params["conv3"][:4])
    w4_f, t4 = _fold_conv_bn(*params["conv4"][:4])
    w5_f, t5 = _fold_conv_bn(*params["conv5"][:4])
    wf_f, tf = _fold_conv_bn(*params["fuse"][:4])

    wdc_big = _stack_taps(wdc_f, dim_p).astype(bf16)            # (in_dim, 9*dim_p)
    wbr_big = jnp.stack([_stack_taps(w2_f), _stack_taps(w3_f),
                         _stack_taps(w4_f)]).astype(bf16)       # (3, dd, 9*in_dim)
    w1_t = w1_f[0, 0].T.astype(bf16)                            # (dd, in_dim)
    w5_m = w5_f[0, 0]                                           # (in_dim, dd) f32
    wf2 = wf_f[0, 0]                                            # (5*dd, in_dim)
    wfc = wf2[:4 * dd].T                                        # (in_dim, 4*dd) f32
    wf5 = wf2[4 * dd:].T                                        # (in_dim, dd)   f32

    tdc_c = tdc.reshape(in_dim, 1)
    tbr_c = jnp.stack([t1, t2, t3, t4]).reshape(4, dd, 1)
    t5_r = t5.reshape(1, dd)
    tf_c = tf.reshape(in_dim, 1)

    alphas = jnp.array([params["down_conv"][4], params["conv1"][4],
                        params["conv2"][4], params["conv3"][4],
                        params["conv4"][4], params["conv5"][4],
                        params["fuse"][4], 0.0], jnp.float32)

    # validity mask over the band (1 inside the original HxW image)
    cols = np.arange(L) % WG
    mask = jnp.asarray(((cols >= C0) & (cols < C0 + W))
                       .astype(np.float32)).reshape(1, L)

    xr = x.reshape(N, dim, H * W)           # free reshape; padding is in-kernel

    kernel = _make_aspp_kernel(dim, dim_p, in_dim, dd, H, W, WG, C0,
                               xin_base, LGI, band2, LG2, L)

    def _const(arr):
        nd = arr.ndim
        return pl.BlockSpec(arr.shape, lambda n, _nd=nd: (0,) * _nd)

    out = pl.pallas_call(
        kernel,
        out_shape=jax.ShapeDtypeStruct((N, in_dim, L), jnp.float32),
        grid=(N,),
        in_specs=[
            pl.BlockSpec((1, dim, H * W), lambda n: (n, 0, 0)),
            _const(wdc_big), _const(w1_t), _const(wbr_big), _const(w5_m),
            _const(wfc), _const(wf5), _const(tdc_c), _const(tbr_c),
            _const(t5_r), _const(tf_c), _const(mask),
            pl.BlockSpec(memory_space=pltpu.MemorySpace.SMEM),   # PReLU slopes
        ],
        out_specs=pl.BlockSpec((1, in_dim, L), lambda n: (n, 0, 0)),
        scratch_shapes=[
            pltpu.VMEM((dim_p, LGI), jnp.float32),               # wide input
            pltpu.VMEM((in_dim, LG2), jnp.bfloat16),             # down_conv out
            pltpu.VMEM((max(9 * dim_p, 9 * in_dim), L), jnp.bfloat16),  # taps
            pltpu.VMEM((4 * dd, L), jnp.float32),                # branch concat
        ],
        compiler_params=pltpu.CompilerParams(
            dimension_semantics=("parallel",)),
    )(xr, wdc_big, w1_t, wbr_big, w5_m, wfc, wf5, tdc_c, tbr_c, t5_r, tf_c,
      mask, alphas)

    # drop the zero border columns of the band -> NCHW output
    # TODO(synk): at real W (>=128) store only the valid columns in-kernel so
    #             this host-side slice pass disappears.
    return out.reshape(N, in_dim, H, WG)[:, :, :, C0:C0 + W]


# ----------------------------------------------------------------------------
# Deterministic parameter init (synthetic) + pure-JAX reference
# ----------------------------------------------------------------------------
def init_conv_bn_prelu(key, Cin, Cout, K):
    k1, k2, k3, k4 = jax.random.split(key, 4)
    bound = 1.0 / math.sqrt(Cin * K * K)
    w = jax.random.uniform(k1, (K, K, Cin, Cout), jnp.float32, -bound, bound)
    b = jax.random.uniform(k2, (Cout,), jnp.float32, -bound, bound)
    gamma = jax.random.uniform(k3, (Cout,), jnp.float32, 0.5, 1.5)
    beta = jax.random.uniform(k4, (Cout,), jnp.float32, -0.5, 0.5)
    eps = 1e-5
    # inference-mode BN folded: running_mean=0, running_var=1 (PyTorch defaults)
    scale = gamma / jnp.sqrt(1.0 + eps)
    shift = beta
    alpha = 0.25  # nn.PReLU() default
    return (w, b, scale, shift, alpha)


def _ref_conv_bn_prelu(x_nhwc, w, b, scale, shift, alpha, dil=1):
    K = w.shape[0]
    pad = dil * (K // 2)
    y = jax.lax.conv_general_dilated(
        x_nhwc, w, (1, 1), ((pad, pad), (pad, pad)),
        rhs_dilation=(dil, dil),
        dimension_numbers=("NHWC", "HWIO", "NHWC"),
        precision=jax.lax.Precision.HIGHEST)
    y = y + b
    y = y * scale + shift
    return jnp.where(y > 0, y, alpha * y)


def ref_forward(x_nchw, params):
    x = jnp.transpose(x_nchw, (0, 2, 3, 1)).astype(jnp.float32)
    x = _ref_conv_bn_prelu(x, *params["down_conv"], dil=1)
    c1 = _ref_conv_bn_prelu(x, *params["conv1"], dil=1)
    c2 = _ref_conv_bn_prelu(x, *params["conv2"], dil=2)
    c3 = _ref_conv_bn_prelu(x, *params["conv3"], dil=4)
    c4 = _ref_conv_bn_prelu(x, *params["conv4"], dil=6)
    pooled = jnp.mean(x, axis=(1, 2), keepdims=True)
    y5 = _ref_conv_bn_prelu(pooled, *params["conv5"], dil=1)
    N, H, W, _ = x.shape
    c5 = jnp.broadcast_to(y5, (N, H, W, y5.shape[-1]))
    cat = jnp.concatenate([c1, c2, c3, c4, c5], axis=-1)
    out = _ref_conv_bn_prelu(cat, *params["fuse"], dil=1)
    return jnp.transpose(out, (0, 3, 1, 2))


# ----------------------------------------------------------------------------
if __name__ == "__main__":
    key = jax.random.PRNGKey(0)
    keys = jax.random.split(key, 8)

    dim, in_dim = 4, 16
    down_dim = in_dim // 2
    N, H, W = 2, 16, 16

    x = jax.random.normal(keys[0], (N, dim, H, W), jnp.float32)

    params = {
        "down_conv": init_conv_bn_prelu(keys[1], dim, in_dim, 3),
        "conv1":     init_conv_bn_prelu(keys[2], in_dim, down_dim, 1),
        "conv2":     init_conv_bn_prelu(keys[3], in_dim, down_dim, 3),
        "conv3":     init_conv_bn_prelu(keys[4], in_dim, down_dim, 3),
        "conv4":     init_conv_bn_prelu(keys[5], in_dim, down_dim, 3),
        "conv5":     init_conv_bn_prelu(keys[6], in_dim, down_dim, 1),
        "fuse":      init_conv_bn_prelu(keys[7], 5 * down_dim, in_dim, 1),
    }

    out = jax.block_until_ready(aspp_forward(x, params))
    assert out.shape == (N, in_dim, H, W), out.shape

    ref = jax.block_until_ready(ref_forward(x, params))
    # Tolerance covers the bf16 matmul operands (stage-1/branch weights and the
    # xdc activation) with f32 accumulation, plus host-side BN/bias folding.
    np.testing.assert_allclose(np.asarray(out), np.asarray(ref),
                               rtol=3e-2, atol=3e-2)
    assert bool(jnp.all(jnp.isfinite(out)))

    print("KERNEL_OK")
</pallas_src>

<mosaic_0001>
module attributes {stable_mosaic.version = 11 : i64} {
  func.func @kernel(%arg0: i32, %arg1: memref<1x4x256xf32, #tpu.memory_space<vmem>>, %arg2: memref<16x144xbf16, #tpu.memory_space<vmem>>, %arg3: memref<8x16xbf16, #tpu.memory_space<vmem>>, %arg4: memref<3x8x144xbf16, #tpu.memory_space<vmem>>, %arg5: memref<16x8xf32, #tpu.memory_space<vmem>>, %arg6: memref<16x32xf32, #tpu.memory_space<vmem>>, %arg7: memref<16x8xf32, #tpu.memory_space<vmem>>, %arg8: memref<16x1xf32, #tpu.memory_space<vmem>>, %arg9: memref<4x8x1xf32, #tpu.memory_space<vmem>>, %arg10: memref<1x8xf32, #tpu.memory_space<vmem>>, %arg11: memref<16x1xf32, #tpu.memory_space<vmem>>, %arg12: memref<1x512xf32, #tpu.memory_space<vmem>>, %arg13: memref<8xf32, #tpu.memory_space<smem>>, %arg14: memref<1x16x512xf32, #tpu.memory_space<vmem>>, %arg15: memref<16x768xf32, #tpu.memory_space<vmem>>, %arg16: memref<16x1024xbf16, #tpu.memory_space<vmem>>, %arg17: memref<144x512xbf16, #tpu.memory_space<vmem>>, %arg18: memref<32x512xf32, #tpu.memory_space<vmem>>) attributes {dimension_semantics = [#tpu.dimension_semantics<parallel>], iteration_bounds = array<i64: 2>, scalar_prefetch = 0 : i64, scratch_operands = 4 : i64, tpu.core_type = #tpu.core_type<tc>, window_params = [{transform_indices = @transform_0, window_bounds = array<i64: 1, 4, 256>}, {pipeline_mode = #tpu.pipeline_mode<synchronous>, transform_indices = @transform_1, window_bounds = array<i64: 16, 144>}, {pipeline_mode = #tpu.pipeline_mode<synchronous>, transform_indices = @transform_2, window_bounds = array<i64: 8, 16>}, {pipeline_mode = #tpu.pipeline_mode<synchronous>, transform_indices = @transform_3, window_bounds = array<i64: 3, 8, 144>}, {pipeline_mode = #tpu.pipeline_mode<synchronous>, transform_indices = @transform_4, window_bounds = array<i64: 16, 8>}, {pipeline_mode = #tpu.pipeline_mode<synchronous>, transform_indices = @transform_5, window_bounds = array<i64: 16, 32>}, {pipeline_mode = #tpu.pipeline_mode<synchronous>, transform_indices = @transform_6, window_bounds = array<i64: 16, 8>}, {pipeline_mode = #tpu.pipeline_mode<synchronous>, transform_indices = @transform_7, window_bounds = array<i64: 16, 1>}, {pipeline_mode = #tpu.pipeline_mode<synchronous>, transform_indices = @transform_8, window_bounds = array<i64: 4, 8, 1>}, {pipeline_mode = #tpu.pipeline_mode<synchronous>, transform_indices = @transform_9, window_bounds = array<i64: 1, 8>}, {pipeline_mode = #tpu.pipeline_mode<synchronous>, transform_indices = @transform_10, window_bounds = array<i64: 16, 1>}, {pipeline_mode = #tpu.pipeline_mode<synchronous>, transform_indices = @transform_11, window_bounds = array<i64: 1, 512>}, {transform_indices = @transform_12, window_bounds = array<i64: 8>}, {transform_indices = @transform_13, window_bounds = array<i64: 1, 16, 512>}]} {
    %cst = arith.constant 0.000000e+00 : f32
    %0 = vector.broadcast %cst : f32 to vector<16x768xf32>
    %c0 = arith.constant 0 : index
    %c0_0 = arith.constant 0 : index
    %1 = vector.load %arg15[%c0, %c0_0] : memref<16x768xf32, #tpu.memory_space<vmem>>, vector<16x768xf32>
    tpu.vector_store %arg15[%c0, %c0_0], %0 {strides = array<i32>} : memref<16x768xf32, #tpu.memory_space<vmem>>, vector<16x768xf32>,
    %c0_1 = arith.constant 0 : index
    %c0_2 = arith.constant 0 : index
    %c0_3 = arith.constant 0 : index
    %2 = vector.load %arg1[%c0_1, %c0_2, %c0_3] : memref<1x4x256xf32, #tpu.memory_space<vmem>>, vector<1x4x16xf32>
    %3 = vector.shape_cast %2 : vector<1x4x16xf32> to vector<4x16xf32>
    %c0_4 = arith.constant 0 : index
    %c134 = arith.constant 134 : index
    %4 = vector.load %arg15[%c0_4, %c134] : memref<16x768xf32, #tpu.memory_space<vmem>>, vector<4x16xf32>
    tpu.vector_store %arg15[%c0_4, %c134], %3 {strides = array<i32>} : memref<16x768xf32, #tpu.memory_space<vmem>>, vector<4x16xf32>,
    %c0_5 = arith.constant 0 : index
    %c0_6 = arith.constant 0 : index
    %c16 = arith.constant 16 : index
    %5 = vector.load %arg1[%c0_5, %c0_6, %c16] : memref<1x4x256xf32, #tpu.memory_space<vmem>>, vector<1x4x16xf32>
    %6 = vector.shape_cast %5 : vector<1x4x16xf32> to vector<4x16xf32>
    %c0_7 = arith.constant 0 : index
    %c166 = arith.constant 166 : index
    %7 = vector.load %arg15[%c0_7, %c166] : memref<16x768xf32, #tpu.memory_space<vmem>>, vector<4x16xf32>
    tpu.vector_store %arg15[%c0_7, %c166], %6 {strides = array<i32>} : memref<16x768xf32, #tpu.memory_space<vmem>>, vector<4x16xf32>,
    %c0_8 = arith.constant 0 : index
    %c0_9 = arith.constant 0 : index
    %c32 = arith.constant 32 : index
    %8 = vector.load %arg1[%c0_8, %c0_9, %c32] : memref<1x4x256xf32, #tpu.memory_space<vmem>>, vector<1x4x16xf32>
    %9 = vector.shape_cast %8 : vector<1x4x16xf32> to vector<4x16xf32>
    %c0_10 = arith.constant 0 : index
    %c198 = arith.constant 198 : index
    %10 = vector.load %arg15[%c0_10, %c198] : memref<16x768xf32, #tpu.memory_space<vmem>>, vector<4x16xf32>
    tpu.vector_store %arg15[%c0_10, %c198], %9 {strides = array<i32>} : memref<16x768xf32, #tpu.memory_space<vmem>>, vector<4x16xf32>,
    %c0_11 = arith.constant 0 : index
    %c0_12 = arith.constant 0 : index
    %c48 = arith.constant 48 : index
    %11 = vector.load %arg1[%c0_11, %c0_12, %c48] : memref<1x4x256xf32, #tpu.memory_space<vmem>>, vector<1x4x16xf32>
    %12 = vector.shape_cast %11 : vector<1x4x16xf32> to vector<4x16xf32>
    %c0_13 = arith.constant 0 : index
    %c230 = arith.constant 230 : index
    %13 = vector.load %arg15[%c0_13, %c230] : memref<16x768xf32, #tpu.memory_space<vmem>>, vector<4x16xf32>
    tpu.vector_store %arg15[%c0_13, %c230], %12 {strides = array<i32>} : memref<16x768xf32, #tpu.memory_space<vmem>>, vector<4x16xf32>,
    %c0_14 = arith.constant 0 : index
    %c0_15 = arith.constant 0 : index
    %c64 = arith.constant 64 : index
    %14 = vector.load %arg1[%c0_14, %c0_15, %c64] : memref<1x4x256xf32, #tpu.memory_space<vmem>>, vector<1x4x16xf32>
    %15 = vector.shape_cast %14 : vector<1x4x16xf32> to vector<4x16xf32>
    %c0_16 = arith.constant 0 : index
    %c262 = arith.constant 262 : index
    %16 = vector.load %arg15[%c0_16, %c262] : memref<16x768xf32, #tpu.memory_space<vmem>>, vector<4x16xf32>
    tpu.vector_store %arg15[%c0_16, %c262], %15 {strides = array<i32>} : memref<16x768xf32, #tpu.memory_space<vmem>>, vector<4x16xf32>,
    %c0_17 = arith.constant 0 : index
    %c0_18 = arith.constant 0 : index
    %c80 = arith.constant 80 : index
    %17 = vector.load %arg1[%c0_17, %c0_18, %c80] : memref<1x4x256xf32, #tpu.memory_space<vmem>>, vector<1x4x16xf32>
    %18 = vector.shape_cast %17 : vector<1x4x16xf32> to vector<4x16xf32>
    %c0_19 = arith.constant 0 : index
    %c294 = arith.constant 294 : index
    %19 = vector.load %arg15[%c0_19, %c294] : memref<16x768xf32, #tpu.memory_space<vmem>>, vector<4x16xf32>
    tpu.vector_store %arg15[%c0_19, %c294], %18 {strides = array<i32>} : memref<16x768xf32, #tpu.memory_space<vmem>>, vector<4x16xf32>,
    %c0_20 = arith.constant 0 : index
    %c0_21 = arith.constant 0 : index
    %c96 = arith.constant 96 : index
    %20 = vector.load %arg1[%c0_20, %c0_21, %c96] : memref<1x4x256xf32, #tpu.memory_space<vmem>>, vector<1x4x16xf32>
    %21 = vector.shape_cast %20 : vector<1x4x16xf32> to vector<4x16xf32>
    %c0_22 = arith.constant 0 : index
    %c326 = arith.constant 326 : index
    %22 = vector.load %arg15[%c0_22, %c326] : memref<16x768xf32, #tpu.memory_space<vmem>>, vector<4x16xf32>
    tpu.vector_store %arg15[%c0_22, %c326], %21 {strides = array<i32>} : memref<16x768xf32, #tpu.memory_space<vmem>>, vector<4x16xf32>,
    %c0_23 = arith.constant 0 : index
    %c0_24 = arith.constant 0 : index
    %c112 = arith.constant 112 : index
    %23 = vector.load %arg1[%c0_23, %c0_24, %c112] : memref<1x4x256xf32, #tpu.memory_space<vmem>>, vector<1x4x16xf32>
    %24 = vector.shape_cast %23 : vector<1x4x16xf32> to vector<4x16xf32>
    %c0_25 = arith.constant 0 : index
    %c358 = arith.constant 358 : index
    %25 = vector.load %arg15[%c0_25, %c358] : memref<16x768xf32, #tpu.memory_space<vmem>>, vector<4x16xf32>
    tpu.vector_store %arg15[%c0_25, %c358], %24 {strides = array<i32>} : memref<16x768xf32, #tpu.memory_space<vmem>>, vector<4x16xf32>,
    %c0_26 = arith.constant 0 : index
    %c0_27 = arith.constant 0 : index
    %c128 = arith.constant 128 : index
    %26 = vector.load %arg1[%c0_26, %c0_27, %c128] : memref<1x4x256xf32, #tpu.memory_space<vmem>>, vector<1x4x16xf32>
    %27 = vector.shape_cast %26 : vector<1x4x16xf32> to vector<4x16xf32>
    %c0_28 = arith.constant 0 : index
    %c390 = arith.constant 390 : index
    %28 = vector.load %arg15[%c0_28, %c390] : memref<16x768xf32, #tpu.memory_space<vmem>>, vector<4x16xf32>
    tpu.vector_store %arg15[%c0_28, %c390], %27 {strides = array<i32>} : memref<16x768xf32, #tpu.memory_space<vmem>>, vector<4x16xf32>,
    %c0_29 = arith.constant 0 : index
    %c0_30 = arith.constant 0 : index
    %c144 = arith.constant 144 : index
    %29 = vector.load %arg1[%c0_29, %c0_30, %c144] : memref<1x4x256xf32, #tpu.memory_space<vmem>>, vector<1x4x16xf32>
    %30 = vector.shape_cast %29 : vector<1x4x16xf32> to vector<4x16xf32>
    %c0_31 = arith.constant 0 : index
    %c422 = arith.constant 422 : index
    %31 = vector.load %arg15[%c0_31, %c422] : memref<16x768xf32, #tpu.memory_space<vmem>>, vector<4x16xf32>
    tpu.vector_store %arg15[%c0_31, %c422], %30 {strides = array<i32>} : memref<16x768xf32, #tpu.memory_space<vmem>>, vector<4x16xf32>,
    %c0_32 = arith.constant 0 : index
    %c0_33 = arith.constant 0 : index
    %c160 = arith.constant 160 : index
    %32 = vector.load %arg1[%c0_32, %c0_33, %c160] : memref<1x4x256xf32, #tpu.memory_space<vmem>>, vector<1x4x16xf32>
    %33 = vector.shape_cast %32 : vector<1x4x16xf32> to vector<4x16xf32>
    %c0_34 = arith.constant 0 : index
    %c454 = arith.constant 454 : index
    %34 = vector.load %arg15[%c0_34, %c454] : memref<16x768xf32, #tpu.memory_space<vmem>>, vector<4x16xf32>
    tpu.vector_store %arg15[%c0_34, %c454], %33 {strides = array<i32>} : memref<16x768xf32, #tpu.memory_space<vmem>>, vector<4x16xf32>,
    %c0_35 = arith.constant 0 : index
    %c0_36 = arith.constant 0 : index
    %c176 = arith.constant 176 : index
    %35 = vector.load %arg1[%c0_35, %c0_36, %c176] : memref<1x4x256xf32, #tpu.memory_space<vmem>>, vector<1x4x16xf32>
    %36 = vector.shape_cast %35 : vector<1x4x16xf32> to vector<4x16xf32>
    %c0_37 = arith.constant 0 : index
    %c486 = arith.constant 486 : index
    %37 = vector.load %arg15[%c0_37, %c486] : memref<16x768xf32, #tpu.memory_space<vmem>>, vector<4x16xf32>
    tpu.vector_store %arg15[%c0_37, %c486], %36 {strides = array<i32>} : memref<16x768xf32, #tpu.memory_space<vmem>>, vector<4x16xf32>,
    %c0_38 = arith.constant 0 : index
    %c0_39 = arith.constant 0 : index
    %c192 = arith.constant 192 : index
    %38 = vector.load %arg1[%c0_38, %c0_39, %c192] : memref<1x4x256xf32, #tpu.memory_space<vmem>>, vector<1x4x16xf32>
    %39 = vector.shape_cast %38 : vector<1x4x16xf32> to vector<4x16xf32>
    %c0_40 = arith.constant 0 : index
    %c518 = arith.constant 518 : index
    %40 = vector.load %arg15[%c0_40, %c518] : memref<16x768xf32, #tpu.memory_space<vmem>>, vector<4x16xf32>
    tpu.vector_store %arg15[%c0_40, %c518], %39 {strides = array<i32>} : memref<16x768xf32, #tpu.memory_space<vmem>>, vector<4x16xf32>,
    %c0_41 = arith.constant 0 : index
    %c0_42 = arith.constant 0 : index
    %c208 = arith.constant 208 : index
    %41 = vector.load %arg1[%c0_41, %c0_42, %c208] : memref<1x4x256xf32, #tpu.memory_space<vmem>>, vector<1x4x16xf32>
    %42 = vector.shape_cast %41 : vector<1x4x16xf32> to vector<4x16xf32>
    %c0_43 = arith.constant 0 : index
    %c550 = arith.constant 550 : index
    %43 = vector.load %arg15[%c0_43, %c550] : memref<16x768xf32, #tpu.memory_space<vmem>>, vector<4x16xf32>
    tpu.vector_store %arg15[%c0_43, %c550], %42 {strides = array<i32>} : memref<16x768xf32, #tpu.memory_space<vmem>>, vector<4x16xf32>,
    %c0_44 = arith.constant 0 : index
    %c0_45 = arith.constant 0 : index
    %c224 = arith.constant 224 : index
    %44 = vector.load %arg1[%c0_44, %c0_45, %c224] : memref<1x4x256xf32, #tpu.memory_space<vmem>>, vector<1x4x16xf32>
    %45 = vector.shape_cast %44 : vector<1x4x16xf32> to vector<4x16xf32>
    %c0_46 = arith.constant 0 : index
    %c582 = arith.constant 582 : index
    %46 = vector.load %arg15[%c0_46, %c582] : memref<16x768xf32, #tpu.memory_space<vmem>>, vector<4x16xf32>
    tpu.vector_store %arg15[%c0_46, %c582], %45 {strides = array<i32>} : memref<16x768xf32, #tpu.memory_space<vmem>>, vector<4x16xf32>,
    %c0_47 = arith.constant 0 : index
    %c0_48 = arith.constant 0 : index
    %c240 = arith.constant 240 : index
    %47 = vector.load %arg1[%c0_47, %c0_48, %c240] : memref<1x4x256xf32, #tpu.memory_space<vmem>>, vector<1x4x16xf32>
    %48 = vector.shape_cast %47 : vector<1x4x16xf32> to vector<4x16xf32>
    %c0_49 = arith.constant 0 : index
    %c614 = arith.constant 614 : index
    %49 = vector.load %arg15[%c0_49, %c614] : memref<16x768xf32, #tpu.memory_space<vmem>>, vector<4x16xf32>
    tpu.vector_store %arg15[%c0_49, %c614], %48 {strides = array<i32>} : memref<16x768xf32, #tpu.memory_space<vmem>>, vector<4x16xf32>,
    %c0_50 = arith.constant 0 : index
    %c95 = arith.constant 95 : index
    %50 = vector.load %arg15[%c0_50, %c95] : memref<16x768xf32, #tpu.memory_space<vmem>>, vector<16x512xf32>
    %51 = arith.truncf %50 : vector<16x512xf32> to vector<16x512xbf16>
    %c0_51 = arith.constant 0 : index
    %c0_52 = arith.constant 0 : index
    %52 = vector.load %arg17[%c0_51, %c0_52] : memref<144x512xbf16, #tpu.memory_space<vmem>>, vector<16x512xbf16>
    tpu.vector_store %arg17[%c0_51, %c0_52], %51 {strides = array<i32>} : memref<144x512xbf16, #tpu.memory_space<vmem>>, vector<16x512xbf16>,
    %c0_53 = arith.constant 0 : index
    %c96_54 = arith.constant 96 : index
    %53 = vector.load %arg15[%c0_53, %c96_54] : memref<16x768xf32, #tpu.memory_space<vmem>>, vector<16x512xf32>
    %54 = arith.truncf %53 : vector<16x512xf32> to vector<16x512xbf16>
    %c16_55 = arith.constant 16 : index
    %c0_56 = arith.constant 0 : index
    %55 = vector.load %arg17[%c16_55, %c0_56] : memref<144x512xbf16, #tpu.memory_space<vmem>>, vector<16x512xbf16>
    tpu.vector_store %arg17[%c16_55, %c0_56], %54 {strides = array<i32>} : memref<144x512xbf16, #tpu.memory_space<vmem>>, vector<16x512xbf16>,
    %c0_57 = arith.constant 0 : index
    %c97 = arith.constant 97 : index
    %56 = vector.load %arg15[%c0_57, %c97] : memref<16x768xf32, #tpu.memory_space<vmem>>, vector<16x512xf32>
    %57 = arith.truncf %56 : vector<16x512xf32> to vector<16x512xbf16>
    %c32_58 = arith.constant 32 : index
    %c0_59 = arith.constant 0 : index
    %58 = vector.load %arg17[%c32_58, %c0_59] : memref<144x512xbf16, #tpu.memory_space<vmem>>, vector<16x512xbf16>
    tpu.vector_store %arg17[%c32_58, %c0_59], %57 {strides = array<i32>} : memref<144x512xbf16, #tpu.memory_space<vmem>>, vector<16x512xbf16>,
    %c0_60 = arith.constant 0 : index
    %c127 = arith.constant 127 : index
    %59 = vector.load %arg15[%c0_60, %c127] : memref<16x768xf32, #tpu.memory_space<vmem>>, vector<16x512xf32>
    %60 = arith.truncf %59 : vector<16x512xf32> to vector<16x512xbf16>
    %c48_61 = arith.constant 48 : index
    %c0_62 = arith.constant 0 : index
    %61 = vector.load %arg17[%c48_61, %c0_62] : memref<144x512xbf16, #tpu.memory_space<vmem>>, vector<16x512xbf16>
    tpu.vector_store %arg17[%c48_61, %c0_62], %60 {strides = array<i32>} : memref<144x512xbf16, #tpu.memory_space<vmem>>, vector<16x512xbf16>,
    %c0_63 = arith.constant 0 : index
    %c128_64 = arith.constant 128 : index
    %62 = vector.load %arg15[%c0_63, %c128_64] : memref<16x768xf32, #tpu.memory_space<vmem>>, vector<16x512xf32>
    %63 = arith.truncf %62 : vector<16x512xf32> to vector<16x512xbf16>
    %c64_65 = arith.constant 64 : index
    %c0_66 = arith.constant 0 : index
    %64 = vector.load %arg17[%c64_65, %c0_66] : memref<144x512xbf16, #tpu.memory_space<vmem>>, vector<16x512xbf16>
    tpu.vector_store %arg17[%c64_65, %c0_66], %63 {strides = array<i32>} : memref<144x512xbf16, #tpu.memory_space<vmem>>, vector<16x512xbf16>,
    %c0_67 = arith.constant 0 : index
    %c129 = arith.constant 129 : index
    %65 = vector.load %arg15[%c0_67, %c129] : memref<16x768xf32, #tpu.memory_space<vmem>>, vector<16x512xf32>
    %66 = arith.truncf %65 : vector<16x512xf32> to vector<16x512xbf16>
    %c80_68 = arith.constant 80 : index
    %c0_69 = arith.constant 0 : index
    %67 = vector.load %arg17[%c80_68, %c0_69] : memref<144x512xbf16, #tpu.memory_space<vmem>>, vector<16x512xbf16>
    tpu.vector_store %arg17[%c80_68, %c0_69], %66 {strides = array<i32>} : memref<144x512xbf16, #tpu.memory_space<vmem>>, vector<16x512xbf16>,
    %c0_70 = arith.constant 0 : index
    %c159 = arith.constant 159 : index
    %68 = vector.load %arg15[%c0_70, %c159] : memref<16x768xf32, #tpu.memory_space<vmem>>, vector<16x512xf32>
    %69 = arith.truncf %68 : vector<16x512xf32> to vector<16x512xbf16>
    %c96_71 = arith.constant 96 : index
    %c0_72 = arith.constant 0 : index
    %70 = vector.load %arg17[%c96_71, %c0_72] : memref<144x512xbf16, #tpu.memory_space<vmem>>, vector<16x512xbf16>
    tpu.vector_store %arg17[%c96_71, %c0_72], %69 {strides = array<i32>} : memref<144x512xbf16, #tpu.memory_space<vmem>>, vector<16x512xbf16>,
    %c0_73 = arith.constant 0 : index
    %c160_74 = arith.constant 160 : index
    %71 = vector.load %arg15[%c0_73, %c160_74] : memref<16x768xf32, #tpu.memory_space<vmem>>, vector<16x512xf32>
    %72 = arith.truncf %71 : vector<16x512xf32> to vector<16x512xbf16>
    %c112_75 = arith.constant 112 : index
    %c0_76 = arith.constant 0 : index
    %73 = vector.load %arg17[%c112_75, %c0_76] : memref<144x512xbf16, #tpu.memory_space<vmem>>, vector<16x512xbf16>
    tpu.vector_store %arg17[%c112_75, %c0_76], %72 {strides = array<i32>} : memref<144x512xbf16, #tpu.memory_space<vmem>>, vector<16x512xbf16>,
    %c0_77 = arith.constant 0 : index
    %c161 = arith.constant 161 : index
    %74 = vector.load %arg15[%c0_77, %c161] : memref<16x768xf32, #tpu.memory_space<vmem>>, vector<16x512xf32>
    %75 = arith.truncf %74 : vector<16x512xf32> to vector<16x512xbf16>
    %c128_78 = arith.constant 128 : index
    %c0_79 = arith.constant 0 : index
    %76 = vector.load %arg17[%c128_78, %c0_79] : memref<144x512xbf16, #tpu.memory_space<vmem>>, vector<16x512xbf16>
    tpu.vector_store %arg17[%c128_78, %c0_79], %75 {strides = array<i32>} : memref<144x512xbf16, #tpu.memory_space<vmem>>, vector<16x512xbf16>,
    %c0_80 = arith.constant 0 : index
    %c0_81 = arith.constant 0 : index
    %77 = vector.load %arg2[%c0_80, %c0_81] : memref<16x144xbf16, #tpu.memory_space<vmem>>, vector<16x144xbf16>
    %c0_82 = arith.constant 0 : index
    %c0_83 = arith.constant 0 : index
    %78 = vector.load %arg17[%c0_82, %c0_83] : memref<144x512xbf16, #tpu.memory_space<vmem>>, vector<144x512xbf16>
    %cst_84 = arith.constant dense<0.000000e+00> : vector<16x512xf32>
    %79 = tpu.matmul %77, %78, %cst_84 {dimension_numbers = #tpu.dot_dimension_numbers<[1], [0], [0], [1], [0, 0, 1, 1], [], []>} : vector<16x144xbf16>, vector<144x512xbf16>, vector<16x512xf32> -> vector<16x512xf32>
    %c0_85 = arith.constant 0 : index
    %c0_86 = arith.constant 0 : index
    %80 = vector.load %arg8[%c0_85, %c0_86] : memref<16x1xf32, #tpu.memory_space<vmem>>, vector<16x1xf32>
    %81 = vector.broadcast %80 : vector<16x1xf32> to vector<16x512xf32>
    %82 = arith.addf %79, %81 : vector<16x512xf32>
    %c0_87 = arith.constant 0 : index
    %83 = memref.load %arg13[%c0_87] : memref<8xf32, #tpu.memory_space<smem>>
    %cst_88 = arith.constant 0.000000e+00 : f32
    %84 = vector.broadcast %cst_88 : f32 to vector<16x512xf32>
    %85 = arith.cmpf ogt, %82, %84 : vector<16x512xf32>
    %86 = vector.broadcast %83 : f32 to vector<16x512xf32>
    %87 = arith.mulf %86, %82 : vector<16x512xf32>
    %88 = arith.select %85, %82, %87 : vector<16x512xi1>, vector<16x512xf32>
    %c0_89 = arith.constant 0 : index
    %c0_90 = arith.constant 0 : index
    %89 = vector.load %arg12[%c0_89, %c0_90] : memref<1x512xf32, #tpu.memory_space<vmem>>, vector<1x512xf32>
    %90 = vector.broadcast %89 : vector<1x512xf32> to vector<16x512xf32>
    %91 = arith.mulf %88, %90 : vector<16x512xf32>
    %92 = arith.truncf %91 : vector<16x512xf32> to vector<16x512xbf16>
    %cst_91 = arith.constant dense<0.000000e+00> : vector<16xf32>
    %93 = vector.multi_reduction <add>, %91, %cst_91 [1] : vector<16x512xf32> to vector<16xf32>
    %94 = vector.shape_cast %93 : vector<16xf32> to vector<16x1xf32>
    %cst_92 = arith.constant 3.906250e-03 : f32
    %95 = vector.broadcast %cst_92 : f32 to vector<16x1xf32>
    %96 = arith.mulf %94, %95 : vector<16x1xf32>
    %c0_93 = arith.constant 0 : index
    %c0_94 = arith.constant 0 : index
    %97 = vector.load %arg5[%c0_93, %c0_94] : memref<16x8xf32, #tpu.memory_space<vmem>>, vector<16x8xf32>
    %98 = vector.broadcast %96 : vector<16x1xf32> to vector<16x8xf32>
    %99 = arith.mulf %97, %98 : vector<16x8xf32>
    %cst_95 = arith.constant dense<0.000000e+00> : vector<8xf32>
    %100 = vector.multi_reduction <add>, %99, %cst_95 [0] : vector<16x8xf32> to vector<8xf32>
    %101 = vector.shape_cast %100 : vector<8xf32> to vector<1x8xf32>
    %c0_96 = arith.constant 0 : index
    %c0_97 = arith.constant 0 : index
    %102 = vector.load %arg10[%c0_96, %c0_97] : memref<1x8xf32, #tpu.memory_space<vmem>>, vector<1x8xf32>
    %103 = arith.addf %101, %102 : vector<1x8xf32>
    %c5 = arith.constant 5 : index
    %104 = memref.load %arg13[%c5] : memref<8xf32, #tpu.memory_space<smem>>
    %cst_98 = arith.constant 0.000000e+00 : f32
    %105 = vector.broadcast %cst_98 : f32 to vector<1x8xf32>
    %106 = arith.cmpf ogt, %103, %105 : vector<1x8xf32>
    %107 = vector.broadcast %104 : f32 to vector<1x8xf32>
    %108 = arith.mulf %107, %103 : vector<1x8xf32>
    %109 = arith.select %106, %103, %108 : vector<1x8xi1>, vector<1x8xf32>
    %c0_99 = arith.constant 0 : index
    %c0_100 = arith.constant 0 : index
    %110 = vector.load %arg11[%c0_99, %c0_100] : memref<16x1xf32, #tpu.memory_space<vmem>>, vector<16x1xf32>
    %c0_101 = arith.constant 0 : index
    %c0_102 = arith.constant 0 : index
    %111 = vector.load %arg7[%c0_101, %c0_102] : memref<16x8xf32, #tpu.memory_space<vmem>>, vector<16x8xf32>
    %112 = vector.broadcast %109 : vector<1x8xf32> to vector<16x8xf32>
    %113 = arith.mulf %111, %112 : vector<16x8xf32>
    %cst_103 = arith.constant dense<0.000000e+00> : vector<16xf32>
    %114 = vector.multi_reduction <add>, %113, %cst_103 [1] : vector<16x8xf32> to vector<16xf32>
    %115 = vector.shape_cast %114 : vector<16xf32> to vector<16x1xf32>
    %116 = arith.addf %110, %115 : vector<16x1xf32>
    %cst_104 = arith.constant 0.000000e+00 : bf16
    %117 = vector.broadcast %cst_104 : bf16 to vector<16x256xbf16>
    %c0_105 = arith.constant 0 : index
    %c0_106 = arith.constant 0 : index
    %118 = vector.load %arg16[%c0_105, %c0_106] : memref<16x1024xbf16, #tpu.memory_space<vmem>>, vector<16x256xbf16>
    tpu.vector_store %arg16[%c0_105, %c0_106], %117 {strides = array<i32>} : memref<16x1024xbf16, #tpu.memory_space<vmem>>, vector<16x256xbf16>,
    %c0_107 = arith.constant 0 : index
    %c256 = arith.constant 256 : index
    %119 = vector.load %arg16[%c0_107, %c256] : memref<16x1024xbf16, #tpu.memory_space<vmem>>, vector<16x512xbf16>
    tpu.vector_store %arg16[%c0_107, %c256], %92 {strides = array<i32>} : memref<16x1024xbf16, #tpu.memory_space<vmem>>, vector<16x512xbf16>,
    %cst_108 = arith.constant 0.000000e+00 : bf16
    %120 = vector.broadcast %cst_108 : bf16 to vector<16x256xbf16>
    %c0_109 = arith.constant 0 : index
    %c768 = arith.constant 768 : index
    %121 = vector.load %arg16[%c0_109, %c768] : memref<16x1024xbf16, #tpu.memory_space<vmem>>, vector<16x256xbf16>
    tpu.vector_store %arg16[%c0_109, %c768], %120 {strides = array<i32>} : memref<16x1024xbf16, #tpu.memory_space<vmem>>, vector<16x256xbf16>,
    %c0_110 = arith.constant 0 : index
    %c0_111 = arith.constant 0 : index
    %122 = vector.load %arg3[%c0_110, %c0_111] : memref<8x16xbf16, #tpu.memory_space<vmem>>, vector<8x16xbf16>
    %cst_112 = arith.constant dense<0.000000e+00> : vector<8x512xf32>
    %123 = tpu.matmul %122, %92, %cst_112 {dimension_numbers = #tpu.dot_dimension_numbers<[1], [0], [0], [1], [0, 0, 1, 1], [], []>} : vector<8x16xbf16>, vector<16x512xbf16>, vector<8x512xf32> -> vector<8x512xf32>
    %c0_113 = arith.constant 0 : index
    %c0_114 = arith.constant 0 : index
    %c0_115 = arith.constant 0 : index
    %124 = vector.load %arg9[%c0_113, %c0_114, %c0_115] : memref<4x8x1xf32, #tpu.memory_space<vmem>>, vector<1x8x1xf32>
    %125 = vector.shape_cast %124 : vector<1x8x1xf32> to vector<8x1xf32>
    %126 = vector.broadcast %125 : vector<8x1xf32> to vector<8x512xf32>
    %127 = arith.addf %123, %126 : vector<8x512xf32>
    %c1 = arith.constant 1 : index
    %128 = memref.load %arg13[%c1] : memref<8xf32, #tpu.memory_space<smem>>
    %cst_116 = arith.constant 0.000000e+00 : f32
    %129 = vector.broadcast %cst_116 : f32 to vector<8x512xf32>
    %130 = arith.cmpf ogt, %127, %129 : vector<8x512xf32>
    %131 = vector.broadcast %128 : f32 to vector<8x512xf32>
    %132 = arith.mulf %131, %127 : vector<8x512xf32>
    %133 = arith.select %130, %127, %132 : vector<8x512xi1>, vector<8x512xf32>
    %c0_117 = arith.constant 0 : index
    %c0_118 = arith.constant 0 : index
    %134 = vector.load %arg18[%c0_117, %c0_118] : memref<32x512xf32, #tpu.memory_space<vmem>>, vector<8x512xf32>
    tpu.vector_store %arg18[%c0_117, %c0_118], %133 {strides = array<i32>} : memref<32x512xf32, #tpu.memory_space<vmem>>, vector<8x512xf32>,
    %c0_119 = arith.constant 0 : index
    %c190 = arith.constant 190 : index
    %135 = vector.load %arg16[%c0_119, %c190] : memref<16x1024xbf16, #tpu.memory_space<vmem>>, vector<16x512xbf16>
    %c0_120 = arith.constant 0 : index
    %c0_121 = arith.constant 0 : index
    %136 = vector.load %arg17[%c0_120, %c0_121] : memref<144x512xbf16, #tpu.memory_space<vmem>>, vector<16x512xbf16>
    tpu.vector_store %arg17[%c0_120, %c0_121], %135 {strides = array<i32>} : memref<144x512xbf16, #tpu.memory_space<vmem>>, vector<16x512xbf16>,
    %c0_122 = arith.constant 0 : index
    %c192_123 = arith.constant 192 : index
    %137 = vector.load %arg16[%c0_122, %c192_123] : memref<16x1024xbf16, #tpu.memory_space<vmem>>, vector<16x512xbf16>
    %c16_124 = arith.constant 16 : index
    %c0_125 = arith.constant 0 : index
    %138 = vector.load %arg17[%c16_124, %c0_125] : memref<144x512xbf16, #tpu.memory_space<vmem>>, vector<16x512xbf16>
    tpu.vector_store %arg17[%c16_124, %c0_125], %137 {strides = array<i32>} : memref<144x512xbf16, #tpu.memory_space<vmem>>, vector<16x512xbf16>,
    %c0_126 = arith.constant 0 : index
    %c194 = arith.constant 194 : index
    %139 = vector.load %arg16[%c0_126, %c194] : memref<16x1024xbf16, #tpu.memory_space<vmem>>, vector<16x512xbf16>
    %c32_127 = arith.constant 32 : index
    %c0_128 = arith.constant 0 : index
    %140 = vector.load %arg17[%c32_127, %c0_128] : memref<144x512xbf16, #tpu.memory_space<vmem>>, vector<16x512xbf16>
    tpu.vector_store %arg17[%c32_127, %c0_128], %139 {strides = array<i32>} : memref<144x512xbf16, #tpu.memory_space<vmem>>, vector<16x512xbf16>,
    %c0_129 = arith.constant 0 : index
    %c254 = arith.constant 254 : index
    %141 = vector.load %arg16[%c0_129, %c254] : memref<16x1024xbf16, #tpu.memory_space<vmem>>, vector<16x512xbf16>
    %c48_130 = arith.constant 48 : index
    %c0_131 = arith.constant 0 : index
    %142 = vector.load %arg17[%c48_130, %c0_131] : memref<144x512xbf16, #tpu.memory_space<vmem>>, vector<16x512xbf16>
    tpu.vector_store %arg17[%c48_130, %c0_131], %141 {strides = array<i32>} : memref<144x512xbf16, #tpu.memory_space<vmem>>, vector<16x512xbf16>,
    %c0_132 = arith.constant 0 : index
    %c256_133 = arith.constant 256 : index
    %143 = vector.load %arg16[%c0_132, %c256_133] : memref<16x1024xbf16, #tpu.memory_space<vmem>>, vector<16x512xbf16>
    %c64_134 = arith.constant 64 : index
    %c0_135 = arith.constant 0 : index
    %144 = vector.load %arg17[%c64_134, %c0_135] : memref<144x512xbf16, #tpu.memory_space<vmem>>, vector<16x512xbf16>
    tpu.vector_store %arg17[%c64_134, %c0_135], %143 {strides = array<i32>} : memref<144x512xbf16, #tpu.memory_space<vmem>>, vector<16x512xbf16>,
    %c0_136 = arith.constant 0 : index
    %c258 = arith.constant 258 : index
    %145 = vector.load %arg16[%c0_136, %c258] : memref<16x1024xbf16, #tpu.memory_space<vmem>>, vector<16x512xbf16>
    %c80_137 = arith.constant 80 : index
    %c0_138 = arith.constant 0 : index
    %146 = vector.load %arg17[%c80_137, %c0_138] : memref<144x512xbf16, #tpu.memory_space<vmem>>, vector<16x512xbf16>
    tpu.vector_store %arg17[%c80_137, %c0_138], %145 {strides = array<i32>} : memref<144x512xbf16, #tpu.memory_space<vmem>>, vector<16x512xbf16>,
    %c0_139 = arith.constant 0 : index
    %c318 = arith.constant 318 : index
    %147 = vector.load %arg16[%c0_139, %c318] : memref<16x1024xbf16, #tpu.memory_space<vmem>>, vector<16x512xbf16>
    %c96_140 = arith.constant 96 : index
    %c0_141 = arith.constant 0 : index
    %148 = vector.load %arg17[%c96_140, %c0_141] : memref<144x512xbf16, #tpu.memory_space<vmem>>, vector<16x512xbf16>
    tpu.vector_store %arg17[%c96_140, %c0_141], %147 {strides = array<i32>} : memref<144x512xbf16, #tpu.memory_space<vmem>>, vector<16x512xbf16>,
    %c0_142 = arith.constant 0 : index
    %c320 = arith.constant 320 : index
    %149 = vector.load %arg16[%c0_142, %c320] : memref<16x1024xbf16, #tpu.memory_space<vmem>>, vector<16x512xbf16>
    %c112_143 = arith.constant 112 : index
    %c0_144 = arith.constant 0 : index
    %150 = vector.load %arg17[%c112_143, %c0_144] : memref<144x512xbf16, #tpu.memory_space<vmem>>, vector<16x512xbf16>
    tpu.vector_store %arg17[%c112_143, %c0_144], %149 {strides = array<i32>} : memref<144x512xbf16, #tpu.memory_space<vmem>>, vector<16x512xbf16>,
    %c0_145 = arith.constant 0 : index
    %c322 = arith.constant 322 : index
    %151 = vector.load %arg16[%c0_145, %c322] : memref<16x1024xbf16, #tpu.memory_space<vmem>>, vector<16x512xbf16>
    %c128_146 = arith.constant 128 : index
    %c0_147 = arith.constant 0 : index
    %152 = vector.load %arg17[%c128_146, %c0_147] : memref<144x512xbf16, #tpu.memory_space<vmem>>, vector<16x512xbf16>
    tpu.vector_store %arg17[%c128_146, %c0_147], %151 {strides = array<i32>} : memref<144x512xbf16, #tpu.memory_space<vmem>>, vector<16x512xbf16>,
    %c0_148 = arith.constant 0 : index
    %c0_149 = arith.constant 0 : index
    %c0_150 = arith.constant 0 : index
    %153 = vector.load %arg4[%c0_148, %c0_149, %c0_150] : memref<3x8x144xbf16, #tpu.memory_space<vmem>>, vector<1x8x144xbf16>
    %154 = vector.shape_cast %153 : vector<1x8x144xbf16> to vector<8x144xbf16>
    %c0_151 = arith.constant 0 : index
    %c0_152 = arith.constant 0 : index
    %155 = vector.load %arg17[%c0_151, %c0_152] : memref<144x512xbf16, #tpu.memory_space<vmem>>, vector<144x512xbf16>
    %cst_153 = arith.constant dense<0.000000e+00> : vector<8x512xf32>
    %156 = tpu.matmul %154, %155, %cst_153 {dimension_numbers = #tpu.dot_dimension_numbers<[1], [0], [0], [1], [0, 0, 1, 1], [], []>} : vector<8x144xbf16>, vector<144x512xbf16>, vector<8x512xf32> -> vector<8x512xf32>
    %c1_154 = arith.constant 1 : index
    %c0_155 = arith.constant 0 : index
    %c0_156 = arith.constant 0 : index
    %157 = vector.load %arg9[%c1_154, %c0_155, %c0_156] : memref<4x8x1xf32, #tpu.memory_space<vmem>>, vector<1x8x1xf32>
    %158 = vector.shape_cast %157 : vector<1x8x1xf32> to vector<8x1xf32>
    %159 = vector.broadcast %158 : vector<8x1xf32> to vector<8x512xf32>
    %160 = arith.addf %156, %159 : vector<8x512xf32>
    %c2 = arith.constant 2 : index
    %161 = memref.load %arg13[%c2] : memref<8xf32, #tpu.memory_space<smem>>
    %cst_157 = arith.constant 0.000000e+00 : f32
    %162 = vector.broadcast %cst_157 : f32 to vector<8x512xf32>
    %163 = arith.cmpf ogt, %160, %162 : vector<8x512xf32>
    %164 = vector.broadcast %161 : f32 to vector<8x512xf32>
    %165 = arith.mulf %164, %160 : vector<8x512xf32>
    %166 = arith.select %163, %160, %165 : vector<8x512xi1>, vector<8x512xf32>
    %c8 = arith.constant 8 : index
    %c0_158 = arith.constant 0 : index
    %167 = vector.load %arg18[%c8, %c0_158] : memref<32x512xf32, #tpu.memory_space<vmem>>, vector<8x512xf32>
    tpu.vector_store %arg18[%c8, %c0_158], %166 {strides = array<i32>} : memref<32x512xf32, #tpu.memory_space<vmem>>, vector<8x512xf32>,
    %c0_159 = arith.constant 0 : index
    %c124 = arith.constant 124 : index
    %168 = vector.load %arg16[%c0_159, %c124] : memref<16x1024xbf16, #tpu.memory_space<vmem>>, vector<16x512xbf16>
    %c0_160 = arith.constant 0 : index
    %c0_161 = arith.constant 0 : index
    %169 = vector.load %arg17[%c0_160, %c0_161] : memref<144x512xbf16, #tpu.memory_space<vmem>>, vector<16x512xbf16>
    tpu.vector_store %arg17[%c0_160, %c0_161], %168 {strides = array<i32>} : memref<144x512xbf16, #tpu.memory_space<vmem>>, vector<16x512xbf16>,
    %c0_162 = arith.constant 0 : index
    %c128_163 = arith.constant 128 : index
    %170 = vector.load %arg16[%c0_162, %c128_163] : memref<16x1024xbf16, #tpu.memory_space<vmem>>, vector<16x512xbf16>
    %c16_164 = arith.constant 16 : index
    %c0_165 = arith.constant 0 : index
    %171 = vector.load %arg17[%c16_164, %c0_165] : memref<144x512xbf16, #tpu.memory_space<vmem>>, vector<16x512xbf16>
    tpu.vector_store %arg17[%c16_164, %c0_165], %170 {strides = array<i32>} : memref<144x512xbf16, #tpu.memory_space<vmem>>, vector<16x512xbf16>,
    %c0_166 = arith.constant 0 : index
    %c132 = arith.constant 132 : index
    %172 = vector.load %arg16[%c0_166, %c132] : memref<16x1024xbf16, #tpu.memory_space<vmem>>, vector<16x512xbf16>
    %c32_167 = arith.constant 32 : index
    %c0_168 = arith.constant 0 : index
    %173 = vector.load %arg17[%c32_167, %c0_168] : memref<144x512xbf16, #tpu.memory_space<vmem>>, vector<16x512xbf16>
    tpu.vector_store %arg17[%c32_167, %c0_168], %172 {strides = array<i32>} : memref<144x512xbf16, #tpu.memory_space<vmem>>, vector<16x512xbf16>,
    %c0_169 = arith.constant 0 : index
    %c252 = arith.constant 252 : index
    %174 = vector.load %arg16[%c0_169, %c252] : memref<16x1024xbf16, #tpu.memory_space<vmem>>, vector<16x512xbf16>
    %c48_170 = arith.constant 48 : index
    %c0_171 = arith.constant 0 : index
    %175 = vector.load %arg17[%c48_170, %c0_171] : memref<144x512xbf16, #tpu.memory_space<vmem>>, vector<16x512xbf16>
    tpu.vector_store %arg17[%c48_170, %c0_171], %174 {strides = array<i32>} : memref<144x512xbf16, #tpu.memory_space<vmem>>, vector<16x512xbf16>,
    %c0_172 = arith.constant 0 : index
    %c256_173 = arith.constant 256 : index
    %176 = vector.load %arg16[%c0_172, %c256_173] : memref<16x1024xbf16, #tpu.memory_space<vmem>>, vector<16x512xbf16>
    %c64_174 = arith.constant 64 : index
    %c0_175 = arith.constant 0 : index
    %177 = vector.load %arg17[%c64_174, %c0_175] : memref<144x512xbf16, #tpu.memory_space<vmem>>, vector<16x512xbf16>
    tpu.vector_store %arg17[%c64_174, %c0_175], %176 {strides = array<i32>} : memref<144x512xbf16, #tpu.memory_space<vmem>>, vector<16x512xbf16>,
    %c0_176 = arith.constant 0 : index
    %c260 = arith.constant 260 : index
    %178 = vector.load %arg16[%c0_176, %c260] : memref<16x1024xbf16, #tpu.memory_space<vmem>>, vector<16x512xbf16>
    %c80_177 = arith.constant 80 : index
    %c0_178 = arith.constant 0 : index
    %179 = vector.load %arg17[%c80_177, %c0_178] : memref<144x512xbf16, #tpu.memory_space<vmem>>, vector<16x512xbf16>
    tpu.vector_store %arg17[%c80_177, %c0_178], %178 {strides = array<i32>} : memref<144x512xbf16, #tpu.memory_space<vmem>>, vector<16x512xbf16>,
    %c0_179 = arith.constant 0 : index
    %c380 = arith.constant 380 : index
    %180 = vector.load %arg16[%c0_179, %c380] : memref<16x1024xbf16, #tpu.memory_space<vmem>>, vector<16x512xbf16>
    %c96_180 = arith.constant 96 : index
    %c0_181 = arith.constant 0 : index
    %181 = vector.load %arg17[%c96_180, %c0_181] : memref<144x512xbf16, #tpu.memory_space<vmem>>, vector<16x512xbf16>
    tpu.vector_store %arg17[%c96_180, %c0_181], %180 {strides = array<i32>} : memref<144x512xbf16, #tpu.memory_space<vmem>>, vector<16x512xbf16>,
    %c0_182 = arith.constant 0 : index
    %c384 = arith.constant 384 : index
    %182 = vector.load %arg16[%c0_182, %c384] : memref<16x1024xbf16, #tpu.memory_space<vmem>>, vector<16x512xbf16>
    %c112_183 = arith.constant 112 : index
    %c0_184 = arith.constant 0 : index
    %183 = vector.load %arg17[%c112_183, %c0_184] : memref<144x512xbf16, #tpu.memory_space<vmem>>, vector<16x512xbf16>
    tpu.vector_store %arg17[%c112_183, %c0_184], %182 {strides = array<i32>} : memref<144x512xbf16, #tpu.memory_space<vmem>>, vector<16x512xbf16>,
    %c0_185 = arith.constant 0 : index
    %c388 = arith.constant 388 : index
    %184 = vector.load %arg16[%c0_185, %c388] : memref<16x1024xbf16, #tpu.memory_space<vmem>>, vector<16x512xbf16>
    %c128_186 = arith.constant 128 : index
    %c0_187 = arith.constant 0 : index
    %185 = vector.load %arg17[%c128_186, %c0_187] : memref<144x512xbf16, #tpu.memory_space<vmem>>, vector<16x512xbf16>
    tpu.vector_store %arg17[%c128_186, %c0_187], %184 {strides = array<i32>} : memref<144x512xbf16, #tpu.memory_space<vmem>>, vector<16x512xbf16>,
    %c1_188 = arith.constant 1 : index
    %c0_189 = arith.constant 0 : index
    %c0_190 = arith.constant 0 : index
    %186 = vector.load %arg4[%c1_188, %c0_189, %c0_190] : memref<3x8x144xbf16, #tpu.memory_space<vmem>>, vector<1x8x144xbf16>
    %187 = vector.shape_cast %186 : vector<1x8x144xbf16> to vector<8x144xbf16>
    %c0_191 = arith.constant 0 : index
    %c0_192 = arith.constant 0 : index
    %188 = vector.load %arg17[%c0_191, %c0_192] : memref<144x512xbf16, #tpu.memory_space<vmem>>, vector<144x512xbf16>
    %cst_193 = arith.constant dense<0.000000e+00> : vector<8x512xf32>
    %189 = tpu.matmul %187, %188, %cst_193 {dimension_numbers = #tpu.dot_dimension_numbers<[1], [0], [0], [1], [0, 0, 1, 1], [], []>} : vector<8x144xbf16>, vector<144x512xbf16>, vector<8x512xf32> -> vector<8x512xf32>
    %c2_194 = arith.constant 2 : index
    %c0_195 = arith.constant 0 : index
    %c0_196 = arith.constant 0 : index
    %190 = vector.load %arg9[%c2_194, %c0_195, %c0_196] : memref<4x8x1xf32, #tpu.memory_space<vmem>>, vector<1x8x1xf32>
    %191 = vector.shape_cast %190 : vector<1x8x1xf32> to vector<8x1xf32>
    %192 = vector.broadcast %191 : vector<8x1xf32> to vector<8x512xf32>
    %193 = arith.addf %189, %192 : vector<8x512xf32>
    %c3 = arith.constant 3 : index
    %194 = memref.load %arg13[%c3] : memref<8xf32, #tpu.memory_space<smem>>
    %cst_197 = arith.constant 0.000000e+00 : f32
    %195 = vector.broadcast %cst_197 : f32 to vector<8x512xf32>
    %196 = arith.cmpf ogt, %193, %195 : vector<8x512xf32>
    %197 = vector.broadcast %194 : f32 to vector<8x512xf32>
    %198 = arith.mulf %197, %193 : vector<8x512xf32>
    %199 = arith.select %196, %193, %198 : vector<8x512xi1>, vector<8x512xf32>
    %c16_198 = arith.constant 16 : index
    %c0_199 = arith.constant 0 : index
    %200 = vector.load %arg18[%c16_198, %c0_199] : memref<32x512xf32, #tpu.memory_space<vmem>>, vector<8x512xf32>
    tpu.vector_store %arg18[%c16_198, %c0_199], %199 {strides = array<i32>} : memref<32x512xf32, #tpu.memory_space<vmem>>, vector<8x512xf32>,
    %c0_200 = arith.constant 0 : index
    %c58 = arith.constant 58 : index
    %201 = vector.load %arg16[%c0_200, %c58] : memref<16x1024xbf16, #tpu.memory_space<vmem>>, vector<16x512xbf16>
    %c0_201 = arith.constant 0 : index
    %c0_202 = arith.constant 0 : index
    %202 = vector.load %arg17[%c0_201, %c0_202] : memref<144x512xbf16, #tpu.memory_space<vmem>>, vector<16x512xbf16>
    tpu.vector_store %arg17[%c0_201, %c0_202], %201 {strides = array<i32>} : memref<144x512xbf16, #tpu.memory_space<vmem>>, vector<16x512xbf16>,
    %c0_203 = arith.constant 0 : index
    %c64_204 = arith.constant 64 : index
    %203 = vector.load %arg16[%c0_203, %c64_204] : memref<16x1024xbf16, #tpu.memory_space<vmem>>, vector<16x512xbf16>
    %c16_205 = arith.constant 16 : index
    %c0_206 = arith.constant 0 : index
    %204 = vector.load %arg17[%c16_205, %c0_206] : memref<144x512xbf16, #tpu.memory_space<vmem>>, vector<16x512xbf16>
    tpu.vector_store %arg17[%c16_205, %c0_206], %203 {strides = array<i32>} : memref<144x512xbf16, #tpu.memory_space<vmem>>, vector<16x512xbf16>,
    %c0_207 = arith.constant 0 : index
    %c70 = arith.constant 70 : index
    %205 = vector.load %arg16[%c0_207, %c70] : memref<16x1024xbf16, #tpu.memory_space<vmem>>, vector<16x512xbf16>
    %c32_208 = arith.constant 32 : index
    %c0_209 = arith.constant 0 : index
    %206 = vector.load %arg17[%c32_208, %c0_209] : memref<144x512xbf16, #tpu.memory_space<vmem>>, vector<16x512xbf16>
    tpu.vector_store %arg17[%c32_208, %c0_209], %205 {strides = array<i32>} : memref<144x512xbf16, #tpu.memory_space<vmem>>, vector<16x512xbf16>,
    %c0_210 = arith.constant 0 : index
    %c250 = arith.constant 250 : index
    %207 = vector.load %arg16[%c0_210, %c250] : memref<16x1024xbf16, #tpu.memory_space<vmem>>, vector<16x512xbf16>
    %c48_211 = arith.constant 48 : index
    %c0_212 = arith.constant 0 : index
    %208 = vector.load %arg17[%c48_211, %c0_212] : memref<144x512xbf16, #tpu.memory_space<vmem>>, vector<16x512xbf16>
    tpu.vector_store %arg17[%c48_211, %c0_212], %207 {strides = array<i32>} : memref<144x512xbf16, #tpu.memory_space<vmem>>, vector<16x512xbf16>,
    %c0_213 = arith.constant 0 : index
    %c256_214 = arith.constant 256 : index
    %209 = vector.load %arg16[%c0_213, %c256_214] : memref<16x1024xbf16, #tpu.memory_space<vmem>>, vector<16x512xbf16>
    %c64_215 = arith.constant 64 : index
    %c0_216 = arith.constant 0 : index
    %210 = vector.load %arg17[%c64_215, %c0_216] : memref<144x512xbf16, #tpu.memory_space<vmem>>, vector<16x512xbf16>
    tpu.vector_store %arg17[%c64_215, %c0_216], %209 {strides = array<i32>} : memref<144x512xbf16, #tpu.memory_space<vmem>>, vector<16x512xbf16>,
    %c0_217 = arith.constant 0 : index
    %c262_218 = arith.constant 262 : index
    %211 = vector.load %arg16[%c0_217, %c262_218] : memref<16x1024xbf16, #tpu.memory_space<vmem>>, vector<16x512xbf16>
    %c80_219 = arith.constant 80 : index
    %c0_220 = arith.constant 0 : index
    %212 = vector.load %arg17[%c80_219, %c0_220] : memref<144x512xbf16, #tpu.memory_space<vmem>>, vector<16x512xbf16>
    tpu.vector_store %arg17[%c80_219, %c0_220], %211 {strides = array<i32>} : memref<144x512xbf16, #tpu.memory_space<vmem>>, vector<16x512xbf16>,
    %c0_221 = arith.constant 0 : index
    %c442 = arith.constant 442 : index
    %213 = vector.load %arg16[%c0_221, %c442] : memref<16x1024xbf16, #tpu.memory_space<vmem>>, vector<16x512xbf16>
    %c96_222 = arith.constant 96 : index
    %c0_223 = arith.constant 0 : index
    %214 = vector.load %arg17[%c96_222, %c0_223] : memref<144x512xbf16, #tpu.memory_space<vmem>>, vector<16x512xbf16>
    tpu.vector_store %arg17[%c96_222, %c0_223], %213 {strides = array<i32>} : memref<144x512xbf16, #tpu.memory_space<vmem>>, vector<16x512xbf16>,
    %c0_224 = arith.constant 0 : index
    %c448 = arith.constant 448 : index
    %215 = vector.load %arg16[%c0_224, %c448] : memref<16x1024xbf16, #tpu.memory_space<vmem>>, vector<16x512xbf16>
    %c112_225 = arith.constant 112 : index
    %c0_226 = arith.constant 0 : index
    %216 = vector.load %arg17[%c112_225, %c0_226] : memref<144x512xbf16, #tpu.memory_space<vmem>>, vector<16x512xbf16>
    tpu.vector_store %arg17[%c112_225, %c0_226], %215 {strides = array<i32>} : memref<144x512xbf16, #tpu.memory_space<vmem>>, vector<16x512xbf16>,
    %c0_227 = arith.constant 0 : index
    %c454_228 = arith.constant 454 : index
    %217 = vector.load %arg16[%c0_227, %c454_228] : memref<16x1024xbf16, #tpu.memory_space<vmem>>, vector<16x512xbf16>
    %c128_229 = arith.constant 128 : index
    %c0_230 = arith.constant 0 : index
    %218 = vector.load %arg17[%c128_229, %c0_230] : memref<144x512xbf16, #tpu.memory_space<vmem>>, vector<16x512xbf16>
    tpu.vector_store %arg17[%c128_229, %c0_230], %217 {strides = array<i32>} : memref<144x512xbf16, #tpu.memory_space<vmem>>, vector<16x512xbf16>,
    %c2_231 = arith.constant 2 : index
    %c0_232 = arith.constant 0 : index
    %c0_233 = arith.constant 0 : index
    %219 = vector.load %arg4[%c2_231, %c0_232, %c0_233] : memref<3x8x144xbf16, #tpu.memory_space<vmem>>, vector<1x8x144xbf16>
    %220 = vector.shape_cast %219 : vector<1x8x144xbf16> to vector<8x144xbf16>
    %c0_234 = arith.constant 0 : index
    %c0_235 = arith.constant 0 : index
    %221 = vector.load %arg17[%c0_234, %c0_235] : memref<144x512xbf16, #tpu.memory_space<vmem>>, vector<144x512xbf16>
    %cst_236 = arith.constant dense<0.000000e+00> : vector<8x512xf32>
    %222 = tpu.matmul %220, %221, %cst_236 {dimension_numbers = #tpu.dot_dimension_numbers<[1], [0], [0], [1], [0, 0, 1, 1], [], []>} : vector<8x144xbf16>, vector<144x512xbf16>, vector<8x512xf32> -> vector<8x512xf32>
    %c3_237 = arith.constant 3 : index
    %c0_238 = arith.constant 0 : index
    %c0_239 = arith.constant 0 : index
    %223 = vector.load %arg9[%c3_237, %c0_238, %c0_239] : memref<4x8x1xf32, #tpu.memory_space<vmem>>, vector<1x8x1xf32>
    %224 = vector.shape_cast %223 : vector<1x8x1xf32> to vector<8x1xf32>
    %225 = vector.broadcast %224 : vector<8x1xf32> to vector<8x512xf32>
    %226 = arith.addf %222, %225 : vector<8x512xf32>
    %c4 = arith.constant 4 : index
    %227 = memref.load %arg13[%c4] : memref<8xf32, #tpu.memory_space<smem>>
    %cst_240 = arith.constant 0.000000e+00 : f32
    %228 = vector.broadcast %cst_240 : f32 to vector<8x512xf32>
    %229 = arith.cmpf ogt, %226, %228 : vector<8x512xf32>
    %230 = vector.broadcast %227 : f32 to vector<8x512xf32>
    %231 = arith.mulf %230, %226 : vector<8x512xf32>
    %232 = arith.select %229, %226, %231 : vector<8x512xi1>, vector<8x512xf32>
    %c24 = arith.constant 24 : index
    %c0_241 = arith.constant 0 : index
    %233 = vector.load %arg18[%c24, %c0_241] : memref<32x512xf32, #tpu.memory_space<vmem>>, vector<8x512xf32>
    tpu.vector_store %arg18[%c24, %c0_241], %232 {strides = array<i32>} : memref<32x512xf32, #tpu.memory_space<vmem>>, vector<8x512xf32>,
    %c0_242 = arith.constant 0 : index
    %c0_243 = arith.constant 0 : index
    %234 = vector.load %arg6[%c0_242, %c0_243] : memref<16x32xf32, #tpu.memory_space<vmem>>, vector<16x32xf32>
    %c0_244 = arith.constant 0 : index
    %c0_245 = arith.constant 0 : index
    %235 = vector.load %arg18[%c0_244, %c0_245] : memref<32x512xf32, #tpu.memory_space<vmem>>, vector<32x512xf32>
    %cst_246 = arith.constant dense<0.000000e+00> : vector<16x512xf32>
    %236 = tpu.matmul %234, %235, %cst_246 {dimension_numbers = #tpu.dot_dimension_numbers<[1], [0], [0], [1], [0, 0, 1, 1], [], []>} : vector<16x32xf32>, vector<32x512xf32>, vector<16x512xf32> -> vector<16x512xf32>
    %237 = vector.broadcast %116 : vector<16x1xf32> to vector<16x512xf32>
    %238 = arith.addf %236, %237 : vector<16x512xf32>
    %c6 = arith.constant 6 : index
    %239 = memref.load %arg13[%c6] : memref<8xf32, #tpu.memory_space<smem>>
    %cst_247 = arith.constant 0.000000e+00 : f32
    %240 = vector.broadcast %cst_247 : f32 to vector<16x512xf32>
    %241 = arith.cmpf ogt, %238, %240 : vector<16x512xf32>
    %242 = vector.broadcast %239 : f32 to vector<16x512xf32>
    %243 = arith.mulf %242, %238 : vector<16x512xf32>
    %244 = arith.select %241, %238, %243 : vector<16x512xi1>, vector<16x512xf32>
    %c0_248 = arith.constant 0 : index
    %c0_249 = arith.constant 0 : index
    %c0_250 = arith.constant 0 : index
    %245 = vector.load %arg14[%c0_248, %c0_249, %c0_250] : memref<1x16x512xf32, #tpu.memory_space<vmem>>, vector<1x16x512xf32>
    %246 = vector.shape_cast %245 : vector<1x16x512xf32> to vector<16x512xf32>
    %247 = vector.shape_cast %244 : vector<16x512xf32> to vector<1x16x512xf32>
    tpu.vector_store %arg14[%c0_248, %c0_249, %c0_250], %247 {strides = array<i32>} : memref<1x16x512xf32, #tpu.memory_space<vmem>>, vector<1x16x512xf32>,
    return
  }
  func.func @transform_0(%arg0: i32) -> (i32, i32, i32) {
    %c0_i32 = arith.constant 0 : i32
    %c0_i32_0 = arith.constant 0 : i32
    %c0_i32_1 = arith.constant 0 : i32
    return %arg0, %c0_i32, %c0_i32_0 : i32, i32, i32
  }
  func.func @transform_1(%arg0: i32) -> (i32, i32) {
    %c0_i32 = arith.constant 0 : i32
    %c0_i32_0 = arith.constant 0 : i32
    %c0_i32_1 = arith.constant 0 : i32
    return %c0_i32, %c0_i32_0 : i32, i32
  }
  func.func @transform_2(%arg0: i32) -> (i32, i32) {
    %c0_i32 = arith.constant 0 : i32
    %c0_i32_0 = arith.constant 0 : i32
    %c0_i32_1 = arith.constant 0 : i32
    return %c0_i32, %c0_i32_0 : i32, i32
  }
  func.func @transform_3(%arg0: i32) -> (i32, i32, i32) {
    %c0_i32 = arith.constant 0 : i32
    %c0_i32_0 = arith.constant 0 : i32
    %c0_i32_1 = arith.constant 0 : i32
    %c0_i32_2 = arith.constant 0 : i32
    return %c0_i32, %c0_i32_0, %c0_i32_1 : i32, i32, i32
  }
  func.func @transform_4(%arg0: i32) -> (i32, i32) {
    %c0_i32 = arith.constant 0 : i32
    %c0_i32_0 = arith.constant 0 : i32
    %c0_i32_1 = arith.constant 0 : i32
    return %c0_i32, %c0_i32_0 : i32, i32
  }
  func.func @transform_5(%arg0: i32) -> (i32, i32) {
    %c0_i32 = arith.constant 0 : i32
    %c0_i32_0 = arith.constant 0 : i32
    %c0_i32_1 = arith.constant 0 : i32
    return %c0_i32, %c0_i32_0 : i32, i32
  }
  func.func @transform_6(%arg0: i32) -> (i32, i32) {
    %c0_i32 = arith.constant 0 : i32
    %c0_i32_0 = arith.constant 0 : i32
    %c0_i32_1 = arith.constant 0 : i32
    return %c0_i32, %c0_i32_0 : i32, i32
  }
  func.func @transform_7(%arg0: i32) -> (i32, i32) {
    %c0_i32 = arith.constant 0 : i32
    %c0_i32_0 = arith.constant 0 : i32
    %c0_i32_1 = arith.constant 0 : i32
    return %c0_i32, %c0_i32_0 : i32, i32
  }
  func.func @transform_8(%arg0: i32) -> (i32, i32, i32) {
    %c0_i32 = arith.constant 0 : i32
    %c0_i32_0 = arith.constant 0 : i32
    %c0_i32_1 = arith.constant 0 : i32
    %c0_i32_2 = arith.constant 0 : i32
    return %c0_i32, %c0_i32_0, %c0_i32_1 : i32, i32, i32
  }
  func.func @transform_9(%arg0: i32) -> (i32, i32) {
    %c0_i32 = arith.constant 0 : i32
    %c0_i32_0 = arith.constant 0 : i32
    %c0_i32_1 = arith.constant 0 : i32
    return %c0_i32, %c0_i32_0 : i32, i32
  }
  func.func @transform_10(%arg0: i32) -> (i32, i32) {
    %c0_i32 = arith.constant 0 : i32
    %c0_i32_0 = arith.constant 0 : i32
    %c0_i32_1 = arith.constant 0 : i32
    return %c0_i32, %c0_i32_0 : i32, i32
  }
  func.func @transform_11(%arg0: i32) -> (i32, i32) {
    %c0_i32 = arith.constant 0 : i32
    %c0_i32_0 = arith.constant 0 : i32
    %c0_i32_1 = arith.constant 0 : i32
    return %c0_i32, %c0_i32_0 : i32, i32
  }
  func.func @transform_12(%arg0: i32) -> i32 {
    %c0_i32 = arith.constant 0 : i32
    %c0_i32_0 = arith.constant 0 : i32
    return %c0_i32 : i32
  }
  func.func @transform_13(%arg0: i32) -> (i32, i32, i32) {
    %c0_i32 = arith.constant 0 : i32
    %c0_i32_0 = arith.constant 0 : i32
    %c0_i32_1 = arith.constant 0 : i32
    return %arg0, %c0_i32, %c0_i32_0 : i32, i32, i32
  }
}

</mosaic_0001>

<bundles_post_ra>
// kernel: tpu_custom_call.1
= control target key start
LH: loop header
LB: loop body
LE: loop exit
PB: predicated region body
PF: predicated region fallthrough
CT: control target
= control target key end

     0   :  { %s6819_s0 = inlined_call_operand.vmem [shape: f32[2,4,256], index: 0, kind: input, shape index: {}]   ;;  %s6820_s1 = inlined_call_operand.vmem [shape: bf16[16,144], index: 1, kind: input, shape index: {}]   ;;  %s6821_s2 = inlined_call_operand.vmem [shape: bf16[8,16], index: 2, kind: input, shape index: {}]   ;;  %s6822_s3 = inlined_call_operand.vmem [shape: bf16[3,8,144], index: 3, kind: input, shape index: {}]   ;;  %s6823_s4 = inlined_call_operand.vmem [shape: f32[16,8], index: 4, kind: input, shape index: {}]   ;;  %s6824_s5 = inlined_call_operand.vmem [shape: f32[16,32], index: 5, kind: input, shape index: {}]   ;;  %s6825_s6 = inlined_call_operand.vmem [shape: f32[16,8], index: 6, kind: input, shape index: {}]   ;;  %s6826_s7 = inlined_call_operand.vmem [shape: f32[16,1], index: 7, kind: input, shape index: {}]   ;;  %s6827_s8 = inlined_call_operand.vmem [shape: f32[4,8,1], index: 8, kind: input, shape index: {}]   ;;  %s6828_s9 = inlined_call_operand.vmem [shape: f32[1,8], index: 9, kind: input, shape index: {}]   ;;  %s6829_s10 = inlined_call_operand.vmem [shape: f32[16,1], index: 10, kind: input, shape index: {}]   ;;  %s6830_s11 = inlined_call_operand.vmem [shape: f32[1,512], index: 11, kind: input, shape index: {}]   ;;  %s6831_s12 = inlined_call_operand.vmem [shape: f32[8], index: 12, kind: input, shape index: {}]   ;;  %s6832_s13 = inlined_call_operand.hbm [shape: f32[2,16,512], index: 13, kind: output, shape index: {}]  }
   0x1   :  { %6898 = sst [smem:[#allocation48_spill]] %s6819_s0 }
   0x2   :  { %6899 = sst [smem:[#allocation49_spill]] %s6820_s1 }
   0x3   :  { %6900 = sst [smem:[#allocation50_spill]] %s6826_s7 }
   0x4   :  { %18 = vsyncpa [#allocation8], 0 }
   0x5   :  { %19 = vsyncpa [#allocation7], 0 }
   0x6   :  { %21 = vsyncpa [#allocation7 + $0x1], 0  ;;  %s5144_s25 = smov 0   ;;  %s5146_s26 = smov 0  }
   0x7   :  { %s5148_s27 = smov 0   ;;  %s5150_s28 = smov 0  }
   0x8 LB: > { %s5165_s29 = sadd.s32 4294967295, %s5042_s28   ;;  %s4011_s30 = sadd.s32 4294967294, %s5042_s28   ;;  %s5042_s28 = sphi %s5150_s28, %s7021_s28   ;;  %s5038_s27 = sphi %s5148_s27, %s7020_s27   ;;  %s5034_s26 = sphi %s5146_s26, %s7019_s26   ;;  %s5030_s25 = sphi %s5144_s25, %s7018_s25  }
   0x9   : > { %s5169_s14 = sadd.s32 1, %s5042_s28   ;;  %s312_s15 = sadd.s32 1, %s5038_s27 }
   0xa   : > { %s309_s16 = ssub.s32 %s5042_s28, %s5169_s14  ;;  %p322_p0 = scmp.ne.s32.totalorder %s5038_s27, %s5034_s26 }
   0xb   : > { %p310_p1 = scmp.eq.s32.totalorder %s309_s16, 0  ;;  %p323_p2 = scmp.eq.s32.totalorder %s5165_s29, 1 }
   0xc   : > { %p328_p3 = scmp.ne.s32.totalorder %s5034_s26, %s5030_s25  ;;  %p329_p4 = scmp.eq.s32.totalorder %s4011_s30, 1 }
   0xd   : > { %s5180_s17 = scalar_select %p310_p1, %s5038_s27, %s312_s15  }
   0xe   : > { %p5182_p5 = por %p323_p2, %p322_p0  ;;  %p5186_p6 = por %p329_p4, %p328_p3 }
   0xf   : > { %p4012_p7 = scmp.ge.s32.totalorder %s5042_s28, 1  ;;  %p336_p8 = scmp.lt.s32.totalorder %s5042_s28, 3 }
  0x10   : > { %p4818_p9 = scmp.eq.s32.totalorder %s5165_s29, 0  ;;  %s381_s22 = sshll.u32 %s6831_s12, 4  ;;  %s382_s22 = int_to_ptr.vmem [resolvable:$true] %s381_s22 }
  0x11   : > { %p337_p10 = pnand %p4012_p7, %p336_p8  ;;  %s5044_s23 = smov [#allocation6]  }
  0x13   : > { %p4810_p11 = pneg %p337_p10  ;;  %402 = sbr.rel (%p337_p10) target bundleno = 1325 (0x52d), region = 72 }
  0x15   : > { %p4811_p12 = pnand %p4818_p9, %p4810_p11 }
  0x17   : > { %4813 = dma.vmem_to_smem (!%p4811_p12), %s382_s22, 16, %s5044_s23, [#allocation8]  }
  0x18   : > { %5021 = dma.done.wait (%p4818_p9), [#allocation8], 16  }
  0x19   : > { %5023 = vsyncadd (%p4818_p9), [#allocation8], 4294967280 }
  0x1a   : > { %409 = sfence }
  0x1b   : > { %p448_p13 = scmp.lt.s32.totalorder %s5165_s29, 1  ;;  %v5045_v0 = vmov 0.0|0.0   ;;  %s6842_s30 = smov 96   ;;  %v5048_v1 = vmov 0.0   ;;  %vm638_vm0 = vcmask 1043456   ;;  %vm941_vm1 = vcmask 793600  }
  0x1c   : > { %985 = vrot.lane.b32.xlu0 %v5045_v0, %s6842_s30  ;;  %s6840_s15 = smov 97   ;;  %455 = vst [vmem:[#allocation2 + $0x8] sm:$0xff] %v5048_v1  ;;  %987 = vrot.lane.b32.xlu1 %v5045_v0, %s6842_s30  ;;  %s6903_s0 = sld [smem:[#allocation48_spill]]  ;;  %vm473_vm2 = vcmask 175152   ;;  %vm482_vm3 = vcmask 437552   ;;  %vm491_vm4 = vcmask 699952  }
  0x1d   : > { %s449_s24 = scalar_select %p448_p13, %s5165_s29, 1  ;;  %930 = vrot.lane.b32.xlu2 %v5045_v0, %s6840_s15  ;;  %456 = vst [vmem:[#allocation2 + $0x10] sm:$0xff] %v5048_v1  ;;  %vm998_vm5 = vcmask 785408   ;;  %vm1055_vm6 = vcmask 777216   ;;  %vm500_vm7 = vcmask 962352   ;;  %vm884_vm8 = vcmask 1039360  }
  0x1e   : > { %457 = vst [vmem:[#allocation2 + $0x18] sm:$0xff] %v5048_v1  ;;  %s6833_s23 = smov 95   ;;  %s6835_s20 = smov 22   ;;  %vm811_vm9 = vcmask 7168   ;;  %vm754_vm10 = vcmask 252928   ;;  %vm697_vm11 = vcmask 261120  }
  0x1f   : > { %s4648_s16 = sshll.u32 %s449_s24, 3  ;;  %458 = vst [vmem:[#allocation2 + $0x20] sm:$0xff] %v5048_v1  ;;  %s6845_s24 = smov 127   ;;  %vm640_vm12 = vcmask 269312   ;;  %vm1310_vm13 = vcmask 130048  }
  0x20   : > { %s6837_s21 = smov 38   ;;  %841 = vst [vmem:[#allocation4 + $0x90] sm:$0xff] %v5045_v0  ;;  %s6915_s7 = sld [smem:[#allocation50_spill]] }
  0x21   : > { %842 = vst [vmem:[#allocation4 + $0x98] sm:$0xff] %v5045_v0  ;;  %s6916_s1 = sld [smem:[#allocation49_spill]] }
  0x22   : > { %s5211_s22 = scalar_lea.vmem %s6903_s0, %s4648_s16  ;;  %s6847_s16 = smov 6  }
  0x23   : > { %v466_v2 = vld [vmem:[%s5211_s22] sm:$0xf]  ;;  %v534_v17 = vld [vmem:[%s5211_s22 + $0x4] sm:$0xf]  ;;  %s6867_s0 = smov 122  }
  0x24   : > { %928 = vrot.lane.b32.xlu1 %v5045_v0, %s6840_s15  ;;  %468 = vst [vmem:[#allocation1] ss:$2 sm:$0xff] %v466_v2  ;;  %v475_v3 = vld [vmem:[%s5211_s22] sm:$0xf]  ;;  %v542_v19 = vld [vmem:[%s5211_s22 + $0x4] sm:$0xf] }
  0x25   : > { %1042 = vrot.lane.b32.xlu2 %v5045_v0, %s6833_s23  ;;  %v484_v5 = vld [vmem:[%s5211_s22] sm:$0xf]  ;;  %v550_v21 = vld [vmem:[%s5211_s22 + $0x4] sm:$0xf] }
  0x26   : > { %v493_v7 = vld [vmem:[%s5211_s22] sm:$0xf]  ;;  %v558_v23 = vld [vmem:[%s5211_s22 + $0x4] sm:$0xf] }
  0x27   : > { %v502_v9 = vld [vmem:[%s5211_s22] sm:$0xf]  ;;  %v566_v26 = vld [vmem:[%s5211_s22 + $0x4] sm:$0xf] }
  0x28   : > { %v510_v11 = vld [vmem:[%s5211_s22] sm:$0xf]  ;;  %v574_v29 = vld [vmem:[%s5211_s22 + $0x4] sm:$0xf] }
  0x29   : > { %v518_v13 = vld [vmem:[%s5211_s22] sm:$0xf]  ;;  %v582_v33 = vld [vmem:[%s5211_s22 + $0x4] sm:$0xf] }
  0x2a   : > { %v526_v15 = vld [vmem:[%s5211_s22] sm:$0xf]  ;;  %v590_v42 = vld [vmem:[%s5211_s22 + $0x4] sm:$0xf]  ;;  %s6909_s22 = smov 118  }
  0x2b   : > { %v469_v4 = vld.sshfl [vmem:[#allocation1] sm:$0xff pattern:$0x75316420] }
  0x2c   : > { %873 = vrot.lane.b32.xlu1 %v5045_v0, %s6845_s24  ;;  %470 = vrot.lane.b32.xlu0 %v469_v4, %s6847_s16  ;;  %477 = vst [vmem:[#allocation1] ss:$2 sm:$0xff] %v475_v3 }
  0x33   : > { %v478_v6 = vld.sshfl [vmem:[#allocation1] sm:$0xff pattern:$0x75316420] }
  0x34   : > { %926 = vrot.lane.b32.xlu1 %v5045_v0, %s6840_s15  ;;  %1044 = vrot.lane.b32.xlu0 %v5045_v0, %s6833_s23  ;;  %486 = vst [vmem:[#allocation1] ss:$2 sm:$0xff] %v484_v5  ;;  %s6836_s23 = smov 54  }
  0x35   : > { %479 = vrot.lane.b32.xlu2 %v478_v6, %s6835_s20  ;;  %s6838_s20 = smov 70  }
  0x3b   : > { %v487_v8 = vld.sshfl [vmem:[#allocation1] sm:$0xff pattern:$0x75316420] }
  0x3c   : > { %869 = vrot.lane.b32.xlu1 %v5045_v0, %s6845_s24  ;;  %871 = vrot.lane.b32.xlu0 %v5045_v0, %s6845_s24  ;;  %495 = vst [vmem:[#allocation1] ss:$2 sm:$0xff] %v493_v7 }
  0x3d   : > { %488 = vrot.lane.b32.xlu2 %v487_v8, %s6837_s21  ;;  %s5057_s21 = smov 102  }
  0x43   : > { %v496_v10 = vld.sshfl [vmem:[#allocation1] sm:$0xff pattern:$0x75316420] }
  0x44   : > { %497 = vrot.lane.b32.xlu0 %v496_v10, %s6836_s23  ;;  %504 = vst [vmem:[#allocation1] ss:$2 sm:$0xff] %v502_v9  ;;  %s5056_s23 = smov 86  }
  0x45   : > { %983 = vrot.lane.b32.xlu2 %v5045_v0, %s6842_s30 }
  0x4b   : > { %v505_v12 = vld.sshfl [vmem:[#allocation1] sm:$0xff pattern:$0x75316420] }
  0x4c   : > { %506 = vrot.lane.b32.xlu0 %v505_v12, %s6838_s20  ;;  %512 = vst [vmem:[#allocation1] ss:$2 sm:$0xff] %v510_v11  ;;  %s6851_s20 = smov 1  }
  0x4d   : > { %932 = vrot.lane.b32.xlu2 %v5045_v0, %s6840_s15  ;;  %s6844_s15 = smov 118  }
  0x53   : > { %v513_v14 = vld.sshfl [vmem:[#allocation1] sm:$0xff pattern:$0x75316420] }
  0x54   : > { %989 = vrot.lane.b32.xlu0 %v5045_v0, %s6842_s30  ;;  %520 = vst [vmem:[#allocation1] ss:$2 sm:$0xff] %v518_v13  ;;  %s6904_s30 = smov 22  }
  0x55   : > { %514 = vrot.lane.b32.xlu2 %v513_v14, %s5056_s23 }
  0x5b   : > { %v521_v16 = vld.sshfl [vmem:[#allocation1] sm:$0xff pattern:$0x75316420] }
  0x5c   : > { %522 = vrot.lane.b32.xlu0 %v521_v16, %s5057_s21  ;;  %528 = vst [vmem:[#allocation1] ss:$2 sm:$0xff] %v526_v15 }
  0x5d   : > { %798 = vrot.lane.b32.xlu2 %v5045_v0, %s6851_s20 }
  0x63   : > { %v529_v18 = vld.sshfl [vmem:[#allocation1] sm:$0xff pattern:$0x75316420] }
  0x64   : > { %530 = vrot.lane.b32.xlu1 %v529_v18, %s6844_s15  ;;  %536 = vst [vmem:[#allocation1] ss:$2 sm:$0xff] %v534_v17  ;;  %800 = vrot.lane.b32.xlu0 %v5045_v0, %s6851_s20  ;;  %s6905_s15 = smov 38  }
  0x65   : > { %875 = vrot.lane.b32.xlu2 %v5045_v0, %s6845_s24  ;;  %s5060_s24 = smov 31  }
  0x6b   : > { %v537_v20 = vld.sshfl [vmem:[#allocation1] sm:$0xff pattern:$0x75316420] }
  0x6c   : > { %538 = vrot.lane.b32.xlu1 %v537_v20, %s6847_s16  ;;  %544 = vst [vmem:[#allocation1] ss:$2 sm:$0xff] %v542_v19  ;;  %s6906_s16 = smov 54  }
  0x73   : > { %v545_v22 = vld.sshfl [vmem:[#allocation1] sm:$0xff pattern:$0x75316420] }
  0x74   : > { %546 = vrot.lane.b32.xlu0 %v545_v22, %s6904_s30  ;;  %552 = vst [vmem:[#allocation1] ss:$2 sm:$0xff] %v550_v21  ;;  %s6907_s30 = smov 70  }
  0x77   : > { %v931_v24 = vpop.permute.xlu2 %930 }
  0x78   : > { %v938_v37 = vrot.slane %v931_v24, 4 }
  0x7b   : > { %v553_v25 = vld.sshfl [vmem:[#allocation1] sm:$0xff pattern:$0x75316420] }
  0x7c   : > { %554 = vrot.lane.b32.xlu1 %v553_v25, %s6905_s15  ;;  %560 = vst [vmem:[#allocation1] ss:$2 sm:$0xff] %v558_v23  ;;  %743 = vrot.lane.b32.xlu0 %v5045_v0, %s5060_s24  ;;  %s6908_s15 = smov 95  }
  0x7f   : > { %v1043_v28 = vpop.permute.xlu2 %1042 }
  0x80   : > { %v1051_v53 = vrot.slane %v1043_v28, 4 }
  0x83   : > { %v561_v27 = vld.sshfl [vmem:[#allocation1] sm:$0xff pattern:$0x75316420] }
  0x84   : > { %562 = vrot.lane.b32.xlu2 %v561_v27, %s6906_s16  ;;  %568 = vst [vmem:[#allocation1] ss:$2 sm:$0xff] %v566_v26  ;;  %s6849_s16 = smov 33  }
  0x8b   : > { %v569_v30 = vld.sshfl [vmem:[#allocation1] sm:$0xff pattern:$0x75316420] }
  0x8c   : > { %570 = vrot.lane.b32.xlu1 %v569_v30, %s6907_s30  ;;  %576 = vst [vmem:[#allocation1] ss:$2 sm:$0xff] %v574_v29 }
  0x8e   : > { %v5268_v31 = vpop.permute.xlu1 %987  ;;  %v986_v35 = vpop.permute.xlu0 %985 }
  0x8f   : > { %v480_v32 = vpop.permute.xlu2 %479  ;;  %v994_v41 = vrot.slane %v986_v35, 4  ;;  %v995_v43 = vrot.slane %v5268_v31, 4 }
  0x91   : > { %v1002_v46 = vsel %vm638_vm0, %v994_v41, %v995_v43 }
  0x92   : > { %v1003_v49 = vsel %vm998_vm5, %v986_v35, %v1002_v46 }
  0x93   : > { %v577_v34 = vld.sshfl [vmem:[#allocation1] sm:$0xff pattern:$0x75316420]  ;;  %1012 = vst [vmem:[#allocation4 + $0xf0] sm:$0xff] %v1003_v49  ;;  %v6871_v49 = vmov 0  }
  0x94   : > { %584 = vst [vmem:[#allocation1] ss:$2 sm:$0xff] %v582_v33  ;;  %578 = vrot.lane.b32.xlu1 %v577_v34, %s5056_s23  ;;  %s6852_s23 = smov 32   ;;  %4883 = vset.pattern.permute.xlu2 %v6871_v49 }
  0x95   : > { %1522 = vst [vmem:[#allocation3] sm:$0xff] %v6871_v49  ;;  %4882 = vset.pattern.permute.xlu1 %v6871_v49  ;;  %4959 = vset.pattern.permute.xlu0 %v6871_v49 }
  0x96   : > { %v929_v36 = vpop.permute.xlu1 %928  ;;  %1523 = vst [vmem:[#allocation3 + $0x20] sm:$0xff] %v6871_v49 }
  0x97   : > { %v489_v38 = vpop.permute.xlu2 %488  ;;  %v937_v39 = vrot.slane %v929_v36, 4  ;;  %1528 = vst [vmem:[#allocation3 + $0x18] sm:$0xff] %v6871_v49 }
  0x98   : > { %1529 = vst [vmem:[#allocation3 + $0x38] sm:$0xff] %v6871_v49 }
  0x99   : > { %v945_v40 = vsel %vm638_vm0, %v937_v39, %v938_v37 }
  0x9a   : > { %v946_v44 = vsel %vm941_vm1, %v929_v36, %v945_v40 }
  0x9b   : > { %955 = vst [vmem:[#allocation4 + $0xd0] sm:$0xff] %v946_v44  ;;  %v585_v45 = vld.sshfl [vmem:[#allocation1] sm:$0xff pattern:$0x75316420] }
  0x9c   : > { %586 = vrot.lane.b32.xlu2 %v585_v45, %s5057_s21  ;;  %592 = vst [vmem:[#allocation1] ss:$2 sm:$0xff] %v590_v42  ;;  %1040 = vrot.lane.b32.xlu1 %v5045_v0, %s6908_s15  ;;  %s6910_s21 = smov 96  }
  0x9e   : > { %v471_v47 = vpop.permute.xlu0 %470  ;;  %v874_v62 = vpop.permute.xlu1 %873 }
  0x9f   : > { %v5282_v48 = vpop.permute.xlu2 %983  ;;  %474 = vst.msk [vmem:[#allocation2 + $0x8] sm:$0xf] %vm473_vm2, %v471_v47  ;;  %v881_v2 = vrot.slane %v874_v62, 4 }
  0xa0   : > { %483 = vst.msk [vmem:[#allocation2 + $0x8] sm:$0xf] %vm482_vm3, %v480_v32 }
  0xa1   : > { %492 = vst.msk [vmem:[#allocation2 + $0x8] sm:$0xf] %vm491_vm4, %v489_v38 }
  0xa3   : > { %v593_v50 = vld.sshfl [vmem:[#allocation1] sm:$0xff pattern:$0x75316420] }
  0xa4   : > { %741 = vrot.lane.b32.xlu2 %v5045_v0, %s5060_s24  ;;  %594 = vrot.lane.b32.xlu0 %v593_v50, %s6909_s22  ;;  %s6911_s22 = smov 97  }
  0xa6   : > { %v5291_v51 = vpop.permute.xlu0 %1044  ;;  %v5315_v12 = vpop.permute.xlu1 %926 }
  0xa7   : > { %v933_v52 = vpop.permute.xlu2 %932  ;;  %v1052_v54 = vrot.slane %v5291_v51, 4 }
  0xa8   : > { %v939_v55 = vrot.slane %v933_v52, 4 }
  0xa9   : > { %v1059_v58 = vsel %vm638_vm0, %v1051_v53, %v1052_v54 }
  0xaa   : > { %v947_v56 = vsel %vm638_vm0, %v938_v37, %v939_v55  ;;  %v1060_v61 = vsel %vm1055_vm6, %v1043_v28, %v1059_v58 }
  0xab   : > { %v948_v57 = vsel %vm941_vm1, %v931_v24, %v947_v56  ;;  %1069 = vst [vmem:[#allocation4 + $0x110] sm:$0xff] %v1060_v61 }
  0xac   : > { %956 = vst [vmem:[#allocation4 + $0xd8] sm:$0xff] %v948_v57  ;;  %1046 = vrot.lane.b32.xlu2 %v5045_v0, %s6908_s15  ;;  %686 = vrot.lane.b32.xlu0 %v5045_v0, %s6852_s23 }
  0xae   : > { %v872_v59 = vpop.permute.xlu0 %871  ;;  %v5327_v18 = vpop.permute.xlu1 %869 }
  0xaf   : > { %v515_v60 = vpop.permute.xlu2 %514  ;;  %v880_v63 = vrot.slane %v872_v59, 4 }
  0xb1   : > { %v888_v3 = vsel %vm638_vm0, %v880_v63, %v881_v2  ;;  %v1110_v63 = vld [vmem:[%s6915_s7 + $0x8] sm:$0xff] }
  0xb2   : > { %v889_v6 = vsel %vm884_vm8, %v872_v59, %v888_v3 }
  0xb3   : > { %898 = vst [vmem:[#allocation4 + $0xb0] sm:$0xff] %v889_v6 }
  0xb4   : > { %684 = vrot.lane.b32.xlu2 %v5045_v0, %s6852_s23 }
  0xb6   : > { %v498_v4 = vpop.permute.xlu0 %497 }
  0xb7   : > { %v799_v5 = vpop.permute.xlu2 %798  ;;  %501 = vst.msk [vmem:[#allocation2 + $0x8] sm:$0xf] %vm500_vm7, %v498_v4 }
  0xb8   : > { %v807_v20 = vrot.slane %v799_v5, 4 }
  0xbc   : > { %802 = vrot.lane.b32.xlu2 %v5045_v0, %s6851_s20 }
  0xbe   : > { %v827_v7 = vld [vmem:[#allocation2 + $0x8] sm:$0xff]  ;;  %v507_v8 = vpop.permute.xlu0 %506 }
  0xbf   : > { %509 = vst.msk [vmem:[#allocation2 + $0x10] sm:$0xf] %vm473_vm2, %v507_v8  ;;  %v780_v9 = vpack.c.bf16 %v827_v7, %v5048_v1  ;;  %v876_v10 = vpop.permute.xlu2 %875 }
  0xc0   : > { %517 = vst.msk [vmem:[#allocation2 + $0x10] sm:$0xf] %vm482_vm3, %v515_v60  ;;  %v882_v11 = vrot.slane %v876_v10, 4 }
  0xc1   : > { %792 = vrot.lane.b32.xlu0 %v780_v9, %s6851_s20 }
  0xc2   : > { %v890_v13 = vsel %vm638_vm0, %v881_v2, %v882_v11 }
  0xc3   : > { %v891_v14 = vsel %vm884_vm8, %v874_v62, %v890_v13 }
  0xc4   : > { %626 = vrot.lane.b32.xlu2 %v5045_v0, %s6849_s16  ;;  %899 = vst [vmem:[#allocation4 + $0xb8] sm:$0xff] %v891_v14 }
  0xc6   : > { %v990_v15 = vpop.permute.xlu0 %989 }
  0xc7   : > { %v996_v16 = vrot.slane %v990_v15, 4 }
  0xc9   : > { %v1004_v1 = vsel %vm638_vm0, %v995_v43, %v996_v16  ;;  %735 = vrot.lane.b32.xlu0 %v780_v9, %s5060_s24 }
  0xca   : > { %v1005_v17 = vsel %vm998_vm5, %v5268_v31, %v1004_v1 }
  0xcb   : > { %1013 = vst [vmem:[#allocation4 + $0xf8] sm:$0xff] %v1005_v17 }
  0xce   : > { %v523_v19 = vpop.permute.xlu0 %522 }
  0xcf   : > { %525 = vst.msk [vmem:[#allocation2 + $0x10] sm:$0xf] %vm491_vm4, %v523_v19 }
  0xd1   : > { %678 = vrot.lane.b32.xlu0 %v780_v9, %s6852_s23 }
  0xd6   : > { %v531_v21 = vpop.permute.xlu1 %530  ;;  %v5333_v22 = vpop.permute.xlu0 %800 }
  0xd7   : > { %533 = vst.msk [vmem:[#allocation2 + $0x10] sm:$0xf] %vm500_vm7, %v531_v21  ;;  %v808_v23 = vrot.slane %v5333_v22, 4  ;;  %v993_v21 = vrot.slane %v5282_v48, 4 }
  0xd9   : > { %620 = vrot.lane.b32.xlu0 %v780_v9, %s6849_s16  ;;  %v815_v24 = vsel %vm638_vm0, %v807_v20, %v808_v23  ;;  %s6912_s16 = smov 127  }
  0xda   : > { %v816_v25 = vsel %vm811_vm9, %v799_v5, %v815_v24 }
  0xdb   : > { %825 = vst [vmem:[#allocation4 + $0x70] sm:$0xff] %v816_v25 }
  0xde   : > { %v828_v26 = vld [vmem:[#allocation2 + $0x10] sm:$0xff]  ;;  %v539_v27 = vpop.permute.xlu1 %538  ;;  %v563_v30 = vpop.permute.xlu2 %562 }
  0xdf   : > { %v835_v28 = vpack.c.bf16 %v828_v26, %v827_v7  ;;  %541 = vst.msk [vmem:[#allocation2 + $0x18] sm:$0xf] %vm473_vm2, %v539_v27 }
  0xe1   : > { %839 = vst [vmem:[#allocation4 + $0x80] sm:$0xff] %v835_v28  ;;  %979 = vrot.lane.b32.xlu1 %v835_v28, %s6910_s21  ;;  %922 = vrot.lane.b32.xlu2 %v835_v28, %s6911_s22 }
  0xe2   : > { %1036 = vrot.lane.b32.xlu0 %v835_v28, %s6908_s15 }
  0xe6   : > { %v547_v29 = vpop.permute.xlu0 %546 }
  0xe7   : > { %549 = vst.msk [vmem:[#allocation2 + $0x18] sm:$0xf] %vm482_vm3, %v547_v29 }
  0xe9   : > { %865 = vrot.lane.b32.xlu1 %v835_v28, %s6912_s16 }
  0xee   : > { %v555_v31 = vpop.permute.xlu1 %554  ;;  %v5349_v35 = vpop.permute.xlu0 %743 }
  0xef   : > { %557 = vst.msk [vmem:[#allocation2 + $0x18] sm:$0xf] %vm491_vm4, %v555_v31  ;;  %v751_v36 = vrot.slane %v5349_v35, 4 }
  0xf0   : > { %565 = vst.msk [vmem:[#allocation2 + $0x18] sm:$0xf] %vm500_vm7, %v563_v30 }
  0xf6   : > { %v587_v32 = vpop.permute.xlu2 %586 }
  0xf7   : > { %v773_v33 = vld [vmem:[#allocation2 + $0x18] sm:$0xff] }
  0xf8   : > { %v781_v34 = vpack.c.bf16 %v773_v33, %v828_v26 }
  0xfa   : > { %794 = vrot.lane.b32.xlu1 %v781_v34, %s6851_s20  ;;  %s6913_s20 = smov 33  }
  0xfe   : > { %v742_v37 = vpop.permute.xlu2 %741  ;;  %v571_v38 = vpop.permute.xlu1 %570 }
  0xff   : > { %v750_v39 = vrot.slane %v742_v37, 4  ;;  %573 = vst.msk [vmem:[#allocation2 + $0x20] sm:$0xf] %vm473_vm2, %v571_v38 }
 0x101   : > { %v758_v40 = vsel %vm638_vm0, %v750_v39, %v751_v36 }
 0x102   : > { %737 = vrot.lane.b32.xlu1 %v781_v34, %s5060_s24  ;;  %v759_v41 = vsel %vm754_vm10, %v742_v37, %v758_v40 }
 0x103   : > { %768 = vst [vmem:[#allocation4 + $0x50] sm:$0xff] %v759_v41 }
 0x106   : > { %v1047_v42 = vpop.permute.xlu2 %1046  ;;  %v579_v43 = vpop.permute.xlu1 %578 }
 0x107   : > { %v1053_v44 = vrot.slane %v1047_v42, 4  ;;  %581 = vst.msk [vmem:[#allocation2 + $0x20] sm:$0xf] %vm482_vm3, %v579_v43 }
 0x108   : > { %589 = vst.msk [vmem:[#allocation2 + $0x20] sm:$0xf] %vm491_vm4, %v587_v32 }
 0x109   : > { %v1061_v45 = vsel %vm638_vm0, %v1052_v54, %v1053_v44  ;;  %v4681_v44 = vld [vmem:[#allocation4 + $0xec] sm:$0xf0] }
 0x10a   : > { %680 = vrot.lane.b32.xlu1 %v781_v34, %s6852_s23  ;;  %v1062_v46 = vsel %vm1055_vm6, %v5291_v51, %v1061_v45 }
 0x10b   : > { %1070 = vst [vmem:[#allocation4 + $0x118] sm:$0xff] %v1062_v46 }
 0x10e   : > { %v685_v47 = vpop.permute.xlu2 %684  ;;  %v5404_v2 = vpop.permute.xlu1 %1040 }
 0x10f   : > { %v693_v55 = vrot.slane %v685_v47, 4 }
 0x112   : > { %622 = vrot.lane.b32.xlu1 %v781_v34, %s6913_s20  ;;  %v879_v34 = vrot.slane %v5327_v18, 4 }
 0x116   : > { %v803_v50 = vpop.permute.xlu2 %802  ;;  %v595_v52 = vpop.permute.xlu0 %594 }
 0x117   : > { %v809_v53 = vrot.slane %v803_v50, 4  ;;  %597 = vst.msk [vmem:[#allocation2 + $0x20] sm:$0xf] %vm500_vm7, %v595_v52  ;;  %v4144_v52 = vld [vmem:[#allocation4 + $0xf0] sm:$0xf0]  ;;  %vm1708_vm7 = vcmask 523264  }
 0x119   : > { %v817_v51 = vsel %vm638_vm0, %v808_v23, %v809_v53 }
 0x11a   : > { %v818_v54 = vsel %vm811_vm9, %v5333_v22, %v817_v51 }
 0x11b   : > { %826 = vst [vmem:[#allocation4 + $0x78] sm:$0xff] %v818_v54 }
 0x11e   : > { %v1017_v56 = vld [vmem:[#allocation2 + $0x20] sm:$0xff]  ;;  %v5378_v57 = vpop.permute.xlu0 %686  ;;  %v5406_v6 = vpop.permute.xlu2 %626 }
 0x11f   : > { %v1025_v58 = vpack.c.bf16 %v1017_v56, %v773_v33  ;;  %v694_v59 = vrot.slane %v5378_v57, 4  ;;  %v782_v62 = vpack.c.bf16 %v1017_v56, %v1017_v56 }
 0x121   : > { %1038 = vrot.lane.b32.xlu1 %v1025_v58, %s6908_s15  ;;  %981 = vrot.lane.b32.xlu2 %v1025_v58, %s6910_s21  ;;  %v701_v60 = vsel %vm638_vm0, %v693_v55, %v694_v59  ;;  %840 = vst [vmem:[#allocation4 + $0x88] sm:$0xff] %v1025_v58  ;;  %s6914_s15 = smov 1   ;;  %s6853_s21 = smov 124  }
 0x122   : > { %924 = vrot.lane.b32.xlu0 %v1025_v58, %s6911_s22  ;;  %v702_v61 = vsel %vm697_vm11, %v685_v47, %v701_v60  ;;  %s6865_s22 = smov 66  }
 0x123   : > { %711 = vst [vmem:[#allocation4 + $0x30] sm:$0xff] %v702_v61 }
 0x129   : > { %688 = vrot.lane.b32.xlu1 %v5045_v0, %s6852_s23  ;;  %867 = vrot.lane.b32.xlu2 %v1025_v58, %s6912_s16  ;;  %s6863_s16 = smov 62  }
 0x12a   : > { %628 = vrot.lane.b32.xlu0 %v5045_v0, %s6913_s20 }
 0x131   : > { %745 = vrot.lane.b32.xlu2 %v5045_v0, %s5060_s24  ;;  %796 = vrot.lane.b32.xlu1 %v782_v62, %s6914_s15  ;;  %s6869_s15 = smov 64  }
 0x132   : > { %630 = vrot.lane.b32.xlu0 %v5045_v0, %s6913_s20 }
 0x133   : > { %v793_v4 = vpop.permute.xlu0 %792 }
 0x134   : > { %v804_v0 = vrot.slane %v793_v4, 4 }
 0x139   : > { %1118 = vperm.xlu2 %4883, %v1110_v63   ;;  %739 = vrot.lane.b32.xlu1 %v782_v62, %s5060_s24  ;;  %s6857_s24 = smov 126  }
 0x13a   : > { %682 = vrot.lane.b32.xlu0 %v782_v62, %s6852_s23  ;;  %s6861_s23 = smov 58  }
 0x13b   : > { %v736_v9 = vpop.permute.xlu0 %735  ;;  %v5415_v13 = vpop.permute.xlu2 %922 }
 0x13c   : > { %v747_v15 = vrot.slane %v736_v9, 4 }
 0x141   : > { %624 = vrot.lane.b32.xlu2 %v782_v62, %s6913_s20  ;;  %s6855_s20 = smov 4  }
 0x143   : > { %v679_v17 = vpop.permute.xlu0 %678 }
 0x144   : > { %v690_v25 = vrot.slane %v679_v17, 4 }
 0x14b   : > { %v621_v32 = vpop.permute.xlu0 %620 }
 0x14c   : > { %v632_v40 = vrot.slane %v621_v32, 4 }
 0x153   : > { %v980_v3 = vpop.permute.xlu1 %979 }
 0x154   : > { %v991_v22 = vrot.slane %v980_v3, 4  ;;  %v1037_v56 = vpop.permute.xlu0 %1036 }
 0x15b   : > { %v866_v5 = vpop.permute.xlu1 %865 }
 0x15c   : > { %v877_v37 = vrot.slane %v866_v5, 4 }
 0x16c   : > { %v5408_v7 = vpop.permute.xlu1 %794 }
 0x16d   : > { %v805_v8 = vrot.slane %v5408_v7, 4 }
 0x16f   : > { %v810_v10 = vsel %vm638_vm0, %v804_v0, %v805_v8 }
 0x170   : > { %v812_v11 = vsel %vm811_vm9, %v793_v4, %v810_v10  ;;  %v1048_v4 = vrot.slane %v1037_v56, 4  ;;  %v934_v10 = vrot.slane %v5415_v13, 4 }
 0x171   : > { %823 = vst [vmem:[#allocation4 + $0x60] sm:$0xff] %v812_v11 }
 0x174   : > { %v5417_v14 = vpop.permute.xlu1 %737 }
 0x175   : > { %v748_v16 = vrot.slane %v5417_v14, 4 }
 0x177   : > { %v753_v1 = vsel %vm638_vm0, %v747_v15, %v748_v16 }
 0x178   : > { %v755_v19 = vsel %vm754_vm10, %v736_v9, %v753_v1  ;;  %v936_v9 = vrot.slane %v5315_v12, 4 }
 0x179   : > { %766 = vst [vmem:[#allocation4 + $0x40] sm:$0xff] %v755_v19 }
 0x17b   : > { %v982_v20 = vpop.permute.xlu2 %981 }
 0x17c   : > { %v992_v23 = vrot.slane %v982_v20, 4  ;;  %v5425_v24 = vpop.permute.xlu1 %680 }
 0x17d   : > { %v691_v26 = vrot.slane %v5425_v24, 4 }
 0x17e   : > { %v997_v27 = vsel %vm638_vm0, %v991_v22, %v992_v23  ;;  %v1000_v28 = vsel %vm638_vm0, %v992_v23, %v993_v21 }
 0x17f   : > { %v999_v29 = vsel %vm998_vm5, %v980_v3, %v997_v27  ;;  %v1001_v30 = vsel %vm998_vm5, %v982_v20, %v1000_v28  ;;  %v696_v31 = vsel %vm638_vm0, %v690_v25, %v691_v26  ;;  %v1050_v3 = vrot.slane %v5404_v2, 4 }
 0x180   : > { %1010 = vst [vmem:[#allocation4 + $0xe0] sm:$0xff] %v999_v29  ;;  %v698_v48 = vsel %vm697_vm11, %v679_v17, %v696_v31  ;;  %v635_v27 = vrot.slane %v5406_v6, 4  ;;  %v4685_v29 = vld [vmem:[#allocation4 + $0x10c] sm:$0xf0] }
 0x181   : > { %1011 = vst [vmem:[#allocation4 + $0xe8] sm:$0xff] %v1001_v30  ;;  %v4160_v30 = vld [vmem:[#allocation4 + $0x110] sm:$0xf0] }
 0x182   : > { %709 = vst [vmem:[#allocation4 + $0x20] sm:$0xff] %v698_v48 }
 0x183   : > { %v868_v33 = vpop.permute.xlu2 %867 }
 0x184   : > { %v878_v38 = vrot.slane %v868_v33, 4  ;;  %v5437_v39 = vpop.permute.xlu1 %622 }
 0x185   : > { %v633_v41 = vrot.slane %v5437_v39, 4 }
 0x186   : > { %v883_v42 = vsel %vm638_vm0, %v877_v37, %v878_v38  ;;  %v886_v43 = vsel %vm638_vm0, %v878_v38, %v879_v34  ;;  %v4024_v34 = vld [vmem:[%s6916_s1 + $0x8] sm:$0xf0] }
 0x187   : > { %v885_v45 = vsel %vm884_vm8, %v866_v5, %v883_v42  ;;  %v887_v46 = vsel %vm884_vm8, %v868_v33, %v886_v43  ;;  %v639_v47 = vsel %vm638_vm0, %v632_v40, %v633_v41  ;;  %v4142_v18 = vld [vmem:[#allocation4 + $0xe0] sm:$0xf]  ;;  %v4679_v50 = vld [vmem:[#allocation4 + $0xe4] sm:$0xf]  ;;  %v4649_v33 = vld [vmem:[%s6916_s1 + $0x4] sm:$0xf] }
 0x188   : > { %896 = vst [vmem:[#allocation4 + $0xa0] sm:$0xff] %v885_v45  ;;  %v641_v53 = vsel %vm640_vm12, %v621_v32, %v639_v47  ;;  %v4143_v51 = vor.u32 %v4681_v44, %v4142_v18  ;;  %v4147_v54 = vor.u32 %v4679_v50, %v4144_v52  ;;  %v4150_v48 = vld [vmem:[#allocation4 + $0xe8] sm:$0xf]  ;;  %v4682_v32 = vld [vmem:[#allocation4 + $0xf4] sm:$0xf0]  ;;  %vm1661_vm8 = vcmask 539648  }
 0x189   : > { %897 = vst [vmem:[#allocation4 + $0xa8] sm:$0xff] %v887_v46  ;;  %v4677_v40 = vld [vmem:[#allocation4 + $0xcc] sm:$0xf0]  ;;  %v4128_v42 = vld [vmem:[#allocation4 + $0xd0] sm:$0xf0]  ;;  %v4151_v52 = vor.u32 %v4682_v32, %v4150_v48 }
 0x18a   : > { %652 = vst [vmem:[#allocation4] sm:$0xff] %v641_v53  ;;  %1314 = vmatpush.bf16.msra.mxu0 %v4143_v51  ;;  %1342 = vmatpush.bf16.msra.mxu2 %v4147_v54  ;;  %v4686_v44 = vld [vmem:[#allocation4 + $0x114] sm:$0xf0]  ;;  %v5488_v51 = vor.u32 %v4649_v33, %v4024_v34  ;;  %v4102_v32 = vld [vmem:[#allocation4 + $0x88] sm:$0xf] }
 0x18b   : > { %v746_v55 = vpop.permute.xlu2 %745  ;;  %v4078_v34 = vld [vmem:[#allocation4 + $0x60] sm:$0xf] }
 0x18c   : > { %v752_v58 = vrot.slane %v746_v55, 4 }
 0x18e   : > { %v760_v60 = vsel %vm638_vm0, %v751_v36, %v752_v58 }
 0x18f   : > { %v761_v61 = vsel %vm754_vm10, %v5349_v35, %v760_v60  ;;  %v4671_v60 = vld [vmem:[#allocation4 + $0xa4] sm:$0xf] }
 0x190   : > { %769 = vst [vmem:[#allocation4 + $0x58] sm:$0xff] %v761_v61  ;;  %v4152_v61 = vld [vmem:[#allocation4 + $0xf8] sm:$0xf0] }
 0x193   : > { %v1039_v62 = vpop.permute.xlu1 %1038  ;;  %v5451_v63 = vpop.permute.xlu2 %1118 }
 0x194   : > { %v1049_v5 = vrot.slane %v1039_v62, 4  ;;  %v925_v0 = vpop.permute.xlu0 %924 }
 0x195   : > { %v935_v11 = vrot.slane %v925_v0, 4 }
 0x196   : > { %v1054_v15 = vsel %vm638_vm0, %v1048_v4, %v1049_v5  ;;  %v1057_v36 = vsel %vm638_vm0, %v1049_v5, %v1050_v3  ;;  %v4673_v4 = vld [vmem:[#allocation4 + $0xac] sm:$0xf0] }
 0x197   : > { %v1056_v35 = vsel %vm1055_vm6, %v1037_v56, %v1054_v15  ;;  %v1058_v1 = vsel %vm1055_vm6, %v1039_v62, %v1057_v36  ;;  %v940_v17 = vsel %vm638_vm0, %v934_v10, %v935_v11  ;;  %v943_v2 = vsel %vm638_vm0, %v935_v11, %v936_v9  ;;  %v4112_v10 = vld [vmem:[#allocation4 + $0xb0] sm:$0xf0]  ;;  %v1109_v36 = vld [vmem:[%s6915_s7] sm:$0xff]  ;;  %s6942_s7 = smov 64  }
 0x198   : > { %1067 = vst [vmem:[#allocation4 + $0x100] sm:$0xff] %v1056_v35  ;;  %v942_v19 = vsel %vm941_vm1, %v5415_v13, %v940_v17  ;;  %v944_v12 = vsel %vm941_vm1, %v925_v0, %v943_v2  ;;  %v4678_v0 = vld [vmem:[#allocation4 + $0xd4] sm:$0xf0]  ;;  %v4115_v17 = vor.u32 %v4671_v60, %v4112_v10  ;;  %v4669_v2 = vld [vmem:[#allocation4 + $0x8c] sm:$0xf0]  ;;  %1113 = vperm.xlu1 %4882, %v1109_v36  }
 0x199   : > { %1068 = vst [vmem:[#allocation4 + $0x108] sm:$0xff] %v1058_v1  ;;  %v4657_v10 = vld [vmem:[#allocation4 + $0x2c] sm:$0xf0] }
 0x19a   : > { %953 = vst [vmem:[#allocation4 + $0xc0] sm:$0xff] %v942_v19  ;;  %v4136_v19 = vld [vmem:[#allocation4 + $0xd8] sm:$0xf0] }
 0x19b   : > { %954 = vst [vmem:[#allocation4 + $0xc8] sm:$0xff] %v944_v12  ;;  %v689_v20 = vpop.permute.xlu1 %688  ;;  %v625_v21 = vpop.permute.xlu2 %624  ;;  %v4118_v12 = vld [vmem:[#allocation4 + $0xa8] sm:$0xf] }
 0x19c   : > { %v695_v22 = vrot.slane %v689_v20, 4  ;;  %v634_v23 = vrot.slane %v625_v21, 4  ;;  %v5465_v25 = vpop.permute.xlu0 %628 }
 0x19d   : > { %v636_v28 = vrot.slane %v5465_v25, 4 }
 0x19e   : > { %v703_v13 = vsel %vm638_vm0, %v694_v59, %v695_v22  ;;  %v642_v31 = vsel %vm638_vm0, %v633_v41, %v634_v23  ;;  %v4094_v22 = vld [vmem:[#allocation4 + $0x80] sm:$0xf]  ;;  %v4667_v23 = vld [vmem:[#allocation4 + $0x84] sm:$0xf] }
 0x19f   : > { %v704_v37 = vsel %vm697_vm11, %v5378_v57, %v703_v13  ;;  %v643_v38 = vsel %vm640_vm12, %v5437_v39, %v642_v31  ;;  %v644_v59 = vsel %vm638_vm0, %v635_v27, %v636_v28  ;;  %v4158_v41 = vld [vmem:[#allocation4 + $0x100] sm:$0xf]  ;;  %v4683_v43 = vld [vmem:[#allocation4 + $0x104] sm:$0xf]  ;;  %v4680_v57 = vld [vmem:[#allocation4 + $0xec] sm:$0xf] }
 0x1a0   : > { %712 = vst [vmem:[#allocation4 + $0x38] sm:$0xff] %v704_v37  ;;  %v645_v45 = vsel %vm640_vm12, %v5406_v6, %v644_v59  ;;  %v4159_v46 = vor.u32 %v4685_v29, %v4158_v41  ;;  %v4163_v47 = vor.u32 %v4683_v43, %v4160_v30  ;;  %v4166_v18 = vld [vmem:[#allocation4 + $0x108] sm:$0xf]  ;;  %v4110_v6 = vld [vmem:[#allocation4 + $0xa0] sm:$0xf]  ;;  %v4155_v5 = vor.u32 %v4680_v57, %v4152_v61 }
 0x1a1   : > { %653 = vst [vmem:[#allocation4 + $0x8] sm:$0xff] %v643_v38  ;;  %v4126_v50 = vld [vmem:[#allocation4 + $0xc0] sm:$0xf]  ;;  %v4675_v39 = vld [vmem:[#allocation4 + $0xc4] sm:$0xf]  ;;  %v4167_v53 = vor.u32 %v4686_v44, %v4166_v18  ;;  %v4111_v1 = vor.u32 %v4673_v4, %v4110_v6 }
 0x1a2   : > { %654 = vst [vmem:[#allocation4 + $0x10] sm:$0xff] %v645_v45  ;;  %v4127_v54 = vor.u32 %v4677_v40, %v4126_v50  ;;  %1335 = vmatpush.bf16.msra.mxu1 %v4159_v46  ;;  %v4131_v55 = vor.u32 %v4675_v39, %v4128_v42  ;;  %1363 = vmatpush.bf16.msra.mxu3 %v4163_v47  ;;  %v4134_v56 = vld [vmem:[#allocation4 + $0xc8] sm:$0xf]  ;;  %v4676_v15 = vld [vmem:[#allocation4 + $0xcc] sm:$0xf] }
 0x1a3   : > { %v797_v58 = vpop.permute.xlu1 %796  ;;  %v4135_v11 = vor.u32 %v4678_v0, %v4134_v56  ;;  %v4096_v27 = vld [vmem:[#allocation4 + $0x90] sm:$0xf0]  ;;  %v4139_v29 = vor.u32 %v4676_v15, %v4136_v19  ;;  %v4674_v30 = vld [vmem:[#allocation4 + $0xb4] sm:$0xf0]  ;;  %v4672_v31 = vld [vmem:[#allocation4 + $0xac] sm:$0xf] }
 0x1a4   : > { %1315 = vmatpush.bf16.msra.mxu0 %v4127_v54  ;;  %1343 = vmatpush.bf16.msra.mxu2 %v4131_v55  ;;  %v806_v62 = vrot.slane %v797_v58, 4  ;;  %v631_v3 = vpop.permute.xlu0 %630  ;;  %v4119_v13 = vor.u32 %v4674_v30, %v4118_v12  ;;  %v4099_v48 = vor.u32 %v4667_v23, %v4096_v27  ;;  %v4663_v37 = vld [vmem:[#allocation4 + $0x64] sm:$0xf]  ;;  %v4120_v38 = vld [vmem:[#allocation4 + $0xb8] sm:$0xf0] }
 0x1a5   : > { %v637_v9 = vrot.slane %v631_v3, 4  ;;  %4173 = vmatmul.msk.bf16.vlgmr.msra.gmra.mxu3 %vm1310_vm13, %v5488_v51  ;;  %4172 = vmatmul.msk.bf16.vlgmr.msra.gmra.mxu1 %vm1310_vm13, %v5488_v51  ;;  %v4665_v40 = vld [vmem:[#allocation4 + $0x6c] sm:$0xf0]  ;;  %v4080_v41 = vld [vmem:[#allocation4 + $0x70] sm:$0xf0]  ;;  %v4123_v42 = vor.u32 %v4672_v31, %v4120_v38 }
 0x1a6   : > { %1370 = vmatpush.bf16.msrb.mxu1 %v4151_v52  ;;  %1391 = vmatpush.bf16.msrb.mxu3 %v4167_v53  ;;  %v813_v35 = vsel %vm638_vm0, %v805_v8, %v806_v62  ;;  %v4668_v44 = vld [vmem:[#allocation4 + $0x8c] sm:$0xf]  ;;  %v4104_v45 = vld [vmem:[#allocation4 + $0x98] sm:$0xf0]  ;;  %v4079_v18 = vor.u32 %v4665_v40, %v4078_v34  ;;  %v4083_v57 = vor.u32 %v4663_v37, %v4080_v41  ;;  %v4062_v50 = vld [vmem:[#allocation4 + $0x40] sm:$0xf] }
 0x1a7   : > { %v814_v20 = vsel %vm811_vm9, %v5408_v7, %v813_v35  ;;  %v646_v21 = vsel %vm638_vm0, %v636_v28, %v637_v9  ;;  %v4095_v7 = vor.u32 %v4669_v2, %v4094_v22  ;;  %v4670_v28 = vld [vmem:[#allocation4 + $0x94] sm:$0xf0]  ;;  %v4659_v54 = vld [vmem:[#allocation4 + $0x44] sm:$0xf]  ;;  %v4661_v58 = vld [vmem:[#allocation4 + $0x4c] sm:$0xf0]  ;;  %v4107_v60 = vor.u32 %v4668_v44, %v4104_v45 }
 0x1a8   : > { %824 = vst [vmem:[#allocation4 + $0x68] sm:$0xff] %v814_v20  ;;  %v647_v8 = vsel %vm640_vm12, %v5465_v25, %v646_v21  ;;  %1316 = vmatpush.bf16.msra.mxu0 %v4111_v1  ;;  %1344 = vmatpush.bf16.msra.mxu2 %v4115_v17  ;;  %v4103_v46 = vor.u32 %v4670_v28, %v4102_v32  ;;  %v4666_v39 = vld [vmem:[#allocation4 + $0x74] sm:$0xf0]  ;;  %v4064_v6 = vld [vmem:[#allocation4 + $0x50] sm:$0xf0]  ;;  %vm1857_vm9 = vcmask 1031168  }
 0x1a9   : > { %655 = vst [vmem:[#allocation4 + $0x18] sm:$0xff] %v647_v8  ;;  %v1828_v56 = vld [vmem:[#allocation3 + $0x18] sm:$0xf]  ;;  %v4063_v3 = vor.u32 %v4661_v58, %v4062_v50  ;;  %v4067_v4 = vor.u32 %v4659_v54, %v4064_v6  ;;  %v4655_v0 = vld [vmem:[#allocation4 + $0x24] sm:$0xf]  ;;  %vm1755_vm12 = vcmask 506880  }
 0x1aa   : > { %1398 = vmatpush.bf16.msra.mxu3 %v4155_v5  ;;  %1371 = vmatpush.bf16.msrb.mxu1 %v4135_v11  ;;  %v1831_v62 = vld [vmem:[#allocation3 + $0x38] sm:$0xf]  ;;  %v4046_v5 = vld [vmem:[#allocation4 + $0x20] sm:$0xf]  ;;  %v4088_v9 = vld [vmem:[#allocation4 + $0x78] sm:$0xf0] }
 0x1ab   : > { %v740_v33 = vpop.permute.xlu1 %739  ;;  %v4048_v11 = vld [vmem:[#allocation4 + $0x30] sm:$0xf0]  ;;  %v4047_v15 = vor.u32 %v4657_v10, %v4046_v5  ;;  %v4653_v35 = vld [vmem:[#allocation4 + $0xc] sm:$0xf0]  ;;  %v4662_v1 = vld [vmem:[#allocation4 + $0x54] sm:$0xf0] }
 0x1ac   : > { %1317 = vmatpush.bf16.msra.mxu0 %v4095_v7  ;;  %1345 = vmatpush.bf16.msra.mxu2 %v4099_v48  ;;  %v749_v25 = vrot.slane %v740_v33, 4  ;;  %v683_v59 = vpop.permute.xlu0 %682  ;;  %v4051_v36 = vor.u32 %v4655_v0, %v4048_v11  ;;  %v4072_v17 = vld [vmem:[#allocation4 + $0x58] sm:$0xf0]  ;;  %v4030_v2 = vld [vmem:[#allocation4] sm:$0xf] }
 0x1ad   : > { %v692_v43 = vrot.slane %v683_v59, 4  ;;  %v4032_v19 = vld [vmem:[#allocation4 + $0x10] sm:$0xf0]  ;;  %v4684_v23 = vld [vmem:[#allocation4 + $0x10c] sm:$0xf]  ;;  %v4031_v31 = vor.u32 %v4653_v35, %v4030_v2 }
 0x1ae   : > { %1399 = vmatpush.bf16.msra.mxu3 %v4139_v29  ;;  %1372 = vmatpush.bf16.msrb.mxu1 %v4119_v13  ;;  %v756_v47 = vsel %vm638_vm0, %v748_v16, %v749_v25  ;;  %v4022_v27 = vld [vmem:[%s6916_s1] sm:$0xf]  ;;  %v4650_v8 = vld [vmem:[%s6916_s1 + $0x4] sm:$0xf0]  ;;  %v4651_v29 = vld [vmem:[#allocation4 + $0x4] sm:$0xf] }
 0x1af   : > { %v757_v52 = vsel %vm754_vm10, %v5417_v14, %v756_v47  ;;  %v699_v53 = vsel %vm638_vm0, %v691_v26, %v692_v43  ;;  %v4086_v55 = vld [vmem:[#allocation4 + $0x68] sm:$0xf]  ;;  %v4664_v14 = vld [vmem:[#allocation4 + $0x6c] sm:$0xf]  ;;  %v4894_v26 = vpack.i.bf16 %v1831_v62, %v1828_v56  ;;  %v4035_v7 = vor.u32 %v4651_v29, %v4032_v19  ;;  %v4168_v48 = vld [vmem:[#allocation4 + $0x118] sm:$0xf0] }
 0x1b0   : > { %767 = vst [vmem:[#allocation4 + $0x48] sm:$0xff] %v757_v52  ;;  %v700_v16 = vsel %vm697_vm11, %v5425_v24, %v699_v53  ;;  %1318 = vmatpush.bf16.msra.mxu0 %v4079_v18  ;;  %1346 = vmatpush.bf16.msra.mxu2 %v4083_v57  ;;  %v4087_v61 = vor.u32 %v4666_v39, %v4086_v55  ;;  %v4658_v33 = vld [vmem:[#allocation4 + $0x34] sm:$0xf0]  ;;  %v4056_v34 = vld [vmem:[#allocation4 + $0x38] sm:$0xf0]  ;;  %s6936_s1 = smov 62  }
 0x1b1   : > { %710 = vst [vmem:[#allocation4 + $0x28] sm:$0xff] %v700_v16  ;;  %v4091_v24 = vor.u32 %v4664_v14, %v4088_v9  ;;  %4895 = vrot.lane.b32.xlu0 %v4894_v26, %s6857_s24  ;;  %v4171_v32 = vor.u32 %v4684_v23, %v4168_v48  ;;  %v4023_v28 = vor.u32 %v4650_v8, %v4022_v27  ;;  %v4654_v25 = vld [vmem:[#allocation4 + $0x14] sm:$0xf0]  ;;  %v4040_v59 = vld [vmem:[#allocation4 + $0x18] sm:$0xf0]  ;;  %s6918_s24 = smov 126  }
 0x1b2   : > { %1400 = vmatpush.bf16.msra.mxu3 %v4123_v42  ;;  %1373 = vmatpush.bf16.msrb.mxu1 %v4103_v46  ;;  %v4038_v40 = vld [vmem:[#allocation4 + $0x8] sm:$0xf]  ;;  %v4652_v41 = vld [vmem:[#allocation4 + $0xc] sm:$0xf]  ;;  %v1875_v44 = vld [vmem:[#allocation3 + $0x18] sm:$0xf] }
 0x1b3   : > { %v4039_v42 = vor.u32 %v4654_v25, %v4038_v40  ;;  %v4043_v43 = vor.u32 %v4652_v41, %v4040_v59  ;;  %v1878_v45 = vld [vmem:[#allocation3 + $0x38] sm:$0xf]  ;;  %v2624_v16 = vld [vmem:[#allocation3 + $0x1c] sm:$0xf]  ;;  %vm2397_vm10 = vcmask 31744  }
 0x1b4   : > { %1319 = vmatpush.bf16.msra.mxu0 %v4063_v3  ;;  %1347 = vmatpush.bf16.msra.mxu2 %v4067_v4  ;;  %v4889_v46 = vpack.i.bf16 %v1878_v45, %v1875_v44  ;;  %v2570_v47 = vld [vmem:[#allocation3 + $0x18] sm:$0xf]  ;;  %v2627_v6 = vld [vmem:[#allocation3 + $0x3c] sm:$0xf] }
 0x1b5   : > { %4174 = vmatmul.msk.bf16.vlgmr.msrb.gmra.mxu3 %vm1310_vm13, %v5488_v51  ;;  %v2573_v18 = vld [vmem:[#allocation3 + $0x38] sm:$0xf]  ;;  %v3317_v14 = vld [vmem:[#allocation3 + $0x3c] sm:$0xf] }
 0x1b6   : > { %1401 = vmatpush.bf16.msra.mxu3 %v4107_v60  ;;  %1374 = vmatpush.bf16.msrb.mxu1 %v4087_v61  ;;  %v4904_v57 = vpack.i.bf16 %v2573_v18, %v2570_v47  ;;  %v1967_v50 = vld [vmem:[#allocation3 + $0x18] sm:$0xf]  ;;  %v4919_v60 = vpack.i.bf16 %v2627_v6, %v2624_v16  ;;  %v3314_v61 = vld [vmem:[#allocation3 + $0x1c] sm:$0xf] }
 0x1b7   : > { %v4070_v12 = vld [vmem:[#allocation4 + $0x48] sm:$0xf]  ;;  %v4660_v20 = vld [vmem:[#allocation4 + $0x4c] sm:$0xf]  ;;  %4890 = vrot.lane.b32.xlu1 %v4889_v46, %s6865_s22  ;;  %v1970_v39 = vld [vmem:[#allocation3 + $0x38] sm:$0xf]  ;;  %v4924_v3 = vpack.i.bf16 %v3317_v14, %v3314_v61 }
 0x1b8   : > { %1320 = vmatpush.bf16.msra.mxu0 %v4047_v15  ;;  %1348 = vmatpush.bf16.msra.mxu2 %v4051_v36  ;;  %v4071_v21 = vor.u32 %v4662_v1, %v4070_v12  ;;  %v4075_v22 = vor.u32 %v4660_v20, %v4072_v17  ;;  %v4054_v30 = vld [vmem:[#allocation4 + $0x28] sm:$0xf]  ;;  %v4656_v13 = vld [vmem:[#allocation4 + $0x2c] sm:$0xf]  ;;  %v4899_v52 = vpack.i.bf16 %v1970_v39, %v1967_v50  ;;  %v1921_v53 = vld [vmem:[#allocation3 + $0x18] sm:$0xf] }
 0x1b9   : > { %v4055_v37 = vor.u32 %v4658_v33, %v4054_v30  ;;  %v4059_v38 = vor.u32 %v4656_v13, %v4056_v34  ;;  %4905 = vrot.lane.b32.xlu0 %v4904_v57, %s6855_s20  ;;  %v2524_v55 = vld [vmem:[#allocation3 + $0x18] sm:$0xf]  ;;  %v3268_v62 = vld [vmem:[#allocation3 + $0x1c] sm:$0xf] }
 0x1ba   : > { %1402 = vmatpush.bf16.msra.mxu3 %v4091_v24  ;;  %1375 = vmatpush.bf16.msrb.mxu1 %v4071_v21  ;;  %v2527_v56 = vld [vmem:[#allocation3 + $0x38] sm:$0xf]  ;;  %v3271_v4 = vld [vmem:[#allocation3 + $0x3c] sm:$0xf] }
 0x1bb   : > { %v4909_v58 = vpack.i.bf16 %v2527_v56, %v2524_v55  ;;  %v4929_v26 = vpack.i.bf16 %v3271_v4, %v3268_v62  ;;  %v5546_v21 = vld [vmem:[%s6830_s11] sm:$0xf] }
 0x1bc   : > { %1321 = vmatpush.bf16.msra.mxu0 %v4031_v31  ;;  %1349 = vmatpush.bf16.msra.mxu2 %v4035_v7  ;;  %v1454_v30 = vperm.slane %v5546_v21, 0  ;;  %v1455_v13 = vperm.slane %v5546_v21, 1  ;;  %v1456_v41 = vperm.slane %v5546_v21, 2  ;;  %v1457_v39 = vperm.slane %v5546_v21, 3 }
 0x1be   : > { %1403 = vmatpush.bf16.msra.mxu3 %v4075_v22  ;;  %1376 = vmatpush.bf16.msrb.mxu1 %v4055_v37 }
 0x1bf   : > { %1322 = vmatmul.bf16.vlgmr.msra.gmra.mxu0 %v4023_v28  ;;  %1350 = vmatmul.bf16.vlgmr.msra.gmra.mxu2 %v4023_v28 }
 0x1c0   : > { %1419 = vmatpush.bf16.msrb.mxu0 %v4171_v32  ;;  %4900 = vrot.lane.b32.xlu1 %v4899_v52, %s6863_s16 }
 0x1c2   : > { %1404 = vmatpush.bf16.msra.mxu3 %v4059_v38  ;;  %1377 = vmatpush.bf16.msrb.mxu1 %v4039_v42 }
 0x1c5   : > { %1378 = vmatmul.bf16.vlgmr.msrb.gmra.mxu1 %v4023_v28 }
 0x1c6   : > { %1405 = vmatpush.bf16.msra.mxu3 %v4043_v43 }
 0x1c8   : > { %4915 = vrot.lane.b32.xlu1 %v6871_v49, %s6855_s20  ;;  %s6923_s20 = smov 4  }
 0x1c9   : > { %1406 = vmatmul.bf16.vlgmr.msra.gmra.mxu3 %v4023_v28 }
 0x1cf   : > { %4175 = vmatmul.msk.bf16.vlgmr.msrb.gmra.mxu0 %vm1310_vm13, %v5488_v51  ;;  %v1924_v51 = vld [vmem:[#allocation3 + $0x38] sm:$0xf] }
 0x1d0   : > { %v4884_v54 = vpack.i.bf16 %v1924_v51, %v1921_v53  ;;  %4920 = vrot.lane.b32.xlu1 %v4919_v60, %s6853_s21 }
 0x1d2   : > { %4885 = vrot.lane.b32.xlu2 %v4884_v54, %s6869_s15 }
 0x1d8   : > { %4930 = vrot.lane.b32.xlu1 %v4929_v26, %s6907_s30 }
 0x1da   : > { %4910 = vrot.lane.b32.xlu2 %v4909_v58, %s6853_s21  ;;  %s1426_s21 = sld [smem:[#allocation6]] }
 0x1e0   : > { %v5540_v1 = vstv %s1426_s21  ;;  %s6859_s21 = smov 2  }
 0x1e2   : > { %4925 = vrot.lane.b32.xlu2 %v4924_v3, %s6869_s15 }
 0x1ea   : > { %4935 = vrot.lane.b32.xlu2 %v6871_v49, %s6861_s23  ;;  %s6932_s23 = smov 6  }
 0x20a   : > { %v1114_v11 = vpop.permute.xlu1 %1113 }
 0x222   : > { %v1337_v0 = vpop.f32.mrf.mxu1 }
 0x228   : > { %v1365_v5 = vpop.f32.mrf.mxu3 }
 0x22a   : > { %v1339_v10 = vpop.f32.mrf.mxu1 }
 0x230   : > { %v1367_v9 = vpop.f32.mrf.mxu3 }
 0x238   : > { %v1393_v24 = vpop.f32.mrf.mxu3 }
 0x23c   : > { %v1323_v15 = vpop.f32.mrf.mxu0 }
 0x23d   : > { %v1324_v36 = vadd.f32 %v1323_v15, %v1114_v11 }
 0x23f   : > { %v1338_v35 = vadd.f32 %v1337_v0, %v1324_v36 }
 0x240   : > { %v1395_v17 = vpop.f32.mrf.mxu3 }
 0x241   : > { %v1436_v12 = vmul.f32 %v5540_v1, %v1338_v35  ;;  %vm1427_vm14 = vcmp.gt.f32.partialorder %v1338_v35, 0.0 }
 0x242   : > { %v1351_v2 = vpop.f32.mrf.mxu2  ;;  %v1379_v19 = vpop.f32.mrf.mxu1 }
 0x243   : > { %v1352_v20 = vadd.f32 %v1351_v2, %v1114_v11  ;;  %v1380_v22 = vadd.f32 %v1379_v19, %v1114_v11  ;;  %v1444_v31 = vsel %vm1427_vm14, %v1338_v35, %v1436_v12  ;;  %vm2452_vm14 = vcmask 1014784  }
 0x244   : > { %v1325_v23 = vpop.f32.mrf.mxu0  ;;  %v1462_v37 = vmul.f32 %v1454_v30, %v1444_v31 }
 0x245   : > { %v1366_v27 = vadd.f32 %v1365_v5, %v1352_v20  ;;  %v1326_v8 = vadd.f32 %v1325_v23, %v5451_v63  ;;  %v1394_v29 = vadd.f32 %v1393_v24, %v1380_v22 }
 0x247   : > { %vm1428_vm15 = vcmp.gt.f32.partialorder %v1366_v27, 0.0  ;;  %v1437_v7 = vmul.f32 %v5540_v1, %v1366_v27  ;;  %v1340_v48 = vadd.f32 %v1339_v10, %v1326_v8  ;;  %vm1429_vm1 = vcmp.gt.f32.partialorder %v1394_v29, 0.0 }
 0x248   : > { %v1438_v32 = vmul.f32 %v5540_v1, %v1394_v29 }
 0x249   : > { %v1445_v33 = vsel %vm1428_vm15, %v1366_v27, %v1437_v7  ;;  %v1440_v25 = vmul.f32 %v5540_v1, %v1340_v48  ;;  %vm1431_vm2 = vcmp.gt.f32.partialorder %v1340_v48, 0.0  ;;  %vm1802_vm15 = vcmask 15360  }
 0x24a   : > { %v1463_v38 = vmul.f32 %v1455_v13, %v1445_v33  ;;  %v1353_v59 = vpop.f32.mrf.mxu2  ;;  %v1381_v40 = vpop.f32.mrf.mxu1  ;;  %v1446_v44 = vsel %vm1429_vm1, %v1394_v29, %v1438_v32  ;;  %vm3250_vm1 = vcmask 998400  }
 0x24b   : > { %v1354_v42 = vadd.f32 %v1353_v59, %v5451_v63  ;;  %v1382_v43 = vadd.f32 %v1381_v40, %v5451_v63  ;;  %v1448_v50 = vsel %vm1431_vm2, %v1340_v48, %v1440_v25  ;;  %v1464_v52 = vmul.f32 %v1456_v41, %v1446_v44 }
 0x24c   : > { %v1407_v28 = vpop.f32.mrf.mxu3  ;;  %v5557_v45 = vpack.c.bf16 %v1463_v38, %v1462_v37  ;;  %v1421_v46 = vpop.f32.mrf.mxu0  ;;  %v1474_v53 = vadd.f32 %v1463_v38, %v1462_v37  ;;  %v1466_v60 = vmul.f32 %v1454_v30, %v1448_v50  ;;  %vm3148_vm2 = vcmask 474112  }
 0x24d   : > { %v1408_v34 = vadd.f32 %v1407_v28, %v1114_v11  ;;  %v1368_v47 = vadd.f32 %v1367_v9, %v1354_v42  ;;  %v1396_v18 = vadd.f32 %v1395_v17, %v1382_v43 }
 0x24e   : > { %1524 = vst [vmem:[#allocation3 + $0x8] sm:$0xff] %v5557_v45  ;;  %1931 = vrot.lane.b32.xlu1 %v5557_v45, %s6869_s15  ;;  %v1475_v4 = vadd.f32 %v1474_v53, %v1464_v52  ;;  %v1541_v15 = vunpack.c.l.b16 %v5557_v45  ;;  %v1542_v36 = vunpack.c.h.b16 %v5557_v45 }
 0x24f   : > { %v1422_v57 = vadd.f32 %v1421_v46, %v1408_v34  ;;  %1822 = vst [vmem:[#allocation4 + $0x80] sm:$0xff] %v5557_v45  ;;  %vm1432_vm3 = vcmp.gt.f32.partialorder %v1368_v47, 0.0  ;;  %v1441_v51 = vmul.f32 %v5540_v1, %v1368_v47  ;;  %vm1433_vm4 = vcmp.gt.f32.partialorder %v1396_v18, 0.0 }
 0x250   : > { %v1442_v54 = vmul.f32 %v5540_v1, %v1396_v18 }
 0x251   : > { %vm1430_vm5 = vcmp.gt.f32.partialorder %v1422_v57, 0.0  ;;  %v1439_v55 = vmul.f32 %v5540_v1, %v1422_v57  ;;  %v1449_v16 = vsel %vm1432_vm3, %v1368_v47, %v1441_v51  ;;  %vm3055_vm3 = vcmask 572416  }
 0x252   : > { %v1450_v58 = vsel %vm1433_vm4, %v1396_v18, %v1442_v54  ;;  %v1467_v61 = vmul.f32 %v1455_v13, %v1449_v16  ;;  %v5681_v16 = vpop.permute.xlu2 %4885  ;;  %vm3195_vm4 = vcmask 48128  }
 0x253   : > { %v1447_v14 = vsel %vm1430_vm5, %v1422_v57, %v1439_v55  ;;  %v1468_v62 = vmul.f32 %v1456_v41, %v1450_v58 }
 0x254   : > { %v1409_v56 = vpop.f32.mrf.mxu3  ;;  %v1465_v3 = vmul.f32 %v1457_v39, %v1447_v14  ;;  %v1423_v26 = vpop.f32.mrf.mxu0  ;;  %v5568_v5 = vpack.c.bf16 %v1467_v61, %v1466_v60  ;;  %v1479_v0 = vadd.f32 %v1467_v61, %v1466_v60 }
 0x255   : > { %v1410_v6 = vadd.f32 %v1409_v56, %v5451_v63  ;;  %v5570_v24 = vld [vmem:[#allocation3 + $0x4] sm:$0xff]  ;;  %v5693_v60 = vpop.permute.xlu1 %4890 }
 0x256   : > { %v1476_v10 = vadd.f32 %v1475_v4, %v1465_v3  ;;  %v5572_v11 = vpack.c.bf16 %v1465_v3, %v1464_v52  ;;  %1689 = vrot.lane.b32.xlu2 %v5570_v24, %s6869_s15  ;;  %1526 = vst [vmem:[#allocation3 + $0x28] sm:$0xff] %v5568_v5  ;;  %v1545_v63 = vunpack.c.l.b16 %v5568_v5  ;;  %v1546_v35 = vunpack.c.h.b16 %v5568_v5  ;;  %1885 = vrot.lane.b32.xlu1 %v5557_v45, %s6865_s22  ;;  %v5583_v17 = vld [vmem:[#allocation3 + $0x8] sm:$0xff]  ;;  %v5587_v12 = vld [vmem:[#allocation4 + $0x80] sm:$0xf]  ;;  %v5589_v20 = vld [vmem:[#allocation4 + $0x84] sm:$0xf] }
 0x257   : > { %v1424_v9 = vadd.f32 %v1423_v26, %v1410_v6  ;;  %v1480_v2 = vadd.f32 %v1479_v0, %v1468_v62  ;;  %1824 = vst [vmem:[#allocation4 + $0x90] sm:$0xff] %v5568_v5 }
 0x258   : > { %1477 = vadd.xlane.f32.xlu0 %v1476_v10  ;;  %1525 = vst [vmem:[#allocation3 + $0x10] sm:$0xff] %v5572_v11  ;;  %v1549_v21 = vpack.c.b16 %v1545_v63, %v1541_v15  ;;  %v1550_v22 = vpack.c.b16 %v1546_v35, %v1542_v36  ;;  %v1543_v29 = vunpack.c.l.b16 %v5572_v11  ;;  %v1544_v13 = vunpack.c.h.b16 %v5572_v11 }
 0x259   : > { %vm1434_vm6 = vcmp.gt.f32.partialorder %v1424_v9, 0.0  ;;  %v1443_v19 = vmul.f32 %v5540_v1, %v1424_v9  ;;  %1823 = vst [vmem:[#allocation4 + $0x88] sm:$0xff] %v5572_v11 }
 0x25a   : > { %1567 = vmatpush.bf16.msrb.mxu2 %v1549_v21  ;;  %1580 = vmatpush.bf16.msra.mxu1 %v1550_v22  ;;  %2518 = vst [vmem:[#allocation4 + $0x80] sm:$0xff] %v5583_v17  ;;  %v5695_v61 = vpop.permute.xlu2 %4910 }
 0x25b   : > { %v1451_v23 = vsel %vm1434_vm6, %v1424_v9, %v1443_v19 }
 0x25c   : > { %v1469_v27 = vmul.f32 %v1457_v39, %v1451_v23  ;;  %v4887_v23 = vunpack.i.l.bf16 %v5681_v16 }
 0x25d   : > { %v2516_v32 = vld [vmem:[#allocation3 + $0x28] sm:$0xff]  ;;  %v5703_v14 = vpop.permute.xlu1 %4900 }
 0x25e   : > { %v5594_v1 = vpack.c.bf16 %v1469_v27, %v1468_v62  ;;  %v5596_v8 = vadd.f32 %v1480_v2, %v1469_v27  ;;  %1977 = vrot.lane.b32.xlu2 %v5557_v45, %s6863_s16  ;;  %1838 = vrot.lane.b32.xlu1 %v5557_v45, %s6918_s24  ;;  %v5608_v28 = vld [vmem:[#allocation4 + $0x8c] sm:$0xf0]  ;;  %v5612_v34 = vld [vmem:[#allocation4 + $0x90] sm:$0xf0]  ;;  %v5687_v6 = vld [vmem:[#allocation3 + $0x24] sm:$0xff]  ;;  %v5748_v2 = vpop.permute.xlu0 %4895 }
 0x25f   : > { %2520 = vst [vmem:[#allocation4 + $0x90] sm:$0xff] %v2516_v32  ;;  %v2515_v59 = vld [vmem:[#allocation3 + $0x10] sm:$0xff] }
 0x260   : > { %6917 = vst [vmem:[#allocation12_spill] sm:$0xff] %v5596_v8  ;;  %v1547_v30 = vunpack.c.l.b16 %v5594_v1  ;;  %v1548_v31 = vunpack.c.h.b16 %v5594_v1  ;;  %v5616_v38 = vld [vmem:[#allocation4 + $0x88] sm:$0xf]  ;;  %v5618_v25 = vld [vmem:[#allocation4 + $0x8c] sm:$0xf] }
 0x261   : > { %1527 = vst [vmem:[#allocation3 + $0x30] sm:$0xff] %v5594_v1  ;;  %v5620_v40 = vld [vmem:[#allocation4 + $0x80] sm:$0xf]  ;;  %v5622_v41 = vld [vmem:[#allocation4 + $0x84] sm:$0xf]  ;;  %v5683_v58 = vld [vmem:[#allocation3 + $0xc] sm:$0xff] }
 0x262   : > { %1825 = vst [vmem:[#allocation4 + $0x98] sm:$0xff] %v5594_v1  ;;  %v1551_v7 = vpack.c.b16 %v1547_v30, %v1543_v29  ;;  %v1552_v48 = vpack.c.b16 %v1548_v31, %v1544_v13  ;;  %v5707_v62 = vpop.permute.xlu2 %4925  ;;  %v1773_v3 = vld [vmem:[#allocation3 + $0x14] sm:$0xf]  ;;  %v1945_v31 = vrot.slane %v4887_v23, 4 }
 0x263   : > { %6919 = vst [vmem:[#allocation13_spill] sm:$0xff] %v5616_v38  ;;  %v1726_v26 = vld [vmem:[#allocation3 + $0x14] sm:$0xf] }
 0x264   : > { %1593 = vmatpush.bf16.msra.mxu0 %v1551_v7  ;;  %1606 = vmatpush.bf16.msra.mxu2 %v1552_v48  ;;  %6920 = vst [vmem:[#allocation14_spill] sm:$0xff] %v5618_v25  ;;  %v1679_v10 = vld [vmem:[#allocation3 + $0x14] sm:$0xf] }
 0x265   : > { %6921 = vst [vmem:[#allocation15_spill] sm:$0xff] %v5620_v40  ;;  %v5713_v4 = vpop.permute.xlu1 %4915  ;;  %v1632_v19 = vld [vmem:[#allocation3 + $0x14] sm:$0xf] }
 0x266   : > { %6922 = vst [vmem:[#allocation16_spill] sm:$0xff] %v5622_v41  ;;  %2480 = vrot.lane.b32.xlu2 %v5570_v24, %s6923_s20  ;;  %1642 = vrot.lane.b32.xlu1 %v5570_v24, %s6865_s22  ;;  %v5637_v18 = vld [vmem:[#allocation4 + $0x8c] sm:$0xf0]  ;;  %v5639_v57 = vld [vmem:[#allocation4 + $0x90] sm:$0xf0]  ;;  %v5760_v27 = vpop.permute.xlu0 %4905 }
 0x267   : > { %2519 = vst [vmem:[#allocation4 + $0x88] sm:$0xff] %v2515_v59  ;;  %v5762_v29 = vld [vmem:[#allocation3 + $0x14] sm:$0xff] }
 0x268   : > { %3215 = vst [vmem:[#allocation4 + $0x80] sm:$0xff] %v5583_v17  ;;  %v2517_v47 = vld [vmem:[#allocation3 + $0x30] sm:$0xff] }
 0x269   : > { %v5629_v42 = vld [vmem:[#allocation4 + $0x94] sm:$0xf0]  ;;  %v5631_v43 = vld [vmem:[#allocation4 + $0x98] sm:$0xf0]  ;;  %6925 = vst [vmem:[#allocation18_spill] sm:$0xff] %v5637_v18 }
 0x26a   : > { %6924 = vst [vmem:[#allocation17_spill] sm:$0xff] %v5631_v43  ;;  %v5717_v0 = vpop.permute.xlu2 %4935  ;;  %v2423_v46 = vld [vmem:[#allocation3 + $0x14] sm:$0xf] }
 0x26b   : > { %6926 = vst [vmem:[#allocation19_spill] sm:$0xff] %v5639_v57  ;;  %v1776_v43 = vld [vmem:[#allocation3 + $0x34] sm:$0xf] }
 0x26c   : > { %1783 = vrot.lane.b32.xlu0 %v5570_v24, %s6859_s21  ;;  %2521 = vst [vmem:[#allocation4 + $0x98] sm:$0xff] %v2517_v47  ;;  %s6931_s21 = smov 124  }
 0x26d   : > { %3217 = vst [vmem:[#allocation4 + $0x90] sm:$0xff] %v2516_v32  ;;  %v5723_v9 = vpop.permute.xlu1 %4920 }
 0x26e   : > { %v5647_v52 = vld [vmem:[#allocation4 + $0x88] sm:$0xf]  ;;  %v5649_v53 = vld [vmem:[#allocation4 + $0x8c] sm:$0xf]  ;;  %2380 = vrot.lane.b32.xlu2 %v5557_v45, %s6923_s20  ;;  %2580 = vrot.lane.b32.xlu1 %v5557_v45, %s6923_s20  ;;  %6937 = vst [vmem:[#allocation24_spill] sm:$0xff] %v5707_v62 }
 0x26f   : > { %6927 = vst [vmem:[#allocation20_spill] sm:$0xff] %v5647_v52  ;;  %v4907_v52 = vunpack.i.l.bf16 %v5760_v27 }
 0x270   : > { %6928 = vst [vmem:[#allocation21_spill] sm:$0xff] %v5649_v53 }
 0x271   : > { %3216 = vst [vmem:[#allocation4 + $0x88] sm:$0xff] %v2515_v59 }
 0x272   : > { %6938 = vst [vmem:[#allocation25_spill] sm:$0xff] %v5717_v0 }
 0x273   : > { %v5655_v51 = vld [vmem:[#allocation4 + $0x94] sm:$0xf0]  ;;  %v5657_v54 = vld [vmem:[#allocation4 + $0x98] sm:$0xf0]  ;;  %6939 = vst [vmem:[#allocation26_spill] sm:$0xff] %v5723_v9 }
 0x274   : > { %6929 = vst [vmem:[#allocation22_spill] sm:$0xff] %v5655_v51  ;;  %1736 = vrot.lane.b32.xlu0 %v5570_v24, %s6863_s16  ;;  %s6933_s16 = smov 58  }
 0x275   : > { %6930 = vst [vmem:[#allocation23_spill] sm:$0xff] %v5657_v54  ;;  %v5736_v15 = vpop.permute.xlu1 %4930 }
 0x276   : > { %3218 = vst [vmem:[#allocation4 + $0x98] sm:$0xff] %v2517_v47  ;;  %1933 = vrot.lane.b32.xlu2 %v5572_v11, %s6869_s15  ;;  %2534 = vrot.lane.b32.xlu1 %v5557_v45, %s6931_s21 }
 0x27c   : > { %3176 = vrot.lane.b32.xlu0 %v5570_v24, %s6932_s23 }
 0x27e   : > { %1887 = vrot.lane.b32.xlu2 %v5572_v11, %s6865_s22  ;;  %2433 = vrot.lane.b32.xlu1 %v5570_v24, %s6931_s21  ;;  %s6934_s22 = smov 2  }
 0x284   : > { %3131 = vrot.lane.b32.xlu0 %v5557_v45, %s6933_s16 }
 0x286   : > { %1840 = vrot.lane.b32.xlu2 %v5572_v11, %s6918_s24  ;;  %3231 = vrot.lane.b32.xlu1 %v5557_v45, %s6867_s0  ;;  %s6935_s0 = smov 66  }
 0x28c   : > { %1691 = vrot.lane.b32.xlu0 %v5683_v58, %s6869_s15 }
 0x28e   : > { %1789 = vrot.lane.b32.xlu2 %v5687_v6, %s6934_s22  ;;  %1937 = vrot.lane.b32.xlu1 %v5568_v5, %s6869_s15 }
 0x294   : > { %1648 = vrot.lane.b32.xlu0 %v5687_v6, %s6935_s0 }
 0x296   : > { %1742 = vrot.lane.b32.xlu2 %v5687_v6, %s6936_s1  ;;  %1891 = vrot.lane.b32.xlu1 %v5568_v5, %s6935_s0 }
 0x29c   : > { %1979 = vrot.lane.b32.xlu0 %v5572_v11, %s6936_s1 }
 0x29e   : > { %1644 = vrot.lane.b32.xlu2 %v5683_v58, %s6935_s0  ;;  %1844 = vrot.lane.b32.xlu1 %v5568_v5, %s6918_s24 }
 0x2a4   : > { %1787 = vrot.lane.b32.xlu0 %v1773_v3, %s6934_s22 }
 0x2a6   : > { %1740 = vrot.lane.b32.xlu2 %v1726_v26, %s6936_s1  ;;  %1785 = vrot.lane.b32.xlu1 %v5683_v58, %s6934_s22  ;;  %v4892_v26 = vunpack.i.l.bf16 %v5693_v60 }
 0x2ac   : > { %2586 = vrot.lane.b32.xlu0 %v5568_v5, %s6923_s20 }
 0x2ae   : > { %2582 = vrot.lane.b32.xlu2 %v5572_v11, %s6923_s20  ;;  %1738 = vrot.lane.b32.xlu1 %v5683_v58, %s6936_s1 }
 0x2b0   : > { %v5729_v24 = vpop.permute.xlu2 %1689 }
 0x2b1   : > { %v1701_v54 = vrot.slane %v5729_v24, 4 }
 0x2b4   : > { %2540 = vrot.lane.b32.xlu0 %v5568_v5, %s6931_s21 }
 0x2b6   : > { %1693 = vrot.lane.b32.xlu2 %v1679_v10, %s6869_s15  ;;  %1695 = vrot.lane.b32.xlu1 %v5687_v6, %s6869_s15  ;;  %s6941_s15 = smov 122  }
 0x2b8   : > { %v5738_v63 = vpop.permute.xlu2 %1977 }
 0x2bc   : > { %2482 = vrot.lane.b32.xlu0 %v5683_v58, %s6923_s20 }
 0x2be   : > { %2536 = vrot.lane.b32.xlu2 %v5572_v11, %s6931_s21  ;;  %1983 = vrot.lane.b32.xlu1 %v5568_v5, %s6936_s1 }
 0x2c0   : > { %v5746_v36 = vpop.permute.xlu2 %2480  ;;  %v1932_v35 = vpop.permute.xlu1 %1931 }
 0x2c1   : > { %v1943_v7 = vrot.slane %v1932_v35, 4 }
 0x2c4   : > { %2439 = vrot.lane.b32.xlu0 %v5687_v6, %s6931_s21 }
 0x2c6   : > { %1646 = vrot.lane.b32.xlu2 %v1632_v19, %s6935_s0  ;;  %2486 = vrot.lane.b32.xlu1 %v5687_v6, %s6923_s20  ;;  %v2470_v19 = vld [vmem:[#allocation3 + $0x14] sm:$0xf] }
 0x2c8   : > { %v5755_v21 = vpop.permute.xlu2 %2380  ;;  %v1886_v22 = vpop.permute.xlu1 %1885 }
 0x2c9   : > { %v6878_v49 = vrot.slane %v5755_v21, 4 }
 0x2cb   : > { %v5775_v10 = vpop.xlane.xlu0 %1477 }
 0x2cc   : > { %2634 = vrot.lane.b32.xlu0 %v5683_v58, %s6931_s21  ;;  %6940 = vst [vmem:[#allocation27_spill] sm:$0xff] %v5775_v10 }
 0x2ce   : > { %2435 = vrot.lane.b32.xlu2 %v5683_v58, %s6931_s21  ;;  %2636 = vrot.lane.b32.xlu1 %v5762_v29, %s6931_s21 }
 0x2d0   : > { %v1934_v30 = vpop.permute.xlu2 %1933  ;;  %v1839_v13 = vpop.permute.xlu1 %1838 }
 0x2d1   : > { %v1944_v48 = vrot.slane %v1934_v30, 4 }
 0x2d3   : > { %v1949_v32 = vsel %vm638_vm0, %v1943_v7, %v1944_v48  ;;  %v1951_v59 = vsel %vm638_vm0, %v1944_v48, %v1945_v31  ;;  %v1899_v7 = vrot.slane %v4892_v26, 4  ;;  %v1897_v48 = vrot.slane %v1886_v22, 4 }
 0x2d4   : > { %2386 = vrot.lane.b32.xlu0 %v5568_v5, %s6923_s20  ;;  %v1950_v47 = vsel %vm1708_vm7, %v1932_v35, %v1949_v32  ;;  %v1952_v3 = vsel %vm1708_vm7, %v1934_v30, %v1951_v59  ;;  %v4897_v26 = vunpack.i.l.bf16 %v5748_v2 }
 0x2d5   : > { %1961 = vst [vmem:[#allocation4 + $0xe0] sm:$0xff] %v1950_v47  ;;  %v2368_v47 = vld [vmem:[#allocation3 + $0x10] sm:$0xf] }
 0x2d6   : > { %1962 = vst [vmem:[#allocation4 + $0xe8] sm:$0xff] %v1952_v3  ;;  %3233 = vrot.lane.b32.xlu2 %v5572_v11, %s6941_s15  ;;  %2484 = vrot.lane.b32.xlu1 %v2470_v19, %s6923_s20 }
 0x2d8   : > { %v1888_v23 = vpop.permute.xlu2 %1887  ;;  %v5780_v31 = vpop.permute.xlu1 %1642 }
 0x2d9   : > { %v1898_v35 = vrot.slane %v1888_v23, 4 }
 0x2db   : > { %v1903_v30 = vsel %vm638_vm0, %v1897_v48, %v1898_v35  ;;  %v1905_v32 = vsel %vm638_vm0, %v1898_v35, %v1899_v7 }
 0x2dc   : > { %3324 = vrot.lane.b32.xlu0 %v5683_v58, %s6942_s7  ;;  %v1904_v59 = vsel %vm1661_vm8, %v1886_v22, %v1903_v30  ;;  %v1906_v11 = vsel %vm1661_vm8, %v1888_v23, %v1905_v32  ;;  %v5788_v3 = vld [vmem:[#allocation4 + $0xe0] sm:$0xf]  ;;  %v5790_v19 = vld [vmem:[#allocation4 + $0xe4] sm:$0xf]  ;;  %v2615_v22 = vld [vmem:[#allocation3 + $0x14] sm:$0xff]  ;;  %v1852_v30 = vrot.slane %v4897_v26, 4 }
 0x2dd   : > { %1915 = vst [vmem:[#allocation4 + $0xc0] sm:$0xff] %v1904_v59  ;;  %v5795_v48 = vld [vmem:[#allocation4 + $0xe8] sm:$0xf]  ;;  %v5797_v7 = vld [vmem:[#allocation4 + $0xec] sm:$0xf]  ;;  %v1850_v32 = vrot.slane %v1839_v13, 4 }
 0x2de   : > { %v5793_v56 = vpop.permute.xlu0 %1783  ;;  %6943 = vst [vmem:[#allocation28_spill] sm:$0xff] %v5797_v7  ;;  %2382 = vrot.lane.b32.xlu2 %v2368_v47, %s6923_s20  ;;  %3326 = vrot.lane.b32.xlu1 %v5762_v29, %s6942_s7 }
 0x2df   : > { %1916 = vst [vmem:[#allocation4 + $0xc8] sm:$0xff] %v1906_v11 }
 0x2e0   : > { %2618 = vst [vmem:[#allocation4 + $0xe0] sm:$0xff] %v5683_v58  ;;  %v1841_v23 = vpop.permute.xlu2 %1840  ;;  %v5803_v35 = vpop.permute.xlu1 %2580 }
 0x2e1   : > { %2619 = vst [vmem:[#allocation4 + $0xe8] sm:$0xff] %v2615_v22  ;;  %v1851_v59 = vrot.slane %v1841_v23, 4 }
 0x2e3   : > { %v1856_v55 = vsel %vm638_vm0, %v1850_v32, %v1851_v59  ;;  %v1859_v11 = vsel %vm638_vm0, %v1851_v59, %v1852_v30  ;;  %v4917_v32 = vunpack.i.l.bf16 %v5713_v4  ;;  %v1654_v59 = vrot.slane %v5780_v31, 4 }
 0x2e4   : > { %3278 = vrot.lane.b32.xlu0 %v5683_v58, %s6907_s30  ;;  %v1858_v47 = vsel %vm1857_vm9, %v1839_v13, %v1856_v55  ;;  %v1860_v39 = vsel %vm1857_vm9, %v1841_v23, %v1859_v11  ;;  %v5904_v25 = vld [vmem:[#allocation4 + $0xc0] sm:$0xf]  ;;  %v5906_v7 = vld [vmem:[#allocation4 + $0xc4] sm:$0xf] }
 0x2e5   : > { %1869 = vst [vmem:[#allocation4 + $0xa0] sm:$0xff] %v1858_v47  ;;  %v1729_v47 = vld [vmem:[#allocation3 + $0x34] sm:$0xf]  ;;  %v2390_v33 = vrot.slane %v4917_v32, 4 }
 0x2e6   : > { %v5811_v50 = vpop.permute.xlu0 %1736  ;;  %1870 = vst [vmem:[#allocation4 + $0xa8] sm:$0xff] %v1860_v39  ;;  %3182 = vrot.lane.b32.xlu2 %v5687_v6, %s6932_s23  ;;  %2437 = vrot.lane.b32.xlu1 %v2423_v46, %s6931_s21  ;;  %v5832_v46 = vld [vmem:[#allocation3 + $0x2c] sm:$0xff] }
 0x2e8   : > { %v5816_v26 = vpop.permute.xlu2 %1789  ;;  %v5818_v22 = vpop.permute.xlu1 %2534 }
 0x2ec   : > { %3237 = vrot.lane.b32.xlu0 %v5568_v5, %s6941_s15 }
 0x2ee   : > { %v5822_v55 = vpop.permute.xlu0 %3176  ;;  %1939 = vrot.lane.b32.xlu2 %v5594_v1, %s6942_s7  ;;  %3280 = vrot.lane.b32.xlu1 %v5762_v29, %s6907_s30 }
 0x2f0   : > { %v5828_v39 = vpop.permute.xlu2 %1742  ;;  %v5830_v6 = vpop.permute.xlu1 %2433 }
 0x2f4   : > { %1744 = vrot.lane.b32.xlu0 %v5832_v46, %s6936_s1 }
 0x2f6   : > { %v5836_v13 = vpop.permute.xlu0 %3131  ;;  %1893 = vrot.lane.b32.xlu2 %v5594_v1, %s6935_s0  ;;  %3178 = vrot.lane.b32.xlu1 %v5683_v58, %s6932_s23 }
 0x2f7   : > { %6944 = vst [vmem:[#allocation29_spill] sm:$0xff] %v5836_v13 }
 0x2f8   : > { %v5842_v23 = vpop.permute.xlu2 %1644  ;;  %v5844_v30 = vpop.permute.xlu1 %3231 }
 0x2f9   : > { %v6874_v11 = vrot.slane %v5842_v23, 4 }
 0x2fb   : > { %v1660_v44 = vsel %vm638_vm0, %v1654_v59, %v6874_v11  ;;  %v1682_v11 = vld [vmem:[#allocation3 + $0x34] sm:$0xf] }
 0x2fc   : > { %1746 = vrot.lane.b32.xlu0 %v1729_v47, %s6936_s1  ;;  %v1662_v37 = vsel %vm1661_vm8, %v5780_v31, %v1660_v44 }
 0x2fd   : > { %1673 = vst [vmem:[#allocation4] sm:$0xff] %v1662_v37  ;;  %v2396_v37 = vsel %vm638_vm0, %v2390_v33, %v6878_v49  ;;  %v2594_v33 = vrot.slane %v4907_v52, 4  ;;  %v6949_v52 = vmov 0  }
 0x2fe   : > { %v5856_v10 = vpop.permute.xlu0 %1691  ;;  %1846 = vrot.lane.b32.xlu2 %v5594_v1, %s6918_s24  ;;  %1791 = vrot.lane.b32.xlu1 %v5832_v46, %s6934_s22  ;;  %s4633_s24 = sld [smem:[#allocation6 + $0x4]] }
 0x2ff   : > { %v6876_v53 = vrot.slane %v5856_v10, 4 }
 0x300   : > { %v5867_v31 = vpop.permute.xlu2 %1740  ;;  %v5869_v59 = vpop.permute.xlu1 %1937 }
 0x301   : > { %v1707_v44 = vsel %vm638_vm0, %v1701_v54, %v6876_v53  ;;  %v2398_v54 = vsel %vm2397_vm10, %v4917_v32, %v2396_v37  ;;  %v2592_v32 = vrot.slane %v5803_v35, 4 }
 0x302   : > { %v1709_v47 = vsel %vm1708_vm7, %v5729_v24, %v1707_v44  ;;  %v2413_v44 = vld [vmem:[#allocation3 + $0x4] sm:$0xff] }
 0x303   : > { %1720 = vst [vmem:[#allocation4 + $0x20] sm:$0xff] %v1709_v47 }
 0x304   : > { %1699 = vrot.lane.b32.xlu0 %v1682_v11, %s6942_s7  ;;  %v5879_v53 = vld [vmem:[#allocation4] sm:$0xf]  ;;  %v5881_v51 = vld [vmem:[#allocation4 + $0x4] sm:$0xf] }
 0x305   : > { %6945 = vst [vmem:[#allocation30_spill] sm:$0xff] %v5879_v53 }
 0x306   : > { %6946 = vst [vmem:[#allocation31_spill] sm:$0xff] %v5881_v51  ;;  %v5883_v8 = vpop.permute.xlu0 %1648  ;;  %1697 = vrot.lane.b32.xlu2 %v5832_v46, %s6942_s7  ;;  %1650 = vrot.lane.b32.xlu1 %v5832_v46, %s6935_s0 }
 0x307   : > { %2409 = vst [vmem:[#allocation4] sm:$0xff] %v2398_v54  ;;  %v4902_v54 = vunpack.i.l.bf16 %v5703_v14 }
 0x308   : > { %v2583_v24 = vpop.permute.xlu2 %2582  ;;  %v5889_v11 = vpop.permute.xlu1 %1891 }
 0x309   : > { %v2593_v37 = vrot.slane %v2583_v24, 4 }
 0x30a   : > { %v5892_v47 = vld [vmem:[#allocation4 + $0x20] sm:$0xf]  ;;  %v5894_v49 = vld [vmem:[#allocation4 + $0x24] sm:$0xf] }
 0x30b   : > { %6947 = vst [vmem:[#allocation32_spill] sm:$0xff] %v5892_v47  ;;  %v2598_v57 = vsel %vm638_vm0, %v2592_v32, %v2593_v37  ;;  %v2600_v41 = vsel %vm638_vm0, %v2593_v37, %v2594_v33  ;;  %v5910_v32 = vld [vmem:[#allocation4 + $0xcc] sm:$0xf]  ;;  %v1991_v33 = vrot.slane %v4902_v54, 4  ;;  %v1989_v37 = vrot.slane %v5738_v63, 4 }
 0x30c   : > { %6948 = vst [vmem:[#allocation33_spill] sm:$0xff] %v5894_v49  ;;  %4945 = vrot.lane.b32.xlu0 %v6949_v52, %s6942_s7  ;;  %v2599_v40 = vsel %vm2397_vm10, %v5803_v35, %v2598_v57  ;;  %v2601_v18 = vsel %vm2397_vm10, %v2583_v24, %v2600_v41  ;;  %v3221_v41 = vld [vmem:[#allocation3 + $0x18] sm:$0xf]  ;;  %v1635_v47 = vld [vmem:[#allocation3 + $0x34] sm:$0xf] }
 0x30d   : > { %2417 = vst [vmem:[#allocation4 + $0x20] sm:$0xff] %v2413_v44  ;;  %v5908_v44 = vld [vmem:[#allocation4 + $0xc8] sm:$0xf]  ;;  %v3224_v57 = vld [vmem:[#allocation3 + $0x38] sm:$0xf] }
 0x30e   : > { %v1980_v51 = vpop.permute.xlu0 %1979  ;;  %2610 = vst [vmem:[#allocation4 + $0xc0] sm:$0xff] %v2599_v40  ;;  %1985 = vrot.lane.b32.xlu2 %v5594_v1, %s6936_s1  ;;  %1793 = vrot.lane.b32.xlu1 %v1776_v43, %s6934_s22  ;;  %v4939_v38 = vpack.i.bf16 %v3224_v57, %v3221_v41  ;;  %v6951_v43 = vrot.slane %v5856_v10, 4 }
 0x30f   : > { %6950 = vst [vmem:[#allocation34_spill] sm:$0xff] %v5910_v32  ;;  %v1990_v52 = vrot.slane %v1980_v51, 4 }
 0x310   : > { %2611 = vst [vmem:[#allocation4 + $0xc8] sm:$0xff] %v2601_v18  ;;  %v1694_v24 = vpop.permute.xlu2 %1693  ;;  %v5918_v53 = vpop.permute.xlu1 %1844 }
 0x311   : > { %v1995_v35 = vsel %vm638_vm0, %v1989_v37, %v1990_v52  ;;  %v1997_v40 = vsel %vm638_vm0, %v1990_v52, %v1991_v33  ;;  %v1703_v49 = vrot.slane %v1694_v24, 4  ;;  %v4912_v33 = vunpack.i.l.bf16 %v5695_v61 }
 0x312   : > { %v1996_v54 = vsel %vm1755_vm12, %v5738_v63, %v1995_v35  ;;  %v1998_v32 = vsel %vm1755_vm12, %v1980_v51, %v1997_v40  ;;  %v2546_v52 = vrot.slane %v5818_v22, 4 }
 0x313   : > { %2007 = vst [vmem:[#allocation4 + $0x100] sm:$0xff] %v1996_v54  ;;  %v1710_v18 = vsel %vm638_vm0, %v6951_v43, %v1703_v49  ;;  %v2548_v51 = vrot.slane %v4912_v33, 4 }
 0x314   : > { %2008 = vst [vmem:[#allocation4 + $0x108] sm:$0xff] %v1998_v32  ;;  %1652 = vrot.lane.b32.xlu0 %v1635_v47, %s6935_s0  ;;  %v1711_v37 = vsel %vm1708_vm7, %v5856_v10, %v1710_v18  ;;  %v1795_v32 = vrot.slane %v5793_v56, 4  ;;  %s4996_s0 = scalar_lea.hbm %s6832_s13, 128 }
 0x315   : > { %1721 = vst [vmem:[#allocation4 + $0x28] sm:$0xff] %v1711_v37 }
 0x316   : > { %v1788_v63 = vpop.permute.xlu0 %1787  ;;  %4940 = vrot.lane.b32.xlu2 %v4939_v38, %s6941_s15  ;;  %2588 = vrot.lane.b32.xlu1 %v5594_v1, %s6923_s20 }
 0x317   : > { %v1797_v41 = vrot.slane %v1788_v63, 4  ;;  %v5949_v63 = vld [vmem:[#allocation4 + $0xa0] sm:$0xf] }
 0x318   : > { %v2537_v49 = vpop.permute.xlu2 %2536  ;;  %v1786_v47 = vpop.permute.xlu1 %1785 }
 0x319   : > { %v2547_v57 = vrot.slane %v2537_v49, 4  ;;  %v1796_v35 = vrot.slane %v1786_v47, 4 }
 0x31b   : > { %v2552_v10 = vsel %vm638_vm0, %v2546_v52, %v2547_v57  ;;  %v2554_v40 = vsel %vm638_vm0, %v2547_v57, %v2548_v51  ;;  %v1801_v38 = vsel %vm638_vm0, %v1795_v32, %v1796_v35  ;;  %v1804_v24 = vsel %vm638_vm0, %v1796_v35, %v1797_v41  ;;  %v5961_v51 = vld [vmem:[#allocation4 + $0xa8] sm:$0xf]  ;;  %v5963_v32 = vld [vmem:[#allocation4 + $0xac] sm:$0xf] }
 0x31c   : > { %3370 = vrot.lane.b32.xlu0 %v5683_v58, %s6933_s16  ;;  %v2553_v54 = vsel %vm2452_vm14, %v5818_v22, %v2552_v10  ;;  %v1803_v43 = vsel %vm1802_vm15, %v5793_v56, %v1801_v38  ;;  %v1805_v18 = vsel %vm1802_vm15, %v1786_v47, %v1804_v24  ;;  %v2555_v33 = vsel %vm2452_vm14, %v2537_v49, %v2554_v40  ;;  %v5951_v58 = vld [vmem:[#allocation4 + $0xa4] sm:$0xf]  ;;  %v5957_v22 = vld [vmem:[#allocation4 + $0x28] sm:$0xf]  ;;  %v5959_v56 = vld [vmem:[#allocation4 + $0x2c] sm:$0xf] }
 0x31d   : > { %1814 = vst [vmem:[#allocation4 + $0x60] sm:$0xff] %v1803_v43  ;;  %v2414_v47 = vld [vmem:[#allocation3 + $0xc] sm:$0xff]  ;;  %v1748_v41 = vrot.slane %v5811_v50, 4  ;;  %v1750_v57 = vrot.slane %v5867_v31, 4  ;;  %v5967_v40 = vld [vmem:[#allocation3 + $0x34] sm:$0xff]  ;;  %v6955_v38 = vrot.slane %v5842_v23, 4 }
 0x31e   : > { %v5947_v37 = vpop.permute.xlu0 %2586  ;;  %2488 = vrot.lane.b32.xlu2 %v5832_v46, %s6923_s20  ;;  %1815 = vst [vmem:[#allocation4 + $0x68] sm:$0xff] %v1805_v18  ;;  %2542 = vrot.lane.b32.xlu1 %v5594_v1, %s6931_s21 }
 0x31f   : > { %6952 = vst [vmem:[#allocation35_spill] sm:$0xff] %v5957_v22 }
 0x320   : > { %6953 = vst [vmem:[#allocation36_spill] sm:$0xff] %v5959_v56  ;;  %v1647_v52 = vpop.permute.xlu2 %1646  ;;  %v1739_v49 = vpop.permute.xlu1 %1738 }
 0x321   : > { %2564 = vst [vmem:[#allocation4 + $0xa0] sm:$0xff] %v2553_v54  ;;  %v1656_v35 = vrot.slane %v1647_v52, 4  ;;  %v1749_v10 = vrot.slane %v1739_v49, 4 }
 0x322   : > { %6954 = vst [vmem:[#allocation37_spill] sm:$0xff] %v5963_v32 }
 0x323   : > { %2565 = vst [vmem:[#allocation4 + $0xa8] sm:$0xff] %v2555_v33  ;;  %v1663_v24 = vsel %vm638_vm0, %v6955_v38, %v1656_v35  ;;  %v1754_v54 = vsel %vm638_vm0, %v1748_v41, %v1749_v10  ;;  %v1757_v43 = vsel %vm638_vm0, %v1749_v10, %v1750_v57  ;;  %v4937_v57 = vunpack.i.l.bf16 %v5717_v0 }
 0x324   : > { %2418 = vst [vmem:[#allocation4 + $0x28] sm:$0xff] %v2414_v47  ;;  %2642 = vrot.lane.b32.xlu0 %v5967_v40, %s6931_s21  ;;  %v1664_v18 = vsel %vm1661_vm8, %v5842_v23, %v1663_v24  ;;  %v1756_v31 = vsel %vm1755_vm12, %v5811_v50, %v1754_v54  ;;  %v1758_v33 = vsel %vm1755_vm12, %v1739_v49, %v1757_v43  ;;  %v2445_v23 = vrot.slane %v5830_v6, 4  ;;  %v6025_v0 = vld [vmem:[#allocation4 + $0x60] sm:$0xf]  ;;  %v6027_v56 = vld [vmem:[#allocation4 + $0x64] sm:$0xf] }
 0x325   : > { %1674 = vst [vmem:[#allocation4 + $0x8] sm:$0xff] %v1664_v18  ;;  %v2492_v54 = vrot.slane %v5746_v36, 4 }
 0x326   : > { %v5981_v52 = vpop.permute.xlu0 %2540  ;;  %3091 = vrot.lane.b32.xlu2 %v5568_v5, %s6942_s7  ;;  %1767 = vst [vmem:[#allocation4 + $0x40] sm:$0xff] %v1756_v31  ;;  %3137 = vrot.lane.b32.xlu1 %v5568_v5, %s6933_s16  ;;  %v3243_v31 = vrot.slane %v5844_v30, 4 }
 0x327   : > { %6956 = vst [vmem:[#allocation38_spill] sm:$0xff] %v5981_v52 }
 0x328   : > { %1768 = vst [vmem:[#allocation4 + $0x48] sm:$0xff] %v1758_v33  ;;  %v5987_v47 = vpop.permute.xlu2 %2435  ;;  %v5989_v41 = vpop.permute.xlu1 %1695 }
 0x329   : > { %v6886_v50 = vrot.slane %v5987_v47, 4 }
 0x32b   : > { %v2451_v49 = vsel %vm638_vm0, %v2445_v23, %v6886_v50 }
 0x32c   : > { %3332 = vrot.lane.b32.xlu0 %v5967_v40, %s6942_s7  ;;  %v2453_v35 = vsel %vm2452_vm14, %v5830_v6, %v2451_v49  ;;  %v3141_v6 = vrot.slane %v4937_v57, 4 }
 0x32d   : > { %v6003_v38 = vld [vmem:[#allocation4 + $0x40] sm:$0xf]  ;;  %v6005_v24 = vld [vmem:[#allocation4 + $0x44] sm:$0xf] }
 0x32e   : > { %v6001_v10 = vpop.permute.xlu0 %2482  ;;  %2640 = vrot.lane.b32.xlu2 %v5832_v46, %s6931_s21  ;;  %2441 = vrot.lane.b32.xlu1 %v5832_v46, %s6931_s21  ;;  %2464 = vst [vmem:[#allocation4 + $0x40] sm:$0xff] %v2453_v35  ;;  %v6957_v35 = vrot.slane %v5836_v13, 4 }
 0x32f   : > { %v6888_v18 = vrot.slane %v6001_v10, 4 }
 0x330   : > { %v6018_v23 = vpop.permute.xlu2 %3233  ;;  %v6020_v49 = vpop.permute.xlu1 %1983  ;;  %v3147_v22 = vsel %vm638_vm0, %v3141_v6, %v6957_v35 }
 0x331   : > { %v2498_v33 = vsel %vm638_vm0, %v2492_v54, %v6888_v18  ;;  %v6892_v43 = vrot.slane %v6018_v23, 4  ;;  %v6039_v18 = vld [vmem:[#allocation4 + $0xa4] sm:$0xf]  ;;  %v3149_v13 = vsel %vm3148_vm2, %v4937_v57, %v3147_v22 }
 0x332   : > { %v2499_v50 = vsel %vm2397_vm10, %v5746_v36, %v2498_v33  ;;  %v2473_v36 = vld [vmem:[#allocation3 + $0x34] sm:$0xf]  ;;  %v6037_v33 = vld [vmem:[#allocation4 + $0xa0] sm:$0xf]  ;;  %6959 = vst [vmem:[#allocation40_spill] sm:$0xff] %v6039_v18 }
 0x333   : > { %2510 = vst [vmem:[#allocation4 + $0x60] sm:$0xff] %v2499_v50  ;;  %v3249_v54 = vsel %vm638_vm0, %v3243_v31, %v6892_v43 }
 0x334   : > { %3286 = vrot.lane.b32.xlu0 %v5967_v40, %s6907_s30  ;;  %6958 = vst [vmem:[#allocation39_spill] sm:$0xff] %v6037_v33  ;;  %v3251_v32 = vsel %vm3250_vm1, %v5844_v30, %v3249_v54  ;;  %v1530_v30 = vld [vmem:[%s6821_s2] sm:$0xf]  ;;  %v6070_v54 = vld [vmem:[#allocation4 + $0xc] sm:$0xf] }
 0x335   : > { %v6046_v50 = vld [vmem:[#allocation4 + $0x40] sm:$0xf]  ;;  %v6048_v6 = vld [vmem:[#allocation4 + $0x44] sm:$0xf]  ;;  %3262 = vst [vmem:[#allocation4 + $0xa0] sm:$0xff] %v3251_v32  ;;  %4177 = vmatmul.msk.bf16.vlgmr.msrb.gmra.mxu2 %vm1310_vm13, %v1530_v30  ;;  %4178 = vmatmul.msk.bf16.vlgmr.msra.gmra.mxu1 %vm1310_vm13, %v1530_v30  ;;  %v6963_v32 = vrot.slane %v5755_v21, 4 }
 0x336   : > { %v6044_v52 = vpop.permute.xlu0 %2439  ;;  %6961 = vst [vmem:[#allocation42_spill] sm:$0xff] %v6046_v50  ;;  %2490 = vrot.lane.b32.xlu2 %v2473_v36, %s6923_s20  ;;  %3085 = vrot.lane.b32.xlu1 %v5557_v45, %s6942_s7  ;;  %v4922_v36 = vunpack.i.l.bf16 %v5723_v9  ;;  %v6091_v33 = vld [vmem:[#allocation4 + $0x100] sm:$0xf]  ;;  %v3166_v9 = vld [vmem:[#allocation3 + $0x14] sm:$0xf] }
 0x337   : > { %6960 = vst [vmem:[#allocation41_spill] sm:$0xff] %v6044_v52  ;;  %4179 = vmatmul.msk.bf16.vlgmr.msra.gmra.mxu0 %vm1310_vm13, %v1530_v30  ;;  %v6084_v52 = vld [vmem:[#allocation4 + $0x108] sm:$0xf] }
 0x338   : > { %6962 = vst [vmem:[#allocation43_spill] sm:$0xff] %v6048_v6  ;;  %v2383_v31 = vpop.permute.xlu2 %2382  ;;  %v6053_v35 = vpop.permute.xlu1 %2486 }
 0x339   : > { %3160 = vst [vmem:[#allocation4 + $0x40] sm:$0xff] %v3149_v13  ;;  %v2392_v22 = vrot.slane %v2383_v31, 4  ;;  %v6068_v13 = vld [vmem:[#allocation4 + $0x8] sm:$0xf] }
 0x33a   : > { %6964 = vst [vmem:[#allocation44_spill] sm:$0xff] %v6068_v13 }
 0x33b   : > { %v2399_v57 = vsel %vm638_vm0, %v6963_v32, %v2392_v22  ;;  %6965 = vst [vmem:[#allocation45_spill] sm:$0xff] %v6070_v54  ;;  %v2648_v32 = vrot.slane %v4922_v36, 4  ;;  %v6082_v54 = vld [vmem:[#allocation4 + $0x10c] sm:$0xf]  ;;  %v4888_v36 = vunpack.i.h.bf16 %v5681_v16 }
 0x33c   : > { %3044 = vrot.lane.b32.xlu0 %v5568_v5, %s6907_s30  ;;  %v2400_v45 = vsel %vm2397_vm10, %v5755_v21, %v2399_v57  ;;  %v2371_v57 = vld [vmem:[#allocation3 + $0x30] sm:$0xf] }
 0x33d   : > { %2410 = vst [vmem:[#allocation4 + $0x8] sm:$0xff] %v2400_v45  ;;  %v2426_v45 = vld [vmem:[#allocation3 + $0x34] sm:$0xf] }
 0x33e   : > { %v2635_v31 = vpop.permute.xlu0 %2634  ;;  %3330 = vrot.lane.b32.xlu2 %v5832_v46, %s6942_s7  ;;  %3239 = vrot.lane.b32.xlu1 %v5594_v1, %s6941_s15  ;;  %s4331_s15 = sld [smem:[#allocation6 + $0x2]] }
 0x33f   : > { %v2646_v43 = vrot.slane %v2635_v31, 4 }
 0x340   : > { %v6077_v22 = vpop.permute.xlu2 %3182  ;;  %v2637_v5 = vpop.permute.xlu1 %2636 }
 0x341   : > { %6966 = vst [vmem:[#allocation46_spill] sm:$0xff] %v6077_v22  ;;  %v2647_v21 = vrot.slane %v2637_v5, 4 }
 0x343   : > { %v2652_v6 = vsel %vm638_vm0, %v2646_v43, %v2647_v21  ;;  %v2654_v50 = vsel %vm638_vm0, %v2647_v21, %v2648_v32 }
 0x344   : > { %2388 = vrot.lane.b32.xlu0 %v2371_v57, %s6923_s20  ;;  %v2653_v1 = vsel %vm2452_vm14, %v2635_v31, %v2652_v6  ;;  %v2655_v22 = vsel %vm2452_vm14, %v2637_v5, %v2654_v50  ;;  %v6093_v57 = vld [vmem:[#allocation4 + $0x104] sm:$0xf]  ;;  %v1948_v6 = vrot.slane %v4888_v36, 4  ;;  %v1946_v50 = vrot.slane %v5869_v59, 4  ;;  %s4176_s20 = sld [smem:[#allocation6 + $0x5]] }
 0x345   : > { %2665 = vst [vmem:[#allocation4 + $0x108] sm:$0xff] %v2655_v22  ;;  %4180 = vmatmul.msk.bf16.vlgmr.msra.gmra.mxu2 %vm1310_vm13, %v1530_v30  ;;  %v4960_v22 = vld [vmem:[#allocation3] sm:$0xff] }
 0x346   : > { %v6089_v18 = vpop.permute.xlu0 %2386  ;;  %2443 = vrot.lane.b32.xlu2 %v2426_v45, %s6931_s21  ;;  %3372 = vrot.lane.b32.xlu1 %v5762_v29, %s6933_s16  ;;  %2664 = vst [vmem:[#allocation4 + $0x100] sm:$0xff] %v2653_v1  ;;  %v4949_v5 = vpack.i.bf16 %v4960_v22, %v4960_v22  ;;  %v6967_v29 = vrot.slane %v6001_v10, 4  ;;  %v4893_v1 = vunpack.i.h.bf16 %v5693_v60  ;;  %v6119_v60 = vld [vmem:[#allocation4 + $0x6c] sm:$0xf]  ;;  %s4795_s21 = sshll.u32 %s5165_s29, 6 }
 0x347   : > { %6968 = vst [vmem:[#allocation47_spill] sm:$0xff] %v6119_v60 }
 0x348   : > { %v1940_v43 = vpop.permute.xlu2 %1939  ;;  %v2485_v32 = vpop.permute.xlu1 %2484 }
 0x349   : > { %v1947_v31 = vrot.slane %v1940_v43, 4  ;;  %v2494_v16 = vrot.slane %v2485_v32, 4 }
 0x34b   : > { %v1953_v21 = vsel %vm638_vm0, %v1946_v50, %v1947_v31  ;;  %v1955_v13 = vsel %vm638_vm0, %v1947_v31, %v1948_v6  ;;  %v2500_v45 = vsel %vm638_vm0, %v6967_v29, %v2494_v16  ;;  %v4927_v6 = vunpack.i.l.bf16 %v5707_v62  ;;  %v6117_v31 = vld [vmem:[#allocation4 + $0x68] sm:$0xf] }
 0x34c   : > { %3184 = vrot.lane.b32.xlu0 %v5832_v46, %s6932_s23  ;;  %v1954_v36 = vsel %vm1708_vm7, %v5869_v59, %v1953_v21  ;;  %v1956_v30 = vsel %vm1708_vm7, %v1940_v43, %v1955_v13  ;;  %v2501_v32 = vsel %vm2397_vm10, %v6001_v10, %v2500_v45  ;;  %v1902_v59 = vrot.slane %v4893_v1, 4 }
 0x34d   : > { %1963 = vst [vmem:[#allocation4 + $0xf0] sm:$0xff] %v1954_v36  ;;  %v1900_v10 = vrot.slane %v5889_v11, 4  ;;  %v3338_v29 = vrot.slane %v4927_v6, 4 }
 0x34e   : > { %v3325_v50 = vpop.permute.xlu0 %3324  ;;  %1964 = vst [vmem:[#allocation4 + $0xf8] sm:$0xff] %v1956_v30  ;;  %3284 = vrot.lane.b32.xlu2 %v5832_v46, %s6907_s30  ;;  %4950 = vrot.lane.b32.xlu1 %v4949_v5, %s6907_s30  ;;  %v4898_v30 = vunpack.i.h.bf16 %v5748_v2 }
 0x34f   : > { %2511 = vst [vmem:[#allocation4 + $0x68] sm:$0xff] %v2501_v32  ;;  %v3336_v16 = vrot.slane %v3325_v50, 4 }
 0x350   : > { %v1894_v13 = vpop.permute.xlu2 %1893  ;;  %v3327_v43 = vpop.permute.xlu1 %3326 }
 0x351   : > { %v1901_v22 = vrot.slane %v1894_v13, 4  ;;  %v3337_v21 = vrot.slane %v3327_v43, 4 }
 0x353   : > { %v1907_v45 = vsel %vm638_vm0, %v1900_v10, %v1901_v22  ;;  %v1909_v36 = vsel %vm638_vm0, %v1901_v22, %v1902_v59  ;;  %v3342_v5 = vsel %vm638_vm0, %v3336_v16, %v3337_v21  ;;  %v3344_v6 = vsel %vm638_vm0, %v3337_v21, %v3338_v29  ;;  %v6149_v21 = vld [vmem:[#allocation4 + $0xe4] sm:$0xf] }
 0x354   : > { %3378 = vrot.lane.b32.xlu0 %v5967_v40, %s6933_s16  ;;  %v1908_v1 = vsel %vm1661_vm8, %v5889_v11, %v1907_v45  ;;  %v1910_v32 = vsel %vm1661_vm8, %v1894_v13, %v1909_v36  ;;  %v4717_v60 = vld [vmem:[#allocation4 + $0xec] sm:$0xf0]  ;;  %v4299_v62 = vld [vmem:[#allocation4 + $0xf0] sm:$0xf0]  ;;  %v3343_v11 = vsel %vm1708_vm7, %v3325_v50, %v3342_v5  ;;  %v1853_v50 = vrot.slane %v5918_v53, 4 }
 0x355   : > { %1917 = vst [vmem:[#allocation4 + $0xd0] sm:$0xff] %v1908_v1  ;;  %v4298_v59 = vor.u32 %v4717_v60, %v5788_v3  ;;  %v4302_v22 = vor.u32 %v5790_v19, %v4299_v62  ;;  %v6136_v16 = vld [vmem:[#allocation4 + $0xf4] sm:$0xf0]  ;;  %v6138_v2 = vld [vmem:[#allocation4 + $0xf8] sm:$0xf0]  ;;  %v3345_v3 = vsel %vm1708_vm7, %v3327_v43, %v3344_v6  ;;  %v1855_v62 = vrot.slane %v4898_v30, 4 }
 0x356   : > { %v6132_v10 = vpop.permute.xlu0 %3278  ;;  %1918 = vst [vmem:[#allocation4 + $0xd8] sm:$0xff] %v1910_v32  ;;  %3038 = vrot.lane.b32.xlu2 %v5583_v17, %s6907_s30  ;;  %3180 = vrot.lane.b32.xlu1 %v3166_v9, %s6932_s23  ;;  %v6146_v60 = vld [vmem:[#allocation4 + $0xe0] sm:$0xf]  ;;  %v6151_v17 = vld [vmem:[#allocation4 + $0xe8] sm:$0xf]  ;;  %v4932_v1 = vunpack.i.l.bf16 %v5736_v15 }
 0x357   : > { %2244 = vmatpush.bf16.msrb.mxu1 %v4298_v59  ;;  %2270 = vmatpush.bf16.msrb.mxu0 %v4302_v22  ;;  %2620 = vst [vmem:[#allocation4 + $0xf0] sm:$0xff] %v5832_v46  ;;  %v6154_v45 = vld [vmem:[#allocation4 + $0xec] sm:$0xf]  ;;  %v3119_v36 = vld [vmem:[#allocation3 + $0x10] sm:$0xf] }
 0x358   : > { %v1847_v19 = vpop.permute.xlu2 %1846  ;;  %v2438_v13 = vpop.permute.xlu1 %2437  ;;  %2621 = vst [vmem:[#allocation4 + $0xf8] sm:$0xff] %v5967_v40  ;;  %v6969_v40 = vrot.slane %v5987_v47, 4 }
 0x359   : > { %v1854_v9 = vrot.slane %v1847_v19, 4  ;;  %v2447_v29 = vrot.slane %v2438_v13, 4  ;;  %3354 = vst [vmem:[#allocation4 + $0xe0] sm:$0xff] %v3343_v11 }
 0x35a   : > { %3355 = vst [vmem:[#allocation4 + $0xe8] sm:$0xff] %v3345_v3 }
 0x35b   : > { %v1861_v43 = vsel %vm638_vm0, %v1853_v50, %v1854_v9  ;;  %v1863_v5 = vsel %vm638_vm0, %v1854_v9, %v1855_v62  ;;  %v2454_v30 = vsel %vm638_vm0, %v6969_v40, %v2447_v29  ;;  %v3122_v50 = vld [vmem:[#allocation3 + $0x30] sm:$0xf]  ;;  %v1704_v9 = vrot.slane %v5989_v41, 4  ;;  %v3169_v40 = vld [vmem:[#allocation3 + $0x34] sm:$0xf] }
 0x35c   : > { %3133 = vrot.lane.b32.xlu0 %v3119_v36, %s6933_s16  ;;  %v1862_v32 = vsel %vm1857_vm9, %v5918_v53, %v1861_v43  ;;  %v1864_v6 = vsel %vm1857_vm9, %v1847_v19, %v1863_v5  ;;  %v4713_v59 = vld [vmem:[#allocation4 + $0xcc] sm:$0xf0]  ;;  %v4283_v22 = vld [vmem:[#allocation4 + $0xd0] sm:$0xf0]  ;;  %v2455_v11 = vsel %vm2452_vm14, %v5987_v47, %v2454_v30  ;;  %v6175_v53 = vld [vmem:[#allocation4 + $0x48] sm:$0xf] }
 0x35d   : > { %1871 = vst [vmem:[#allocation4 + $0xb0] sm:$0xff] %v1862_v32  ;;  %v4282_v62 = vor.u32 %v4713_v59, %v5904_v25  ;;  %v4286_v13 = vor.u32 %v5906_v7, %v4283_v22  ;;  %v6177_v19 = vld [vmem:[#allocation4 + $0x4c] sm:$0xf]  ;;  %v3292_v47 = vrot.slane %v4932_v1, 4  ;;  %v3290_v29 = vrot.slane %v6132_v10, 4 }
 0x35e   : > { %v6168_v3 = vpop.permute.xlu0 %3237  ;;  %1872 = vst [vmem:[#allocation4 + $0xb8] sm:$0xff] %v1864_v6  ;;  %3376 = vrot.lane.b32.xlu2 %v5832_v46, %s6933_s16  ;;  %3139 = vrot.lane.b32.xlu1 %v3122_v50, %s6933_s16  ;;  %v3076_v43 = vld [vmem:[#allocation3 + $0x30] sm:$0xf]  ;;  %v3360_v32 = vld [vmem:[#allocation3 + $0x1c] sm:$0xf]  ;;  %v4903_v59 = vunpack.i.h.bf16 %v5703_v14 }
 0x35f   : > { %2245 = vmatpush.bf16.msrb.mxu1 %v4282_v62  ;;  %2271 = vmatpush.bf16.msrb.mxu0 %v4286_v13  ;;  %2465 = vst [vmem:[#allocation4 + $0x48] sm:$0xff] %v2455_v11  ;;  %v3026_v6 = vld [vmem:[#allocation3 + $0x10] sm:$0xf]  ;;  %v6199_v14 = vld [vmem:[#allocation4 + $0xc0] sm:$0xf] }
 0x360   : > { %v6180_v25 = vpop.permute.xlu2 %1697  ;;  %v3281_v7 = vpop.permute.xlu1 %3280 }
 0x361   : > { %v6897_v36 = vrot.slane %v6180_v25, 4  ;;  %v3291_v46 = vrot.slane %v3281_v7, 4 }
 0x363   : > { %v1712_v5 = vsel %vm638_vm0, %v1704_v9, %v6897_v36  ;;  %v3296_v30 = vsel %vm638_vm0, %v3290_v29, %v3291_v46  ;;  %v3298_v1 = vsel %vm638_vm0, %v3291_v46, %v3292_v47  ;;  %v3363_v9 = vld [vmem:[#allocation3 + $0x3c] sm:$0xf]  ;;  %v6201_v36 = vld [vmem:[#allocation4 + $0xc4] sm:$0xf] }
 0x364   : > { %3093 = vrot.lane.b32.xlu0 %v3076_v43, %s6942_s7  ;;  %v1713_v22 = vsel %vm1708_vm7, %v5989_v41, %v1712_v5  ;;  %v4709_v11 = vld [vmem:[#allocation4 + $0xac] sm:$0xf0]  ;;  %v4267_v62 = vld [vmem:[#allocation4 + $0xb0] sm:$0xf0]  ;;  %v3297_v13 = vsel %vm3055_vm3, %v6132_v10, %v3296_v30  ;;  %v3299_v50 = vsel %vm3055_vm3, %v3281_v7, %v3298_v1  ;;  %v1751_v43 = vrot.slane %v5828_v39, 4 }
 0x365   : > { %1722 = vst [vmem:[#allocation4 + $0x30] sm:$0xff] %v1713_v22  ;;  %v4266_v47 = vor.u32 %v4709_v11, %v5949_v63  ;;  %v4270_v46 = vor.u32 %v5951_v58, %v4267_v62  ;;  %v6205_v10 = vld [vmem:[#allocation4 + $0xc8] sm:$0xf]  ;;  %v6207_v7 = vld [vmem:[#allocation4 + $0xcc] sm:$0xf]  ;;  %v4954_v5 = vpack.i.bf16 %v3363_v9, %v3360_v32  ;;  %v1994_v63 = vrot.slane %v4903_v59, 4 }
 0x366   : > { %v1745_v29 = vpop.permute.xlu0 %1744  ;;  %3186 = vrot.lane.b32.xlu2 %v3169_v40, %s6932_s23  ;;  %3040 = vrot.lane.b32.xlu1 %v3026_v6, %s6907_s30  ;;  %3308 = vst [vmem:[#allocation4 + $0xc0] sm:$0xff] %v3297_v13  ;;  %v3188_v58 = vrot.slane %v5822_v55, 4  ;;  %v1992_v40 = vrot.slane %v6020_v49, 4  ;;  %v6970_v13 = vor.u32 %v5608_v28, %v5587_v12  ;;  %s3933_s23 = scalar_lea.hbm %s6832_s13, %s4795_s21 }
 0x367   : > { %v1752_v41 = vrot.slane %v1745_v29, 4  ;;  %2246 = vmatpush.bf16.msrb.mxu1 %v4266_v47  ;;  %2272 = vmatpush.bf16.msrb.mxu0 %v4270_v46  ;;  %3309 = vst [vmem:[#allocation4 + $0xc8] sm:$0xff] %v3299_v50  ;;  %v6971_v47 = vor.u32 %v5589_v20, %v5612_v34  ;;  %v6245_v20 = vld [vmem:[%s6822_s3] sm:$0xff]  ;;  %v6247_v34 = vld [vmem:[#allocation4 + $0x60] sm:$0xf]  ;;  %s3936_s29 = sshll.u32 %s3933_s23, 4  ;;  %s3937_s29 = int_to_ptr.hbm [resolvable:$true] %s3936_s29 }
 0x368   : > { %v1986_v1 = vpop.permute.xlu2 %1985  ;;  %v6211_v22 = vpop.permute.xlu1 %3178 }
 0x369   : > { %v1759_v30 = vsel %vm638_vm0, %v1751_v43, %v1752_v41  ;;  %v1993_v11 = vrot.slane %v1986_v1, 4  ;;  %v3189_v62 = vrot.slane %v6211_v22, 4 }
 0x36a   : > { %v1760_v6 = vsel %vm1755_vm12, %v5828_v39, %v1759_v30  ;;  %v4484_v39 = vld [vmem:[%s6827_s8 + $0x18] sm:$0xff]  ;;  %v6249_v30 = vld [vmem:[#allocation4 + $0x64] sm:$0xf] }
 0x36b   : > { %1769 = vst [vmem:[#allocation4 + $0x50] sm:$0xff] %v1760_v6  ;;  %v1999_v32 = vsel %vm638_vm0, %v1992_v40, %v1993_v11  ;;  %v2001_v59 = vsel %vm638_vm0, %v1993_v11, %v1994_v63  ;;  %2247 = vmatpush.bf16.msrb.mxu1 %v6970_v13  ;;  %v3194_v50 = vsel %vm638_vm0, %v3188_v58, %v3189_v62  ;;  %v1798_v6 = vrot.slane %v5816_v26, 4 }
 0x36c   : > { %4955 = vrot.lane.b32.xlu0 %v4954_v5, %s6933_s16  ;;  %v2000_v9 = vsel %vm1755_vm12, %v6020_v49, %v1999_v32  ;;  %v2002_v43 = vsel %vm1755_vm12, %v1986_v1, %v2001_v59  ;;  %2273 = vmatpush.bf16.msrb.mxu0 %v6971_v47  ;;  %v6235_v46 = vld [vmem:[#allocation4 + $0x2c] sm:$0xf0]  ;;  %v6237_v12 = vld [vmem:[#allocation4 + $0x30] sm:$0xf0]  ;;  %v3196_v63 = vsel %vm3195_vm4, %v5822_v55, %v3194_v50  ;;  %v2415_v49 = vld [vmem:[#allocation3 + $0x24] sm:$0xff]  ;;  %v2057_v13 = vunpack.c.h.b16 %v6245_v20 }
 0x36d   : > { %2009 = vst [vmem:[#allocation4 + $0x110] sm:$0xff] %v2000_v9  ;;  %v3073_v5 = vld [vmem:[#allocation3 + $0x10] sm:$0xf] }
 0x36e   : > { %v1747_v28 = vpop.permute.xlu0 %1746  ;;  %2010 = vst [vmem:[#allocation4 + $0x118] sm:$0xff] %v2002_v43  ;;  %3087 = vrot.lane.b32.xlu2 %v3073_v5, %s6942_s7  ;;  %3446 = vperm.xlu1 %4882, %v4484_v39   ;;  %v1531_v39 = vld [vmem:[%s6827_s8] sm:$0xff]  ;;  %v3029_v9 = vld [vmem:[#allocation3 + $0x30] sm:$0xf]  ;;  %s4482_s7 = sld [smem:[#allocation6 + $0x3]] }
 0x36f   : > { %v1753_v58 = vrot.slane %v1747_v28, 4  ;;  %2419 = vst [vmem:[#allocation4 + $0x30] sm:$0xff] %v2415_v49  ;;  %v6972_v28 = vrot.slane %v6018_v23, 4 }
 0x370   : > { %v6252_v40 = vpop.permute.xlu2 %4940  ;;  %v6254_v55 = vpop.permute.xlu1 %1791  ;;  %3207 = vst [vmem:[#allocation4 + $0x60] sm:$0xff] %v3196_v63 }
 0x371   : > { %v1761_v1 = vsel %vm638_vm0, %v1752_v41, %v1753_v58  ;;  %v4942_v32 = vunpack.i.l.bf16 %v6252_v40  ;;  %v1799_v59 = vrot.slane %v6254_v55, 4 }
 0x372   : > { %v1762_v11 = vsel %vm1755_vm12, %v1745_v29, %v1761_v1  ;;  %v4306_v1 = vor.u32 %v6136_v16, %v5795_v48  ;;  %v4714_v48 = vld [vmem:[#allocation4 + $0xd4] sm:$0xf0]  ;;  %v1657_v16 = vrot.slane %v5883_v8, 4 }
 0x373   : > { %1770 = vst [vmem:[#allocation4 + $0x58] sm:$0xff] %v1762_v11  ;;  %v3245_v50 = vrot.slane %v4942_v32, 4  ;;  %v1806_v41 = vsel %vm638_vm0, %v1798_v6, %v1799_v59  ;;  %v6276_v11 = vld [vmem:[#allocation4 + $0xa8] sm:$0xf] }
 0x374   : > { %v4721_v43 = vld [vmem:[#allocation4 + $0x10c] sm:$0xf0]  ;;  %v4315_v47 = vld [vmem:[#allocation4 + $0x110] sm:$0xf0]  ;;  %v1807_v29 = vsel %vm1802_vm15, %v5816_v26, %v1806_v41  ;;  %v6280_v41 = vpack.c.b16 %v2057_v13, %v2057_v13 }
 0x375   : > { %v3252_v5 = vsel %vm638_vm0, %v6972_v28, %v3245_v50  ;;  %v4314_v58 = vor.u32 %v4721_v43, %v6091_v33  ;;  %v4318_v49 = vor.u32 %v6093_v57, %v4315_v47  ;;  %1816 = vst [vmem:[#allocation4 + $0x70] sm:$0xff] %v1807_v29  ;;  %v4722_v6 = vld [vmem:[#allocation4 + $0x114] sm:$0xf0]  ;;  %v4753_v50 = vld [vmem:[#allocation4 + $0xec] sm:$0xf0]  ;;  %v2495_v43 = vrot.slane %v6053_v35, 4 }
 0x376   : > { %v1700_v63 = vpop.permute.xlu0 %1699  ;;  %3046 = vrot.lane.b32.xlu2 %v3029_v9, %s6907_s30  ;;  %v4322_v26 = vor.u32 %v4722_v6, %v6084_v52  ;;  %1534 = vperm.xlu1 %4882, %v1531_v39   ;;  %v3253_v33 = vsel %vm3250_vm1, %v6018_v23, %v3252_v5  ;;  %v6284_v57 = vld [vmem:[#allocation4 + $0xac] sm:$0xf]  ;;  %v6973_v9 = vrot.slane %v6180_v25, 4  ;;  %v4449_v29 = vor.u32 %v4753_v50, %v6146_v60  ;;  %s4181_s30 = sld [smem:[#allocation6 + $0x1]] }
 0x377   : > { %v1706_v32 = vrot.slane %v1700_v63, 4  ;;  %2264 = vmatpush.bf16.msrb.mxu3 %v4314_v58  ;;  %2290 = vmatpush.bf16.msrb.mxu2 %v4318_v49  ;;  %3263 = vst [vmem:[#allocation4 + $0xa8] sm:$0xff] %v3253_v33  ;;  %v4290_v5 = vor.u32 %v4714_v48, %v5908_v44  ;;  %v4333_v60 = vld [vmem:[%s6827_s8 + $0x10] sm:$0xff]  ;;  %v4710_v58 = vld [vmem:[#allocation4 + $0xb4] sm:$0xf0]  ;;  %v4918_v49 = vunpack.i.h.bf16 %v5713_v4  ;;  %v2394_v48 = vrot.slane %v6089_v18, 4 }
 0x378   : > { %v6291_v13 = vpop.permute.xlu2 %2488  ;;  %v6293_v39 = vpop.permute.xlu1 %1650 }
 0x379   : > { %v1714_v52 = vsel %vm638_vm0, %v6973_v9, %v1706_v32  ;;  %v2496_v47 = vrot.slane %v6291_v13, 4  ;;  %v1658_v28 = vrot.slane %v6293_v39, 4 }
 0x37a   : > { %v1715_v23 = vsel %vm1708_vm7, %v6180_v25, %v1714_v52  ;;  %4328 = vmatmul.msk.bf16.vlgmr.msrb.gmra.mxu2 %vm1310_vm13, %v6280_v41  ;;  %4327 = vmatmul.msk.bf16.vlgmr.msrb.gmra.mxu3 %vm1310_vm13, %v6280_v41 }
 0x37b   : > { %2296 = vmatpush.bf16.msra.mxu3 %v4306_v1  ;;  %2316 = vmatpush.bf16.msra.mxu2 %v4322_v26  ;;  %1723 = vst [vmem:[#allocation4 + $0x38] sm:$0xff] %v1715_v23  ;;  %v2502_v63 = vsel %vm638_vm0, %v2495_v43, %v2496_v47  ;;  %v1665_v25 = vsel %vm638_vm0, %v1657_v16, %v1658_v28  ;;  %v4697_v16 = vld [vmem:[#allocation4 + $0x4c] sm:$0xf0]  ;;  %v4219_v43 = vld [vmem:[#allocation4 + $0x50] sm:$0xf0] }
 0x37c   : > { %v2503_v44 = vsel %vm2397_vm10, %v6053_v35, %v2502_v63  ;;  %v1666_v1 = vsel %vm1661_vm8, %v5883_v8, %v1665_v25  ;;  %v4701_v6 = vld [vmem:[#allocation4 + $0x6c] sm:$0xf0]  ;;  %v4235_v32 = vld [vmem:[#allocation4 + $0x70] sm:$0xf0]  ;;  %v4274_v35 = vor.u32 %v4710_v58, %v5961_v51  ;;  %v2393_v8 = vrot.slane %v4918_v49, 4 }
 0x37d   : > { %1675 = vst [vmem:[#allocation4 + $0x10] sm:$0xff] %v1666_v1  ;;  %v4234_v50 = vor.u32 %v4701_v6, %v6025_v0  ;;  %v4238_v33 = vor.u32 %v6027_v56, %v4235_v32  ;;  %v2416_v23 = vld [vmem:[#allocation3 + $0x2c] sm:$0xff]  ;;  %v4222_v63 = vor.u32 %v6005_v24, %v4219_v43 }
 0x37e   : > { %v6319_v26 = vpop.permute.xlu0 %4945  ;;  %2710 = vperm.xlu2 %4883, %v4333_v60   ;;  %2512 = vst [vmem:[#allocation4 + $0x70] sm:$0xff] %v2503_v44  ;;  %v2401_v25 = vsel %vm638_vm0, %v2393_v8, %v2394_v48  ;;  %v6974_v1 = vld [vmem:[#allocation13_spill] sm:$0xff] }
 0x37f   : > { %2902 = vmatpush.bf16.msrb.mxu2 %v4449_v29  ;;  %2297 = vmatpush.bf16.msra.mxu3 %v4290_v5  ;;  %v4948_v4 = vunpack.i.h.bf16 %v6319_v26  ;;  %v4218_v5 = vor.u32 %v4697_v16, %v6003_v38  ;;  %v4908_v38 = vunpack.i.h.bf16 %v5760_v27  ;;  %v6975_v6 = vor.u32 %v5629_v42, %v6974_v1  ;;  %v6977_v27 = vld [vmem:[#allocation33_spill] sm:$0xff] }
 0x380   : > { %2248 = vmatpush.bf16.msrb.mxu1 %v4234_v50  ;;  %2274 = vmatpush.bf16.msrb.mxu0 %v4238_v33  ;;  %v6326_v52 = vpop.permute.xlu2 %3091  ;;  %v1794_v0 = vpop.permute.xlu1 %1793  ;;  %v4206_v8 = vor.u32 %v6977_v27, %v6237_v12  ;;  %v2056_v42 = vunpack.c.l.b16 %v6245_v20  ;;  %v6981_v27 = vld [vmem:[#allocation34_spill] sm:$0xff] }
 0x381   : > { %v3098_v9 = vrot.slane %v4948_v4, 4  ;;  %v3099_v56 = vrot.slane %v6326_v52, 4  ;;  %v1800_v29 = vrot.slane %v1794_v0, 4  ;;  %v6359_v0 = vld [vmem:[#allocation4 + $0x30] sm:$0xf0] }
 0x382   : > { %v6331_v51 = vld [vmem:[#allocation4 + $0x34] sm:$0xf0]  ;;  %v6333_v60 = vld [vmem:[#allocation4 + $0x38] sm:$0xf0] }
 0x383   : > { %2298 = vmatpush.bf16.msra.mxu3 %v4274_v35  ;;  %2420 = vst [vmem:[#allocation4 + $0x38] sm:$0xff] %v2416_v23  ;;  %v3105_v58 = vsel %vm638_vm0, %v3098_v9, %v3099_v56  ;;  %v1808_v44 = vsel %vm638_vm0, %v1799_v59, %v1800_v29  ;;  %v2402_v35 = vsel %vm2397_vm10, %v4918_v49, %v2401_v25  ;;  %v6976_v59 = vld [vmem:[#allocation32_spill] sm:$0xff]  ;;  %v6357_v9 = vld [vmem:[#allocation4 + $0x2c] sm:$0xf0]  ;;  %v2597_v49 = vrot.slane %v4908_v38, 4 }
 0x384   : > { %2249 = vmatpush.bf16.msrb.mxu1 %v4218_v5  ;;  %2275 = vmatpush.bf16.msrb.mxu0 %v4222_v63  ;;  %v3106_v24 = vsel %vm1708_vm7, %v4948_v4, %v3105_v58  ;;  %v1809_v32 = vsel %vm1802_vm15, %v6254_v55, %v1808_v44  ;;  %v4689_v50 = vld [vmem:[#allocation4 + $0xc] sm:$0xf0]  ;;  %v4187_v33 = vld [vmem:[#allocation4 + $0x10] sm:$0xf0]  ;;  %v4202_v43 = vor.u32 %v6235_v46, %v6976_v59  ;;  %v4323_v55 = vld [vmem:[#allocation4 + $0x118] sm:$0xf0] }
 0x385   : > { %1817 = vst [vmem:[#allocation4 + $0x78] sm:$0xff] %v1809_v32  ;;  %v2595_v23 = vrot.slane %v5947_v37, 4  ;;  %v6978_v63 = vld [vmem:[#allocation30_spill] sm:$0xff]  ;;  %v6979_v58 = vld [vmem:[#allocation31_spill] sm:$0xff]  ;;  %v6980_v38 = vld [vmem:[#allocation28_spill] sm:$0xff]  ;;  %v4326_v1 = vor.u32 %v6082_v54, %v4323_v55 }
 0x386   : > { %v1653_v16 = vpop.permute.xlu0 %1652  ;;  %2411 = vst [vmem:[#allocation4 + $0x10] sm:$0xff] %v2402_v35  ;;  %v4186_v25 = vor.u32 %v4689_v50, %v6978_v63  ;;  %v4190_v44 = vor.u32 %v6979_v58, %v4187_v33  ;;  %v4291_v50 = vld [vmem:[#allocation4 + $0xd8] sm:$0xf0]  ;;  %v4913_v33 = vunpack.i.h.bf16 %v5695_v61  ;;  %v4698_v61 = vld [vmem:[#allocation4 + $0x54] sm:$0xf0] }
 0x387   : > { %2299 = vmatpush.bf16.msra.mxu3 %v6975_v6  ;;  %v1659_v4 = vrot.slane %v1653_v16, 4  ;;  %3115 = vst [vmem:[#allocation4 + $0x30] sm:$0xff] %v3106_v24  ;;  %v4310_v24 = vor.u32 %v6980_v38, %v6138_v2  ;;  %v6374_v6 = vpack.c.b16 %v2056_v42, %v2056_v42  ;;  %v6982_v42 = vld [vmem:[#allocation26_spill] sm:$0xff] }
 0x388   : > { %2250 = vmatpush.bf16.msrb.mxu1 %v4202_v43  ;;  %2276 = vmatpush.bf16.msrb.mxu0 %v4206_v8  ;;  %v6365_v12 = vpop.permute.xlu2 %2640  ;;  %v2589_v29 = vpop.permute.xlu1 %2588  ;;  %v4294_v8 = vor.u32 %v6981_v27, %v4291_v50  ;;  %v4923_v55 = vunpack.i.h.bf16 %v6982_v42  ;;  %v6985_v50 = vld [vmem:[#allocation35_spill] sm:$0xff]  ;;  %v6989_v42 = vld [vmem:[#allocation44_spill] sm:$0xff] }
 0x389   : > { %v1667_v46 = vsel %vm638_vm0, %v1658_v28, %v1659_v4  ;;  %v2596_v5 = vrot.slane %v2589_v29, 4  ;;  %v4450_v28 = vld [vmem:[#allocation4 + $0xf0] sm:$0xf0]  ;;  %v2551_v4 = vrot.slane %v4913_v33, 4  ;;  %v4210_v33 = vor.u32 %v6331_v51, %v6985_v50 }
 0x38a   : > { %v1668_v20 = vsel %vm1661_vm8, %v6293_v39, %v1667_v46  ;;  %4329 = vmatmul.msk.bf16.vlgmr.msra.gmra.mxu2 %vm1310_vm13, %v6280_v41  ;;  %v4453_v43 = vor.u32 %v6149_v21, %v4450_v28  ;;  %v2651_v38 = vrot.slane %v4923_v55, 4  ;;  %v6986_v51 = vld [vmem:[#allocation14_spill] sm:$0xff] }
 0x38b   : > { %1676 = vst [vmem:[#allocation4 + $0x18] sm:$0xff] %v1668_v20  ;;  %v2602_v32 = vsel %vm638_vm0, %v2595_v23, %v2596_v5  ;;  %v2604_v39 = vsel %vm638_vm0, %v2596_v5, %v2597_v49  ;;  %v4226_v20 = vor.u32 %v4698_v61, %v6175_v53  ;;  %v6984_v5 = vld [vmem:[#allocation37_spill] sm:$0xff] }
 0x38c   : > { %2251 = vmatpush.bf16.msrb.mxu1 %v4186_v25  ;;  %2277 = vmatpush.bf16.msrb.mxu0 %v4190_v44  ;;  %v2603_v2 = vsel %vm2397_vm10, %v5947_v37, %v2602_v32  ;;  %v2605_v54 = vsel %vm2397_vm10, %v2589_v29, %v2604_v39  ;;  %v4702_v35 = vld [vmem:[#allocation4 + $0x74] sm:$0xf0]  ;;  %v4275_v37 = vld [vmem:[#allocation4 + $0xb8] sm:$0xf0]  ;;  %v2649_v39 = vrot.slane %v6365_v12, 4 }
 0x38d   : > { %2612 = vst [vmem:[#allocation4 + $0xd0] sm:$0xff] %v2603_v2  ;;  %v4242_v59 = vor.u32 %v4702_v35, %v6117_v31  ;;  %v6983_v31 = vld [vmem:[#allocation38_spill] sm:$0xff]  ;;  %v4278_v63 = vor.u32 %v6984_v5, %v4275_v37  ;;  %v6987_v37 = vld [vmem:[#allocation17_spill] sm:$0xff] }
 0x38e   : > { %v6384_v16 = vpop.permute.xlu0 %3370  ;;  %2613 = vst [vmem:[#allocation4 + $0xd8] sm:$0xff] %v2605_v54  ;;  %v2549_v46 = vrot.slane %v6983_v31, 4 }
 0x38f   : > { %2278 = vmatmul.bf16.vlgmr.msrb.gmra.mxu0 %v6374_v6  ;;  %2252 = vmatmul.bf16.vlgmr.msrb.gmra.mxu1 %v6374_v6 }
 0x390   : > { %2322 = vmatpush.bf16.msra.mxu1 %v4310_v24  ;;  %2342 = vmatpush.bf16.msra.mxu0 %v4326_v1  ;;  %v2491_v49 = vpop.permute.xlu2 %2490  ;;  %v2543_v23 = vpop.permute.xlu1 %2542 }
 0x391   : > { %2300 = vmatpush.bf16.msra.mxu3 %v4242_v59  ;;  %v2497_v21 = vrot.slane %v2491_v49, 4  ;;  %v2550_v29 = vrot.slane %v2543_v23, 4  ;;  %v4243_v59 = vld [vmem:[#allocation4 + $0x78] sm:$0xf0]  ;;  %v6990_v49 = vld [vmem:[#allocation24_spill] sm:$0xff] }
 0x392   : > { %v4690_v35 = vld [vmem:[#allocation4 + $0x14] sm:$0xf0] }
 0x393   : > { %v2504_v25 = vsel %vm638_vm0, %v2496_v47, %v2497_v21  ;;  %v2556_v58 = vsel %vm638_vm0, %v2549_v46, %v2550_v29  ;;  %v2558_v44 = vsel %vm638_vm0, %v2550_v29, %v2551_v4  ;;  %v4194_v55 = vor.u32 %v4690_v35, %v6989_v42  ;;  %v4227_v21 = vld [vmem:[#allocation4 + $0x58] sm:$0xf0] }
 0x394   : > { %2928 = vmatpush.bf16.msrb.mxu0 %v4453_v43  ;;  %2323 = vmatpush.bf16.msra.mxu1 %v4294_v8  ;;  %v2505_v24 = vsel %vm2397_vm10, %v6291_v13, %v2504_v25  ;;  %v2557_v1 = vsel %vm2452_vm14, %v6983_v31, %v2556_v58  ;;  %v2559_v53 = vsel %vm2452_vm14, %v2543_v23, %v2558_v44  ;;  %v4749_v28 = vld [vmem:[#allocation4 + $0xcc] sm:$0xf0]  ;;  %v4434_v32 = vld [vmem:[#allocation4 + $0xd0] sm:$0xf0]  ;;  %v4928_v23 = vunpack.i.h.bf16 %v6990_v49  ;;  %v6991_v31 = vld [vmem:[#allocation47_spill] sm:$0xff] }
 0x395   : > { %2301 = vmatpush.bf16.msra.mxu3 %v4226_v20  ;;  %2566 = vst [vmem:[#allocation4 + $0xb0] sm:$0xff] %v2557_v1  ;;  %v4433_v2 = vor.u32 %v4749_v28, %v6199_v14  ;;  %v4437_v54 = vor.u32 %v6201_v36, %v4434_v32  ;;  %v6988_v14 = vor.u32 %v6986_v51, %v6987_v37  ;;  %v6993_v58 = vld [vmem:[#allocation40_spill] sm:$0xff]  ;;  %v6994_v28 = vld [vmem:[#allocation41_spill] sm:$0xff]  ;;  %v4737_v37 = vld [vmem:[#allocation4 + $0x6c] sm:$0xf0] }
 0x396   : > { %v2643_v47 = vpop.permute.xlu0 %2642  ;;  %2567 = vst [vmem:[#allocation4 + $0xb8] sm:$0xff] %v2559_v53  ;;  %v4246_v46 = vor.u32 %v6991_v31, %v4243_v59  ;;  %v3341_v44 = vrot.slane %v4928_v23, 4  ;;  %v4230_v1 = vor.u32 %v6177_v19, %v4227_v21  ;;  %v4933_v53 = vunpack.i.h.bf16 %v5736_v15  ;;  %v6997_v49 = vld [vmem:[#allocation15_spill] sm:$0xff]  ;;  %v6999_v31 = vld [vmem:[#allocation16_spill] sm:$0xff] }
 0x397   : > { %v2650_v13 = vrot.slane %v2643_v47, 4  ;;  %2903 = vmatpush.bf16.msrb.mxu2 %v4433_v2  ;;  %2513 = vst [vmem:[#allocation4 + $0x78] sm:$0xff] %v2505_v24  ;;  %v2448_v32 = vrot.slane %v6994_v28, 4  ;;  %v4754_v2 = vld [vmem:[#allocation4 + $0xf4] sm:$0xf0] }
 0x398   : > { %2324 = vmatpush.bf16.msra.mxu1 %v4278_v63  ;;  %v3331_v8 = vpop.permute.xlu2 %3330  ;;  %2929 = vmatpush.bf16.msrb.mxu0 %v4437_v54  ;;  %v6412_v61 = vpop.permute.xlu1 %3137  ;;  %v6992_v63 = vld [vmem:[#allocation39_spill] sm:$0xff] }
 0x399   : > { %2302 = vmatpush.bf16.msra.mxu3 %v4210_v33  ;;  %v2656_v43 = vsel %vm638_vm0, %v2649_v39, %v2650_v13  ;;  %v2658_v27 = vsel %vm638_vm0, %v2650_v13, %v2651_v38  ;;  %v3339_v38 = vrot.slane %v3331_v8, 4  ;;  %v4464_v33 = vld [vmem:[#allocation4 + $0x100] sm:$0xf] }
 0x39a   : > { %v2657_v36 = vsel %vm2452_vm14, %v6365_v12, %v2656_v43  ;;  %v2659_v4 = vsel %vm2452_vm14, %v2643_v47, %v2658_v27  ;;  %v6435_v43 = vld [vmem:[#allocation4 + $0xf8] sm:$0xf0]  ;;  %v6995_v27 = vld [vmem:[#allocation36_spill] sm:$0xff] }
 0x39b   : > { %2666 = vst [vmem:[#allocation4 + $0x110] sm:$0xff] %v2657_v36  ;;  %v4214_v51 = vor.u32 %v6995_v27, %v6333_v60  ;;  %v4182_v36 = vld [vmem:[%s6827_s8 + $0x8] sm:$0xff]  ;;  %v4195_v60 = vld [vmem:[#allocation4 + $0x18] sm:$0xf0] }
 0x39c   : > { %2325 = vmatpush.bf16.msra.mxu1 %v6988_v14  ;;  %2667 = vst [vmem:[#allocation4 + $0x118] sm:$0xff] %v2659_v4  ;;  %v4745_v29 = vld [vmem:[#allocation4 + $0xac] sm:$0xf0]  ;;  %v4418_v20 = vld [vmem:[#allocation4 + $0xb0] sm:$0xf0]  ;;  %2052 = vperm.xlu0 %4959, %v4182_v36  }
 0x39d   : > { %2303 = vmatpush.bf16.msra.mxu3 %v4194_v55  ;;  %v4417_v25 = vor.u32 %v4745_v29, %v6992_v63  ;;  %v4421_v12 = vor.u32 %v6993_v58, %v4418_v20  ;;  %v4386_v14 = vld [vmem:[#allocation4 + $0x70] sm:$0xf0]  ;;  %v6454_v29 = vld [vmem:[%s6822_s3 + $0x8] sm:$0xff] }
 0x39e   : > { %v3333_v5 = vpop.permute.xlu0 %3332  ;;  %v6996_v55 = vld [vmem:[#allocation18_spill] sm:$0xff] }
 0x39f   : > { %v3340_v24 = vrot.slane %v3333_v5, 4  ;;  %4330 = vmatmul.msk.bf16.vlgmr.msra.gmra.mxu0 %vm1310_vm13, %v6280_v41  ;;  %2904 = vmatpush.bf16.msrb.mxu2 %v4417_v25  ;;  %v6998_v23 = vor.u32 %v6996_v55, %v6997_v49  ;;  %v4750_v25 = vld [vmem:[#allocation4 + $0xd4] sm:$0xf0] }
 0x3a0   : > { %2326 = vmatpush.bf16.msra.mxu1 %v4246_v46  ;;  %2304 = vmatmul.bf16.vlgmr.msra.gmra.mxu3 %v6374_v6  ;;  %v2444_v50 = vpop.permute.xlu2 %2443  ;;  %v2442_v54 = vpop.permute.xlu1 %2441  ;;  %v7000_v46 = vld [vmem:[#allocation19_spill] sm:$0xff] }
 0x3a1   : > { %2930 = vmatpush.bf16.msrb.mxu0 %v4421_v12  ;;  %v3346_v39 = vsel %vm638_vm0, %v3339_v38, %v3340_v24  ;;  %v3348_v47 = vsel %vm638_vm0, %v3340_v24, %v3341_v44  ;;  %v2450_v41 = vrot.slane %v2444_v50, 4  ;;  %v2449_v59 = vrot.slane %v2442_v54, 4  ;;  %v4755_v50 = vld [vmem:[#allocation4 + $0x104] sm:$0xf] }
 0x3a2   : > { %v3347_v19 = vsel %vm1708_vm7, %v3331_v8, %v3346_v39  ;;  %v3349_v13 = vsel %vm1708_vm7, %v3333_v5, %v3348_v47  ;;  %v4757_v35 = vld [vmem:[#allocation4 + $0x10c] sm:$0xf0]  ;;  %v4457_v8 = vor.u32 %v4754_v2, %v6151_v17  ;;  %v7001_v21 = vor.u32 %v6999_v31, %v7000_v46  ;;  %v7002_v17 = vld [vmem:[#allocation25_spill] sm:$0xff]  ;;  %v4466_v58 = vld [vmem:[#allocation4 + $0x110] sm:$0xf0] }
 0x3a3   : > { %3356 = vst [vmem:[#allocation4 + $0xf0] sm:$0xff] %v3347_v19  ;;  %v4465_v15 = vor.u32 %v4757_v35, %v4464_v33  ;;  %v2456_v4 = vsel %vm638_vm0, %v2448_v32, %v2449_v59  ;;  %v2458_v42 = vsel %vm638_vm0, %v2449_v59, %v2450_v41  ;;  %2905 = vmatpush.bf16.msrb.mxu2 %v6998_v23  ;;  %v4938_v20 = vunpack.i.h.bf16 %v7002_v17  ;;  %v4746_v19 = vld [vmem:[#allocation4 + $0xb4] sm:$0xf0]  ;;  %v4727_v17 = vld [vmem:[#allocation4 + $0x24] sm:$0xf] }
 0x3a4   : > { %2327 = vmatpush.bf16.msra.mxu1 %v4230_v1  ;;  %3357 = vst [vmem:[#allocation4 + $0xf8] sm:$0xff] %v3349_v13  ;;  %v2457_v5 = vsel %vm2452_vm14, %v6994_v28, %v2456_v4  ;;  %v2459_v63 = vsel %vm2452_vm14, %v2442_v54, %v2458_v42  ;;  %v3295_v12 = vrot.slane %v4933_v53, 4  ;;  %v4947_v44 = vunpack.i.l.bf16 %v6319_v26  ;;  %v7003_v28 = vld [vmem:[#allocation45_spill] sm:$0xff]  ;;  %v7004_v53 = vld [vmem:[#allocation12_spill] sm:$0xff]  ;;  %v7006_v46 = vld [vmem:[#allocation43_spill] sm:$0xff] }
 0x3a5   : > { %2931 = vmatpush.bf16.msrb.mxu0 %v7001_v21  ;;  %2922 = vmatpush.bf16.msrb.mxu3 %v4465_v15  ;;  %2466 = vst [vmem:[#allocation4 + $0x50] sm:$0xff] %v2457_v5  ;;  %v4385_v24 = vor.u32 %v4737_v37, %v6247_v34  ;;  %v4389_v1 = vor.u32 %v6249_v30, %v4386_v14  ;;  %v3145_v32 = vrot.slane %v6412_v61, 4  ;;  %v2715_v33 = vunpack.c.h.b16 %v6454_v29 }
 0x3a6   : > { %v3287_v38 = vpop.permute.xlu0 %3286  ;;  %2467 = vst [vmem:[#allocation4 + $0x58] sm:$0xff] %v2459_v63  ;;  %v4198_v47 = vor.u32 %v7003_v28, %v4195_v60  ;;  %v4441_v26 = vor.u32 %v4750_v25, %v6205_v10  ;;  %v4469_v2 = vor.u32 %v4755_v50, %v4466_v58  ;;  %v3144_v54 = vrot.slane %v4938_v20, 4  ;;  %v4442_v10 = vld [vmem:[#allocation4 + $0xd8] sm:$0xf0]  ;;  %v4352_v60 = vld [vmem:[#allocation4 + $0x20] sm:$0xf] }
 0x3a7   : > { %v3294_v39 = vrot.slane %v3287_v38, 4  ;;  %1482 = vadd.xlane.f32.xlu2 %v7004_v53  ;;  %2906 = vmatpush.bf16.msrb.mxu2 %v4385_v24  ;;  %v3095_v41 = vrot.slane %v4947_v44, 4  ;;  %v6478_v37 = vpack.c.b16 %v2715_v33, %v2715_v33  ;;  %v4425_v36 = vor.u32 %v4746_v19, %v6276_v11  ;;  %v7005_v11 = vld [vmem:[#allocation42_spill] sm:$0xff]  ;;  %v4738_v63 = vld [vmem:[#allocation4 + $0x74] sm:$0xf0] }
 0x3a8   : > { %2328 = vmatpush.bf16.msra.mxu1 %v4214_v51  ;;  %v3285_v30 = vpop.permute.xlu2 %3284  ;;  %v6469_v13 = vpop.permute.xlu1 %3085  ;;  %v3152_v27 = vsel %vm638_vm0, %v3144_v54, %v3145_v32  ;;  %v4461_v51 = vor.u32 %v6154_v45, %v6435_v43  ;;  %v4943_v43 = vunpack.i.h.bf16 %v6252_v40  ;;  %v4426_v40 = vld [vmem:[#allocation4 + $0xb8] sm:$0xf0]  ;;  %v4338_v50 = vld [vmem:[#allocation4 + $0x10] sm:$0xf0]  ;;  %v2714_v33 = vunpack.c.l.b16 %v6454_v29  ;;  %v4336_v54 = vld [vmem:[#allocation4] sm:$0xf] }
 0x3a9   : > { %2954 = vmatpush.bf16.msra.mxu3 %v4457_v8  ;;  %v3302_v34 = vsel %vm638_vm0, %v3294_v39, %v3295_v12  ;;  %2932 = vmatpush.bf16.msrb.mxu0 %v4389_v1  ;;  %v3293_v59 = vrot.slane %v3285_v30, 4  ;;  %v3096_v15 = vrot.slane %v6469_v13, 4  ;;  %v3153_v49 = vsel %vm3148_vm2, %v4938_v20, %v3152_v27  ;;  %v7007_v12 = vld [vmem:[#allocation22_spill] sm:$0xff]  ;;  %v4474_v19 = vld [vmem:[#allocation4 + $0x118] sm:$0xf0] }
 0x3aa   : > { %v3303_v35 = vsel %vm3055_vm3, %v3287_v38, %v3302_v34  ;;  %v3246_v20 = vrot.slane %v6168_v3, 4  ;;  %v3248_v58 = vrot.slane %v4943_v43, 4  ;;  %v4357_v1 = vor.u32 %v4727_v17, %v6359_v0  ;;  %v4758_v34 = vld [vmem:[#allocation4 + $0x114] sm:$0xf0] }
 0x3ab   : > { %3311 = vst [vmem:[#allocation4 + $0xd8] sm:$0xff] %v3303_v35  ;;  %v3300_v14 = vsel %vm638_vm0, %v3293_v59, %v3294_v39  ;;  %v3101_v8 = vsel %vm638_vm0, %v3095_v41, %v3096_v15  ;;  %v4392_v39 = vld [vmem:[#allocation4 + $0x68] sm:$0xf]  ;;  %v4429_v28 = vor.u32 %v6284_v57, %v4426_v40  ;;  %v4723_v57 = vld [vmem:[#allocation4 + $0x4] sm:$0xf] }
 0x3ac   : > { %2329 = vmatpush.bf16.msra.mxu1 %v4198_v47  ;;  %v3301_v4 = vsel %vm3055_vm3, %v3285_v30, %v3300_v14  ;;  %v3102_v42 = vsel %vm1708_vm7, %v4947_v44, %v3101_v8  ;;  %v4733_v55 = vld [vmem:[#allocation4 + $0x4c] sm:$0xf0]  ;;  %v4370_v45 = vld [vmem:[#allocation4 + $0x50] sm:$0xf0]  ;;  %v7008_v44 = vld [vmem:[#allocation20_spill] sm:$0xff]  ;;  %v4393_v53 = vor.u32 %v4738_v63, %v4392_v39  ;;  %v4341_v35 = vor.u32 %v4723_v57, %v4338_v50 }
 0x3ad   : > { %2955 = vmatpush.bf16.msra.mxu3 %v4441_v26  ;;  %3310 = vst [vmem:[#allocation4 + $0xd0] sm:$0xff] %v3301_v4  ;;  %v4369_v31 = vor.u32 %v4733_v55, %v7005_v11  ;;  %v4373_v21 = vor.u32 %v7006_v46, %v4370_v45  ;;  %v7009_v38 = vor.u32 %v7007_v12, %v7008_v44  ;;  %v4725_v47 = vld [vmem:[#allocation4 + $0xc] sm:$0xf0]  ;;  %v4734_v30 = vld [vmem:[#allocation4 + $0x54] sm:$0xf0] }
 0x3ae   : > { %v6490_v23 = vpop.permute.xlu0 %3044  ;;  %3162 = vst [vmem:[#allocation4 + $0x50] sm:$0xff] %v3153_v49  ;;  %v4337_v29 = vor.u32 %v4725_v47, %v4336_v54  ;;  %v4472_v59 = vld [vmem:[#allocation4 + $0x108] sm:$0xf]  ;;  %v4394_v55 = vld [vmem:[#allocation4 + $0x78] sm:$0xf0] }
 0x3af   : > { %2330 = vmatmul.bf16.vlgmr.msra.gmra.mxu1 %v6374_v6  ;;  %v4445_v6 = vor.u32 %v6207_v7, %v4442_v10  ;;  %2907 = vmatpush.bf16.msrb.mxu2 %v4369_v31  ;;  %3113 = vst [vmem:[#allocation4 + $0x20] sm:$0xff] %v3102_v42  ;;  %v4353_v7 = vor.u32 %v6357_v9, %v4352_v60  ;;  %v4756_v10 = vld [vmem:[#allocation4 + $0x10c] sm:$0xf]  ;;  %v4601_v42 = vld [vmem:[#allocation4 + $0xf0] sm:$0xf0]  ;;  %v7011_v46 = vld [vmem:[#allocation23_spill] sm:$0xff] }
 0x3b0   : > { %2948 = vmatpush.bf16.msrb.mxu1 %v4469_v2  ;;  %4478 = vmatmul.msk.bf16.vlgmr.msrb.gmra.mxu3 %vm1310_vm13, %v6478_v37  ;;  %v6498_v5 = vpop.permute.xlu2 %3038  ;;  %v3240_v25 = vpop.permute.xlu1 %3239  ;;  %v4473_v14 = vor.u32 %v4758_v34, %v4472_v59  ;;  %v4477_v4 = vor.u32 %v4756_v10, %v4474_v19  ;;  %v4730_v49 = vld [vmem:[#allocation4 + $0x34] sm:$0xf0]  ;;  %v7010_v31 = vld [vmem:[#allocation21_spill] sm:$0xff]  ;;  %v3382_v60 = vrot.slane %v6384_v16, 4  ;;  %v4583_v39 = vld [vmem:[#allocation4 + $0xc0] sm:$0xf] }
 0x3b1   : > { %2956 = vmatpush.bf16.msra.mxu3 %v4425_v36  ;;  %2933 = vmatpush.bf16.msrb.mxu0 %v4373_v21  ;;  %v3247_v24 = vrot.slane %v3240_v25, 4  ;;  %v6512_v36 = vpack.c.b16 %v2714_v33, %v2714_v33  ;;  %v7012_v21 = vor.u32 %v7010_v31, %v7011_v46  ;;  %v4736_v63 = vld [vmem:[#allocation4 + $0x6c] sm:$0xf]  ;;  %v4783_v33 = vld [vmem:[#allocation4 + $0xc4] sm:$0xf]  ;;  %v3049_v46 = vrot.slane %v6498_v5, 4 }
 0x3b2   : > { %v4397_v12 = vor.u32 %v4736_v63, %v4394_v55  ;;  %v4362_v57 = vld [vmem:[#allocation4 + $0x38] sm:$0xf0]  ;;  %v4728_v59 = vld [vmem:[#allocation4 + $0x2c] sm:$0xf]  ;;  %v4777_v10 = vld [vmem:[#allocation4 + $0x8c] sm:$0xf0] }
 0x3b3   : > { %v3254_v26 = vsel %vm638_vm0, %v3246_v20, %v3247_v24  ;;  %v3256_v2 = vsel %vm638_vm0, %v3247_v24, %v3248_v58  ;;  %2908 = vmatpush.bf16.msrb.mxu2 %v4353_v7  ;;  %v4787_v20 = vld [vmem:[#allocation4 + $0xe4] sm:$0xf]  ;;  %v4378_v7 = vld [vmem:[#allocation4 + $0x58] sm:$0xf0]  ;;  %v4553_v31 = vld [vmem:[#allocation4 + $0x90] sm:$0xf0] }
 0x3b4   : > { %2980 = vmatpush.bf16.msra.mxu1 %v4461_v51  ;;  %v3255_v9 = vsel %vm3250_vm1, %v6168_v3, %v3254_v26  ;;  %v3257_v0 = vsel %vm3250_vm1, %v3240_v25, %v3256_v2  ;;  %v4376_v51 = vld [vmem:[#allocation4 + $0x48] sm:$0xf]  ;;  %v4789_v3 = vld [vmem:[#allocation4 + $0xec] sm:$0xf0]  ;;  %v4604_v58 = vor.u32 %v4787_v20, %v4601_v42  ;;  %v4585_v24 = vld [vmem:[#allocation4 + $0xd0] sm:$0xf0] }
 0x3b5   : > { %2957 = vmatpush.bf16.msra.mxu3 %v7009_v38  ;;  %2934 = vmatpush.bf16.msrb.mxu0 %v4357_v1  ;;  %3264 = vst [vmem:[#allocation4 + $0xb0] sm:$0xff] %v3255_v9  ;;  %v4377_v8 = vor.u32 %v4734_v30, %v4376_v51  ;;  %v4360_v25 = vld [vmem:[#allocation4 + $0x28] sm:$0xf]  ;;  %v4785_v44 = vld [vmem:[#allocation4 + $0xcc] sm:$0xf0]  ;;  %v4588_v34 = vor.u32 %v4783_v33, %v4585_v24  ;;  %v3052_v42 = vrot.slane %v6490_v23, 4 }
 0x3b6   : > { %v2389_v41 = vpop.permute.xlu0 %2388  ;;  %3265 = vst [vmem:[#allocation4 + $0xb8] sm:$0xff] %v3257_v0  ;;  %v4361_v38 = vor.u32 %v4730_v49, %v4360_v25  ;;  %v4584_v50 = vor.u32 %v4785_v44, %v4583_v39  ;;  %v7013_v26 = vld [vmem:[#allocation46_spill] sm:$0xff]  ;;  %v4567_v0 = vld [vmem:[#allocation4 + $0xa0] sm:$0xf]  ;;  %v4365_v49 = vor.u32 %v4728_v59, %v4362_v57  ;;  %v4775_v63 = vld [vmem:[#allocation4 + $0x84] sm:$0xf] }
 0x3b7   : > { %v2395_v27 = vrot.slane %v2389_v41, 4  ;;  %2909 = vmatpush.bf16.msrb.mxu2 %v4337_v29  ;;  %v3191_v2 = vrot.slane %v7013_v26, 4 }
 0x3b8   : > { %2981 = vmatpush.bf16.msra.mxu1 %v4445_v6  ;;  %v6517_v43 = vpop.permute.xlu2 %3376  ;;  %v6519_v11 = vpop.permute.xlu1 %3372  ;;  %v4599_v6 = vld [vmem:[#allocation4 + $0xe0] sm:$0xf] }
 0x3b9   : > { %2958 = vmatpush.bf16.msra.mxu3 %v4393_v53  ;;  %2935 = vmatpush.bf16.msrb.mxu0 %v4341_v35  ;;  %v2403_v45 = vsel %vm638_vm0, %v2394_v48, %v2395_v27  ;;  %v3383_v40 = vrot.slane %v6519_v11, 4  ;;  %v4600_v48 = vor.u32 %v4789_v3, %v4599_v6  ;;  %v4779_v35 = vld [vmem:[#allocation4 + $0xa4] sm:$0xf]  ;;  %v3385_v24 = vrot.slane %v6517_v43, 4 }
 0x3ba   : > { %v2404_v17 = vsel %vm2397_vm10, %v6089_v18, %v2403_v45  ;;  %2910 = vmatmul.bf16.vlgmr.msrb.gmra.mxu2 %v6512_v36 }
 0x3bb   : > { %2974 = vmatpush.bf16.msra.mxu2 %v4473_v14  ;;  %2412 = vst [vmem:[#allocation4 + $0x18] sm:$0xff] %v2404_v17  ;;  %v3388_v18 = vsel %vm638_vm0, %v3382_v60, %v3383_v40  ;;  %v4344_v14 = vld [vmem:[#allocation4 + $0x8] sm:$0xf]  ;;  %v4551_v17 = vld [vmem:[#allocation4 + $0x80] sm:$0xf] }
 0x3bc   : > { %2982 = vmatpush.bf16.msra.mxu1 %v4429_v28  ;;  %2936 = vmatmul.bf16.vlgmr.msrb.gmra.mxu0 %v6512_v36  ;;  %v3389_v1 = vsel %vm3148_vm2, %v6384_v16, %v3388_v18  ;;  %v4732_v28 = vld [vmem:[#allocation4 + $0x4c] sm:$0xf]  ;;  %v4781_v53 = vld [vmem:[#allocation4 + $0xac] sm:$0xf0]  ;;  %v4569_v30 = vld [vmem:[#allocation4 + $0xb0] sm:$0xf0]  ;;  %v4552_v20 = vor.u32 %v4777_v10, %v4551_v17  ;;  %v6553_v18 = vpop.f32.mrf.mxu2 }
 0x3bd   : > { %2959 = vmatpush.bf16.msra.mxu3 %v4377_v8  ;;  %3000 = vmatpush.bf16.msra.mxu0 %v4477_v4  ;;  %3400 = vst [vmem:[#allocation4 + $0x100] sm:$0xff] %v3389_v1  ;;  %v4381_v9 = vor.u32 %v4732_v28, %v4378_v7  ;;  %v4568_v29 = vor.u32 %v4781_v53, %v4567_v0  ;;  %v4724_v28 = vld [vmem:[#allocation4 + $0xc] sm:$0xf]  ;;  %v4519_v10 = vld [vmem:[#allocation4 + $0x40] sm:$0xf] }
 0x3be   : > { %v3185_v47 = vpop.permute.xlu0 %3184  ;;  %v4572_v45 = vor.u32 %v4779_v35, %v4569_v30 }
 0x3bf   : > { %4479 = vmatmul.msk.bf16.vlgmr.msrb.gmra.mxu1 %vm1310_vm13, %v6478_v37  ;;  %3638 = vmatpush.bf16.msrb.mxu2 %v4600_v48  ;;  %v3192_v54 = vrot.slane %v3185_v47, 4 }
 0x3c0   : > { %2983 = vmatpush.bf16.msra.mxu1 %v7012_v21  ;;  %v3187_v19 = vpop.permute.xlu2 %3186  ;;  %v4951_v41 = vpop.permute.xlu1 %4950 }
 0x3c1   : > { %3664 = vmatpush.bf16.msrb.mxu0 %v4604_v58  ;;  %2960 = vmatpush.bf16.msra.mxu3 %v4361_v38  ;;  %v3199_v16 = vsel %vm638_vm0, %v3191_v2, %v3192_v54  ;;  %v3193_v51 = vrot.slane %v3187_v19, 4  ;;  %v4953_v8 = vunpack.i.h.bf16 %v4951_v41  ;;  %v4952_v4 = vunpack.i.l.bf16 %v4951_v41  ;;  %v4771_v2 = vld [vmem:[#allocation4 + $0x64] sm:$0xf]  ;;  %v4769_v41 = vld [vmem:[#allocation4 + $0x4c] sm:$0xf0] }
 0x3c2   : > { %v3200_v27 = vsel %vm3195_vm4, %v7013_v26, %v3199_v16  ;;  %v4726_v3 = vld [vmem:[#allocation4 + $0x14] sm:$0xf0]  ;;  %v4346_v25 = vld [vmem:[#allocation4 + $0x18] sm:$0xf0]  ;;  %v4556_v38 = vor.u32 %v4775_v63, %v4553_v31  ;;  %v4535_v26 = vld [vmem:[#allocation4 + $0x60] sm:$0xf] }
 0x3c3   : > { %3639 = vmatpush.bf16.msrb.mxu2 %v4584_v50  ;;  %3209 = vst [vmem:[#allocation4 + $0x70] sm:$0xff] %v3200_v27  ;;  %v4345_v55 = vor.u32 %v4726_v3, %v4344_v14  ;;  %v3201_v21 = vsel %vm638_vm0, %v3192_v54, %v3193_v51  ;;  %v3051_v6 = vrot.slane %v4953_v8, 4  ;;  %v3048_v60 = vrot.slane %v4952_v4, 4  ;;  %v4607_v14 = vld [vmem:[#allocation4 + $0xe8] sm:$0xf] }
 0x3c4   : > { %2984 = vmatpush.bf16.msra.mxu1 %v4397_v12  ;;  %v3202_v48 = vsel %vm3195_vm4, %v3185_v47, %v3201_v21  ;;  %v4349_v47 = vor.u32 %v4724_v28, %v4346_v25  ;;  %v4520_v51 = vor.u32 %v4769_v41, %v4519_v10  ;;  %v4788_v3 = vld [vmem:[#allocation4 + $0xec] sm:$0xf]  ;;  %v4615_v17 = vld [vmem:[#allocation4 + $0x100] sm:$0xf]  ;;  %v4763_v63 = vld [vmem:[#allocation4 + $0x24] sm:$0xf] }
 0x3c5   : > { %3665 = vmatpush.bf16.msrb.mxu0 %v4588_v34  ;;  %2961 = vmatpush.bf16.msra.mxu3 %v4345_v55  ;;  %3210 = vst [vmem:[#allocation4 + $0x78] sm:$0xff] %v3202_v48  ;;  %v3054_v12 = vsel %vm638_vm0, %v3048_v60, %v3049_v46  ;;  %v3059_v44 = vsel %vm638_vm0, %v3051_v6, %v3052_v42  ;;  %v7014_v31 = vld [vmem:[#allocation29_spill] sm:$0xff]  ;;  %v4791_v48 = vld [vmem:[#allocation4 + $0x104] sm:$0xf] }
 0x3c6   : > { %v6545_v58 = vpop.permute.xlu0 %3378  ;;  %v3056_v1 = vsel %vm3055_vm3, %v4952_v4, %v3054_v12  ;;  %v3060_v39 = vsel %vm3055_vm3, %v4953_v8, %v3059_v44  ;;  %v4503_v4 = vld [vmem:[#allocation4 + $0x20] sm:$0xf]  ;;  %v7015_v21 = vrot.slane %v7014_v31, 4 }
 0x3c7   : > { %3640 = vmatpush.bf16.msrb.mxu2 %v4568_v29  ;;  %v3386_v7 = vrot.slane %v6545_v58, 4  ;;  %3067 = vst [vmem:[#allocation4] sm:$0xff] %v3056_v1 }
 0x3c8   : > { %2985 = vmatpush.bf16.msra.mxu1 %v4381_v9  ;;  %2962 = vmatmul.bf16.vlgmr.msra.gmra.mxu3 %v6512_v36  ;;  %3069 = vst [vmem:[#allocation4 + $0x10] sm:$0xff] %v3060_v39  ;;  %v3088_v33 = vpop.permute.xlu2 %3087  ;;  %v3181_v53 = vpop.permute.xlu1 %3180 }
 0x3c9   : > { %3666 = vmatpush.bf16.msrb.mxu0 %v4572_v45  ;;  %v3392_v50 = vsel %vm638_vm0, %v3385_v24, %v3386_v7  ;;  %v3097_v34 = vrot.slane %v3088_v33, 4  ;;  %v3190_v9 = vrot.slane %v3181_v53, 4  ;;  %v6586_v45 = vpop.f32.mrf.mxu1 }
 0x3ca   : > { %v3393_v54 = vsel %vm3148_vm2, %v6517_v43, %v3392_v50  ;;  %v4773_v0 = vld [vmem:[#allocation4 + $0x6c] sm:$0xf0]  ;;  %v4537_v30 = vld [vmem:[#allocation4 + $0x70] sm:$0xf0]  ;;  %4480 = vmatmul.msk.bf16.vlgmr.msra.gmra.mxu2 %vm1310_vm13, %v6478_v37 }
 0x3cb   : > { %3641 = vmatpush.bf16.msrb.mxu2 %v4552_v20  ;;  %3402 = vst [vmem:[#allocation4 + $0x110] sm:$0xff] %v3393_v54  ;;  %v4536_v57 = vor.u32 %v4773_v0, %v4535_v26  ;;  %v4540_v16 = vor.u32 %v4771_v2, %v4537_v30  ;;  %v3103_v19 = vsel %vm638_vm0, %v3096_v15, %v3097_v34  ;;  %v1571_v15 = vpop.f32.mrf.mxu2  ;;  %v4765_v50 = vld [vmem:[#allocation4 + $0x2c] sm:$0xf0]  ;;  %v4786_v26 = vld [vmem:[#allocation4 + $0xd4] sm:$0xf0] }
 0x3cc   : > { %2986 = vmatpush.bf16.msra.mxu1 %v4365_v49  ;;  %4481 = vmatmul.msk.bf16.vlgmr.msra.gmra.mxu0 %vm1310_vm13, %v6478_v37  ;;  %v3197_v43 = vsel %vm638_vm0, %v3189_v62, %v3190_v9  ;;  %v3104_v29 = vsel %vm1708_vm7, %v6469_v13, %v3103_v19  ;;  %v4521_v37 = vld [vmem:[#allocation4 + $0x50] sm:$0xf0]  ;;  %v4767_v62 = vld [vmem:[#allocation4 + $0x44] sm:$0xf]  ;;  %v6583_v13 = vld [vmem:[%s6822_s3 + $0x10] sm:$0xff]  ;;  %v6588_v49 = vpop.f32.mrf.mxu0  ;;  %v4504_v2 = vor.u32 %v4765_v50, %v4503_v4 }
 0x3cd   : > { %3667 = vmatpush.bf16.msrb.mxu0 %v4556_v38  ;;  %v3198_v35 = vsel %vm3195_vm4, %v6211_v22, %v3197_v43  ;;  %3114 = vst [vmem:[#allocation4 + $0x28] sm:$0xff] %v3104_v29  ;;  %v4790_v22 = vld [vmem:[#allocation4 + $0xf4] sm:$0xf0]  ;;  %v4524_v8 = vor.u32 %v4767_v62, %v4521_v37  ;;  %v3451_v55 = vunpack.c.h.b16 %v6583_v13  ;;  %v4505_v54 = vld [vmem:[#allocation4 + $0x30] sm:$0xf0] }
 0x3ce   : > { %v3134_v59 = vpop.permute.xlu0 %3133  ;;  %3208 = vst [vmem:[#allocation4 + $0x68] sm:$0xff] %v3198_v35  ;;  %v4608_v28 = vor.u32 %v4790_v22, %v4607_v14  ;;  %v4593_v30 = vld [vmem:[#allocation4 + $0xd8] sm:$0xf0]  ;;  %v4784_v35 = vld [vmem:[#allocation4 + $0xcc] sm:$0xf] }
 0x3cf   : > { %3642 = vmatpush.bf16.msrb.mxu2 %v4536_v57  ;;  %v3143_v27 = vrot.slane %v3134_v59, 4  ;;  %v6601_v34 = vpack.c.b16 %v3451_v55, %v3451_v55  ;;  %v4508_v57 = vor.u32 %v4763_v63, %v4505_v54  ;;  %v4489_v43 = vld [vmem:[#allocation4 + $0x10] sm:$0xf0]  ;;  %v4596_v59 = vor.u32 %v4784_v35, %v4593_v30  ;;  %v4577_v62 = vld [vmem:[#allocation4 + $0xb8] sm:$0xf0] }
 0x3d0   : > { %2987 = vmatpush.bf16.msra.mxu1 %v4349_v47  ;;  %v3047_v60 = vpop.permute.xlu2 %3046  ;;  %v3140_v20 = vpop.permute.xlu1 %3139  ;;  %v4780_v4 = vld [vmem:[#allocation4 + $0xac] sm:$0xf]  ;;  %v4545_v50 = vld [vmem:[#allocation4 + $0x78] sm:$0xf0] }
 0x3d1   : > { %3668 = vmatpush.bf16.msrb.mxu0 %v4540_v16  ;;  %v3150_v6 = vsel %vm638_vm0, %v7015_v21, %v3143_v27  ;;  %v3053_v12 = vrot.slane %v3047_v60, 4  ;;  %v3146_v24 = vrot.slane %v3140_v20, 4  ;;  %v4759_v16 = vld [vmem:[#allocation4 + $0x4] sm:$0xf]  ;;  %v1584_v15 = vpop.f32.mrf.mxu1  ;;  %v4561_v60 = vld [vmem:[#allocation4 + $0x98] sm:$0xf0] }
 0x3d2   : > { %v3151_v25 = vsel %vm3148_vm2, %v7014_v31, %v3150_v6  ;;  %v4793_v44 = vld [vmem:[#allocation4 + $0x10c] sm:$0xf0]  ;;  %v4617_v38 = vld [vmem:[#allocation4 + $0x110] sm:$0xf0]  ;;  %v4492_v22 = vor.u32 %v4759_v16, %v4489_v43 }
 0x3d3   : > { %2988 = vmatmul.bf16.vlgmr.msra.gmra.mxu1 %v6512_v36  ;;  %v4609_v36 = vld [vmem:[#allocation4 + $0xf8] sm:$0xf0]  ;;  %3643 = vmatpush.bf16.msrb.mxu2 %v4520_v51  ;;  %3161 = vst [vmem:[#allocation4 + $0x48] sm:$0xff] %v3151_v25  ;;  %v4616_v1 = vor.u32 %v4793_v44, %v4615_v17  ;;  %v4620_v39 = vor.u32 %v4791_v48, %v4617_v38  ;;  %v6607_v41 = vpop.f32.mrf.mxu2  ;;  %v4782_v51 = vld [vmem:[#allocation4 + $0xb4] sm:$0xf0] }
 0x3d4   : > { %v4612_v47 = vor.u32 %v4788_v3, %v4609_v36  ;;  %v3061_v33 = vsel %vm638_vm0, %v3052_v42, %v3053_v12  ;;  %v3154_v53 = vsel %vm638_vm0, %v3145_v32, %v3146_v24  ;;  %v4487_v42 = vld [vmem:[#allocation4] sm:$0xf]  ;;  %v4761_v32 = vld [vmem:[#allocation4 + $0xc] sm:$0xf0]  ;;  %v1597_v10 = vpop.f32.mrf.mxu0  ;;  %v4559_v25 = vld [vmem:[#allocation4 + $0x88] sm:$0xf] }
 0x3d5   : > { %3669 = vmatpush.bf16.msrb.mxu0 %v4524_v8  ;;  %v3062_v9 = vsel %vm3055_vm3, %v6490_v23, %v3061_v33  ;;  %3658 = vmatpush.bf16.msrb.mxu3 %v4616_v1  ;;  %v3155_v0 = vsel %vm3148_vm2, %v6412_v61, %v3154_v53  ;;  %v4591_v23 = vld [vmem:[#allocation4 + $0xc8] sm:$0xf]  ;;  %v3450_v61 = vunpack.c.l.b16 %v6583_v13  ;;  %v4488_v14 = vor.u32 %v4761_v32, %v4487_v42  ;;  %v4776_v12 = vld [vmem:[#allocation4 + $0x8c] sm:$0xf] }
 0x3d6   : > { %3684 = vmatpush.bf16.msrb.mxu1 %v4620_v39  ;;  %3070 = vst [vmem:[#allocation4 + $0x18] sm:$0xff] %v3062_v9  ;;  %v3094_v19 = vpop.permute.xlu0 %3093  ;;  %v4592_v37 = vor.u32 %v4786_v26, %v4591_v23  ;;  %v4575_v8 = vld [vmem:[#allocation4 + $0xa8] sm:$0xf]  ;;  %v4772_v1 = vld [vmem:[#allocation4 + $0x6c] sm:$0xf] }
 0x3d7   : > { %v3100_v29 = vrot.slane %v3094_v19, 4  ;;  %3163 = vst [vmem:[#allocation4 + $0x58] sm:$0xff] %v3155_v0  ;;  %3644 = vmatpush.bf16.msrb.mxu2 %v4504_v2  ;;  %v6617_v55 = vpack.c.b16 %v3450_v61, %v3450_v61  ;;  %v4576_v31 = vor.u32 %v4782_v51, %v4575_v8  ;;  %v4543_v24 = vld [vmem:[#allocation4 + $0x68] sm:$0xf]  ;;  %v4548_v2 = vor.u32 %v4772_v1, %v4545_v50  ;;  %v4764_v16 = vld [vmem:[#allocation4 + $0x2c] sm:$0xf] }
 0x3d8   : > { %4629 = vmatmul.msk.bf16.vlgmr.msrb.gmra.mxu3 %vm1310_vm13, %v6601_v34  ;;  %v3041_v3 = vpop.permute.xlu1 %3040 }
 0x3d9   : > { %3690 = vmatpush.bf16.msra.mxu3 %v4608_v28  ;;  %3670 = vmatpush.bf16.msrb.mxu0 %v4508_v57  ;;  %v3107_v27 = vsel %vm638_vm0, %v3099_v56, %v3100_v29  ;;  %v3050_v13 = vrot.slane %v3041_v3, 4  ;;  %v4580_v56 = vor.u32 %v4780_v4, %v4577_v62 }
 0x3da   : > { %3716 = vmatpush.bf16.msra.mxu1 %v4612_v47  ;;  %v3108_v36 = vsel %vm1708_vm7, %v6326_v52, %v3107_v27  ;;  %v4778_v52 = vld [vmem:[#allocation4 + $0x94] sm:$0xf0]  ;;  %v4768_v0 = vld [vmem:[#allocation4 + $0x4c] sm:$0xf] }
 0x3db   : > { %3116 = vst [vmem:[#allocation4 + $0x38] sm:$0xff] %v3108_v36  ;;  %3645 = vmatpush.bf16.msrb.mxu2 %v4488_v14  ;;  %v3057_v21 = vsel %vm638_vm0, %v3049_v46, %v3050_v13  ;;  %v1610_v48 = vpop.f32.mrf.mxu2  ;;  %v4560_v46 = vor.u32 %v4778_v52, %v4559_v25  ;;  %v4774_v47 = vld [vmem:[#allocation4 + $0x74] sm:$0xf0]  ;;  %v6644_v13 = vpop.permute.xlu2 %2710 }
 0x3dc   : > { %v3058_v6 = vsel %vm3055_vm3, %v6498_v5, %v3057_v21  ;;  %v4564_v5 = vor.u32 %v4776_v12, %v4561_v60  ;;  %v4544_v26 = vor.u32 %v4774_v47, %v4543_v24 }
 0x3dd   : > { %3691 = vmatpush.bf16.msra.mxu3 %v4592_v37  ;;  %3671 = vmatpush.bf16.msrb.mxu0 %v4492_v22  ;;  %3068 = vst [vmem:[#allocation4 + $0x8] sm:$0xff] %v3058_v6  ;;  %v4762_v10 = vld [vmem:[#allocation4 + $0x14] sm:$0xf0]  ;;  %v4497_v15 = vld [vmem:[#allocation4 + $0x18] sm:$0xf0] }
 0x3de   : > { %3717 = vmatpush.bf16.msra.mxu1 %v4596_v59  ;;  %v4956_v17 = vpop.permute.xlu0 %4955  ;;  %3646 = vmatmul.bf16.vlgmr.msrb.gmra.mxu2 %v6617_v55  ;;  %v4770_v54 = vld [vmem:[#allocation4 + $0x54] sm:$0xf0]  ;;  %v4529_v9 = vld [vmem:[#allocation4 + $0x58] sm:$0xf0] }
 0x3df   : > { %v4958_v20 = vunpack.i.h.bf16 %v4956_v17  ;;  %v4957_v63 = vunpack.i.l.bf16 %v4956_v17 }
 0x3e0   : > { %3672 = vmatmul.bf16.vlgmr.msrb.gmra.mxu0 %v6617_v55 }
 0x3e1   : > { %3692 = vmatpush.bf16.msra.mxu3 %v4576_v31  ;;  %v3387_v44 = vrot.slane %v4958_v20, 4  ;;  %v3384_v38 = vrot.slane %v4957_v63, 4 }
 0x3e2   : > { %3718 = vmatpush.bf16.msra.mxu1 %v4580_v56  ;;  %v4766_v57 = vld [vmem:[#allocation4 + $0x34] sm:$0xf0]  ;;  %v4513_v42 = vld [vmem:[#allocation4 + $0x38] sm:$0xf0] }
 0x3e3   : > { %4630 = vmatmul.msk.bf16.vlgmr.msrb.gmra.mxu1 %vm1310_vm13, %v6601_v34  ;;  %v3394_v39 = vsel %vm638_vm0, %v3386_v7, %v3387_v44  ;;  %v3390_v28 = vsel %vm638_vm0, %v3383_v40, %v3384_v38  ;;  %v4527_v7 = vld [vmem:[#allocation4 + $0x48] sm:$0xf]  ;;  %v4532_v40 = vor.u32 %v4768_v0, %v4529_v9  ;;  %v7016_v56 = vld [vmem:[#allocation27_spill] sm:$0xff]  ;;  %vm1490_vm0 = vcmask 64512  }
 0x3e4   : > { %v3395_v33 = vsel %vm3148_vm2, %v6545_v58, %v3394_v39  ;;  %v3391_v53 = vsel %vm3148_vm2, %v6519_v11, %v3390_v28  ;;  %v4528_v30 = vor.u32 %v4770_v54, %v4527_v7  ;;  %v4511_v58 = vld [vmem:[#allocation4 + $0x28] sm:$0xf]  ;;  %v4516_v11 = vor.u32 %v4764_v16, %v4513_v42  ;;  %v4760_v61 = vld [vmem:[#allocation4 + $0xc] sm:$0xf]  ;;  %v1500_v0 = vld [vmem:[%s6828_s9] sm:$0x1] }
 0x3e5   : > { %3693 = vmatpush.bf16.msra.mxu3 %v4560_v46  ;;  %3403 = vst [vmem:[#allocation4 + $0x118] sm:$0xff] %v3395_v33  ;;  %v4512_v19 = vor.u32 %v4766_v57, %v4511_v58  ;;  %v4495_v29 = vld [vmem:[#allocation4 + $0x8] sm:$0xf]  ;;  %v4500_v51 = vor.u32 %v4760_v61, %v4497_v15  ;;  %v1484_v21 = vmul.f32 0.00390625, %v7016_v56 }
 0x3e6   : > { %3719 = vmatpush.bf16.msra.mxu1 %v4564_v5  ;;  %3401 = vst [vmem:[#allocation4 + $0x108] sm:$0xff] %v3391_v53  ;;  %v4496_v27 = vor.u32 %v4762_v10, %v4495_v29 }
 0x3e9   : > { %3694 = vmatpush.bf16.msra.mxu3 %v4544_v26 }
 0x3ea   : > { %3720 = vmatpush.bf16.msra.mxu1 %v4548_v2 }
 0x3ec   : > { %v4794_v32 = vld [vmem:[#allocation4 + $0x114] sm:$0xf0]  ;;  %v4625_v43 = vld [vmem:[#allocation4 + $0x118] sm:$0xf0] }
 0x3ed   : > { %3695 = vmatpush.bf16.msra.mxu3 %v4528_v30  ;;  %v4623_v23 = vld [vmem:[#allocation4 + $0x108] sm:$0xf]  ;;  %v4792_v35 = vld [vmem:[#allocation4 + $0x10c] sm:$0xf] }
 0x3ee   : > { %3721 = vmatpush.bf16.msra.mxu1 %v4532_v40  ;;  %v4624_v37 = vor.u32 %v4794_v32, %v4623_v23  ;;  %v4628_v59 = vor.u32 %v4792_v35, %v4625_v43  ;;  %v1504_v40 = vstv %s4176_s20  ;;  %v1510_v32 = vld [vmem:[%s6825_s6 + $0x8] sm:$0xff]  ;;  %v1509_v43 = vld [vmem:[%s6825_s6] sm:$0xff] }
 0x3f0   : > { %3710 = vmatpush.bf16.msra.mxu2 %v4624_v37  ;;  %3736 = vmatpush.bf16.msra.mxu0 %v4628_v59 }
 0x3f1   : > { %3696 = vmatpush.bf16.msra.mxu3 %v4512_v19 }
 0x3f2   : > { %3722 = vmatpush.bf16.msra.mxu1 %v4516_v11 }
 0x3f3   : > { %4631 = vmatmul.msk.bf16.vlgmr.msra.gmra.mxu2 %vm1310_vm13, %v6601_v34  ;;  %4632 = vmatmul.msk.bf16.vlgmr.msra.gmra.mxu0 %vm1310_vm13, %v6601_v34  ;;  %v1486_v34 = vld [vmem:[%s6823_s4] sm:$0xff] }
 0x3f4   : > { %v1488_v52 = vmul.f32 %v1486_v34, %v1484_v21 }
 0x3f5   : > { %3697 = vmatpush.bf16.msra.mxu3 %v4496_v27 }
 0x3f6   : > { %3723 = vmatpush.bf16.msra.mxu1 %v4500_v51  ;;  %v1491_v25 = vsel %vm1490_vm0, %v1488_v52, 0.0 }
 0x3f8   : > { %3698 = vmatmul.bf16.vlgmr.msra.gmra.mxu3 %v6617_v55 }
 0x3f9   : > { %3724 = vmatmul.bf16.vlgmr.msra.gmra.mxu1 %v6617_v55  ;;  %v1487_v55 = vld [vmem:[%s6823_s4 + $0x8] sm:$0xff] }
 0x3fd   : > { %v2266_v62 = vpop.f32.mrf.mxu3  ;;  %v2292_v36 = vpop.f32.mrf.mxu2 }
 0x405   : > { %v2268_v14 = vpop.f32.mrf.mxu3  ;;  %v2294_v31 = vpop.f32.mrf.mxu2 }
 0x40c   : > { %v2279_v22 = vpop.f32.mrf.mxu0  ;;  %v2253_v3 = vpop.f32.mrf.mxu1 }
 0x40d   : > { %v2318_v48 = vpop.f32.mrf.mxu2 }
 0x40e   : > { %v2053_v63 = vpop.permute.xlu0 %2052 }
 0x40f   : > { %v2254_v44 = vadd.f32 %v2253_v3, %v2053_v63  ;;  %v2280_v1 = vadd.f32 %v2279_v22, %v2053_v63 }
 0x411   : > { %v6657_v33 = vadd.f32 %v2266_v62, %v2254_v44  ;;  %v6659_v26 = vadd.f32 %v2292_v36, %v2280_v1 }
 0x413   : > { %vm2349_vm7 = vcmp.gt.f32.partialorder %v6657_v33, 0.0  ;;  %vm2350_vm12 = vcmp.gt.f32.partialorder %v6659_v26, 0.0 }
 0x414   : > { %v2281_v8 = vpop.f32.mrf.mxu0  ;;  %v2255_v4 = vpop.f32.mrf.mxu1 }
 0x415   : > { %v2320_v50 = vpop.f32.mrf.mxu2 }
 0x41a   : > { %v1483_v6 = vpop.xlane.xlu2 %1482 }
 0x41b   : > { %v1485_v60 = vmul.f32 0.00390625, %v1483_v6 }
 0x41c   : > { %v2344_v17 = vpop.f32.mrf.mxu0 }
 0x41d   : > { %v1489_v20 = vmul.f32 %v1487_v55, %v1485_v60  ;;  %v6680_v55 = vpop.permute.xlu1 %3446 }
 0x41f   : > { %v1492_v12 = vsel %vm1490_vm0, %v1489_v20, 0.0 }
 0x420   : > { %v1493_v46 = vadd.f32 %v1492_v12, %v1491_v25 }
 0x422   : > { %v1494_v38 = vrot.slane %v1493_v46, 4 }
 0x423   : > { %v2305_v5 = vpop.f32.mrf.mxu3 }
 0x424   : > { %v2306_v24 = vadd.f32 %v2305_v5, %v2053_v63  ;;  %v2346_v39 = vpop.f32.mrf.mxu0  ;;  %v1495_v28 = vadd.f32 %v1494_v38, %v1493_v46 }
 0x425   : > { %v6684_v46 = vpop.permute.xlu1 %1534  ;;  %v6690_v39 = vstv %s4482_s7  ;;  %s4642_s7 = sld [smem:[#allocation6 + $0x6]] }
 0x426   : > { %v6655_v47 = vadd.f32 %v2318_v48, %v2306_v24  ;;  %v1496_v53 = vrot.slane %v1495_v28, 2  ;;  %v6687_v24 = vstv %s4331_s15  ;;  %v1570_v50 = vadd.f32 %v6553_v18, %v6684_v46  ;;  %s4990_s15 = sshra.s32 %s3937_s29, 4  ;;  %s4991_s15 = int_to_ptr.hbm [resolvable:$true] %s4990_s15 }
 0x427   : > { %p4997_p3 = scmp.lt.s32.totalorder %s4991_s15, %s6832_s13 }
 0x428   : > { %v1497_v2 = vadd.f32 %v1496_v53, %v1495_v28  ;;  %v6692_v28 = vstv %s4633_s24  ;;  %vm1613_vm8 = vcmp.gt.f32.partialorder %v1570_v50, 0.0  ;;  %s445_s24 = sand.u32 1, %s5034_s26  }
 0x429   : > { %s3922_s16 = scalar_lea.sflag [#allocation7], %s445_s24 }
 0x42a   : > { %v1498_v7 = vrot.slane %v1497_v2, 1 }
 0x42b   : > { %v2307_v9 = vpop.f32.mrf.mxu3 }
 0x42c   : > { %v2331_v54 = vpop.f32.mrf.mxu1  ;;  %v1499_v30 = vadd.f32 %v1498_v7, %v1497_v2  ;;  %v6698_v9 = vstv %s4181_s30  ;;  %s4017_s30 = sshll.u32 %s445_s24, 6 }
 0x42d   : > { %v2332_v16 = vadd.f32 %v2331_v54, %v2053_v63  ;;  %s6774_s20 = scalar_lea.vmem [#allocation9], %s4017_s30 }
 0x42e   : > { %v1501_v57 = vadd.f32 %v1500_v0, %v1499_v30  ;;  %v2354_v0 = vmul.f32 %v6687_v24, %v6657_v33  ;;  %s3934_s22 = sshll.u32 %s6774_s20, 4  ;;  %s3935_s22 = int_to_ptr.vmem [resolvable:$true] %s3934_s22 }
 0x42f   : > { %v6670_v61 = vadd.f32 %v2344_v17, %v2332_v16  ;;  %v1583_v16 = vadd.f32 %v6586_v45, %v6684_v46 }
 0x430   : > { %vm1503_vm13 = vcmp.gt.f32.partialorder %v1501_v57, 0.0  ;;  %v1505_v42 = vmul.f32 %v1504_v40, %v1501_v57 }
 0x431   : > { %vm1614_vm14 = vcmp.gt.f32.partialorder %v1583_v16, 0.0  ;;  %vm2352_vm2 = vcmp.gt.f32.partialorder %v6670_v61, 0.0 }
 0x432   : > { %v1506_v11 = vsel %vm1503_vm13, %v1501_v57, %v1505_v42  ;;  %v1618_v57 = vmul.f32 %v6698_v9, %v1570_v50  ;;  %vm2351_vm13 = vcmp.gt.f32.partialorder %v6655_v47, 0.0 }
 0x433   : > { %v2924_v19 = vpop.f32.mrf.mxu3  ;;  %v1511_v29 = vperm.slane %v1506_v11, 0  ;;  %v6712_v11 = vld [vmem:[%s6824_s5] sm:$0xff] }
 0x434   : > { %v2333_v58 = vpop.f32.mrf.mxu1 }
 0x435   : > { %v1513_v23 = vmul.f32 %v1511_v29, %v1510_v32  ;;  %v1512_v35 = vmul.f32 %v1511_v29, %v1509_v43  ;;  %v2358_v58 = vsel %vm2349_vm7, %v6657_v33, %v2354_v0  ;;  %v1622_v43 = vsel %vm1613_vm8, %v1570_v50, %v1618_v57  ;;  %v6718_v33 = vld [vmem:[%s6824_s5 + $0x8] sm:$0xff] }
 0x437   : > { %v1517_v37 = vsel %vm1490_vm0, %v1513_v23, 0.0  ;;  %v1514_v59 = vsel %vm1490_vm0, %v1512_v35, 0.0  ;;  %v2355_v23 = vmul.f32 %v6687_v24, %v6659_v26 }
 0x438   : > { %1518 = vadd.xlane.f32.xlu0 %v1517_v37  ;;  %1515 = vadd.xlane.f32.xlu1 %v1514_v59  ;;  %v1619_v59 = vmul.f32 %v6698_v9, %v1583_v16 }
 0x439   : > { %v2937_v10 = vpop.f32.mrf.mxu0 }
 0x43a   : > { %v2938_v1 = vadd.f32 %v2937_v10, %v6644_v13 }
 0x43b   : > { %v2926_v27 = vpop.f32.mrf.mxu3 }
 0x43c   : > { %v2950_v15 = vpop.f32.mrf.mxu1  ;;  %v2359_v27 = vsel %vm2350_vm12, %v6659_v26, %v2355_v23 }
 0x43d   : > { %v2911_v51 = vpop.f32.mrf.mxu2  ;;  %v2951_v30 = vadd.f32 %v2950_v15, %v2938_v1 }
 0x43e   : > { %v2912_v17 = vadd.f32 %v2911_v51, %v6644_v13 }
 0x43f   : > { %vm3008_vm10 = vcmp.gt.f32.partialorder %v2951_v30, 0.0 }
 0x440   : > { %v2925_v63 = vadd.f32 %v2924_v19, %v2912_v17  ;;  %v3013_v19 = vmul.f32 %v6690_v39, %v2951_v30 }
 0x441   : > { %v2939_v62 = vpop.f32.mrf.mxu0 }
 0x442   : > { %v3012_v2 = vmul.f32 %v6690_v39, %v2925_v63  ;;  %vm3007_vm6 = vcmp.gt.f32.partialorder %v2925_v63, 0.0  ;;  %v3017_v37 = vsel %vm3008_vm10, %v2951_v30, %v3013_v19 }
 0x444   : > { %v2952_v14 = vpop.f32.mrf.mxu1  ;;  %v3016_v18 = vsel %vm3007_vm6, %v2925_v63, %v3012_v2  ;;  %v2356_v63 = vmul.f32 %v6687_v24, %v6655_v47 }
 0x445   : > { %v2913_v22 = vpop.f32.mrf.mxu2  ;;  %v1623_v14 = vsel %vm1614_vm14, %v1583_v16, %v1619_v59 }
 0x449   : > { %v6674_v3 = vpop.f32.mrf.mxu0 }
 0x44b   : > { %v6676_v8 = vpop.f32.mrf.mxu3 }
 0x44c   : > { %v2964_v22 = vadd.f32 %v6676_v8, %v6644_v13 }
 0x44d   : > { %v6678_v4 = vpop.f32.mrf.mxu2 }
 0x44e   : > { %v2977_v26 = vadd.f32 %v6678_v4, %v2964_v22 }
 0x450   : > { %v2989_v36 = vpop.f32.mrf.mxu1  ;;  %vm3009_vm0 = vcmp.gt.f32.partialorder %v2977_v26, 0.0 }
 0x451   : > { %v3004_v31 = vpop.f32.mrf.mxu0  ;;  %v2990_v32 = vadd.f32 %v2989_v36, %v6644_v13  ;;  %v2357_v13 = vmul.f32 %v6687_v24, %v6670_v61 }
 0x453   : > { %v2965_v21 = vpop.f32.mrf.mxu3  ;;  %v3003_v10 = vadd.f32 %v6674_v3, %v2990_v32  ;;  %v1609_v3 = vadd.f32 %v6607_v41, %v6684_v46 }
 0x455   : > { %v2978_v34 = vpop.f32.mrf.mxu2  ;;  %v3015_v31 = vmul.f32 %v6690_v39, %v3003_v10  ;;  %vm3010_vm1 = vcmp.gt.f32.partialorder %v3003_v10, 0.0  ;;  %vm1616_vm3 = vcmp.gt.f32.partialorder %v1609_v3, 0.0  ;;  %v1621_v4 = vmul.f32 %v6698_v9, %v1609_v3 }
 0x457   : > { %v3019_v41 = vsel %vm3010_vm1, %v3003_v10, %v3015_v31 }
 0x458   : > { %v2991_v56 = vpop.f32.mrf.mxu1 }
 0x45b   : > { %v3660_v52 = vpop.f32.mrf.mxu3 }
 0x45d   : > { %v3673_v60 = vpop.f32.mrf.mxu0 }
 0x45e   : > { %v3674_v5 = vadd.f32 %v3673_v60, %v6680_v55  ;;  %v1596_v60 = vadd.f32 %v6588_v49, %v6684_v46  ;;  %v1625_v49 = vsel %vm1616_vm3, %v1609_v3, %v1621_v4 }
 0x460   : > { %v3686_v6 = vpop.f32.mrf.mxu1 }
 0x461   : > { %v3647_v48 = vpop.f32.mrf.mxu2  ;;  %v3687_v54 = vadd.f32 %v3686_v6, %v3674_v5  ;;  %v1620_v5 = vmul.f32 %v6698_v9, %v1596_v60 }
 0x462   : > { %v3648_v25 = vadd.f32 %v3647_v48, %v6680_v55  ;;  %v2361_v48 = vsel %vm2352_vm2, %v6670_v61, %v2357_v13  ;;  %v2360_v61 = vsel %vm2351_vm13, %v6655_v47, %v2356_v63  ;;  %v1507_v47 = vld [vmem:[%s6829_s10] sm:$0xff] }
 0x463   : > { %v3662_v12 = vpop.f32.mrf.mxu3  ;;  %v3749_v42 = vmul.f32 %v6692_v28, %v3687_v54  ;;  %vm3744_vm9 = vcmp.gt.f32.partialorder %v3687_v54, 0.0 }
 0x464   : > { %v3661_v38 = vadd.f32 %v3660_v52, %v3648_v25 }
 0x465   : > { %v3675_v44 = vpop.f32.mrf.mxu0  ;;  %v3753_v45 = vsel %vm3744_vm9, %v3687_v54, %v3749_v42 }
 0x466   : > { %vm3743_vm5 = vcmp.gt.f32.partialorder %v3661_v38, 0.0  ;;  %v3748_v53 = vmul.f32 %v6692_v28, %v3661_v38 }
 0x468   : > { %v3688_v20 = vpop.f32.mrf.mxu1  ;;  %v3752_v7 = vsel %vm3743_vm5, %v3661_v38, %v3748_v53  ;;  %vm1615_vm5 = vcmp.gt.f32.partialorder %v1596_v60, 0.0  ;;  %v1508_v38 = vld [vmem:[%s6829_s10 + $0x8] sm:$0xff] }
 0x469   : > { %3807 = vmatpush.msrb.mxu2 %v3752_v7  ;;  %4796 = vmatpush.msrb.mxu3 %v3752_v7  ;;  %v3649_v40 = vpop.f32.mrf.mxu2  ;;  %v1624_v44 = vsel %vm1615_vm5, %v1596_v60, %v1620_v5  ;;  %v3896_v7 = vstv %s4642_s7  ;;  %s4992_s7 = scalar_lea.hbm %s4991_s15, 64 }
 0x46a   : > { %p4993_p0 = scmp.ne.s32.totalorder %s4991_s15, %s4992_s7  ;;  %p4998_p4 = scmp.lt.s32.totalorder %s4996_s0, %s4992_s7 }
 0x46b   : > { %3808 = vmatpush.msrb.mxu2 %v3016_v18  ;;  %4797 = vmatpush.msrb.mxu3 %v3016_v18 }
 0x46c   : > { %p4994_p1 = pnand %p4993_p0, %p5182_p5  ;;  %p4999_p7 = por %p4998_p4, %p4997_p3 }
 0x46d   : > { %3809 = vmatpush.msrb.mxu2 %v2358_v58  ;;  %4798 = vmatpush.msrb.mxu3 %v2358_v58 }
 0x46e   : > { %p4995_p2 = pneg %p4994_p1 }
 0x46f   : > { %3810 = vmatpush.msrb.mxu2 %v1622_v43  ;;  %4799 = vmatpush.msrb.mxu3 %v1622_v43 }
 0x470   : > { %v3738_v29 = vpop.f32.mrf.mxu0  ;;  %4634 = vmatmul.msk.f32.vlgmr.msrb.gmra.mxu2 %vm697_vm11, %v6712_v11  ;;  %4635 = vmatmul.msk.f32.vlgmr.msrb.gmra.mxu3 %vm697_vm11, %v6718_v33  ;;  %p5000_p8 = pnand %p4999_p7, %p4995_p2 }
 0x471   : > { %3830 = vmatpush.msra.mxu3 %v3753_v45 }
 0x473   : > { %3831 = vmatpush.msra.mxu3 %v3017_v37 }
 0x475   : > { %3832 = vmatpush.msra.mxu3 %v2359_v27 }
 0x476   : > { %v3725_v35 = vpop.f32.mrf.mxu1  ;;  %v3712_v62 = vpop.f32.mrf.mxu2 }
 0x477   : > { %v3726_v15 = vadd.f32 %v3725_v35, %v6680_v55  ;;  %3833 = vmatpush.msra.mxu3 %v1623_v14 }
 0x478   : > { %v3740_v21 = vpop.f32.mrf.mxu0  ;;  %4636 = vmatmul.msk.f32.vlgmr.msra.gmra.mxu3 %vm697_vm11, %v6712_v11 }
 0x479   : > { %v3739_v51 = vadd.f32 %v3738_v29, %v3726_v15 }
 0x47b   : > { %vm3746_vm15 = vcmp.gt.f32.partialorder %v3739_v51, 0.0  ;;  %v3751_v36 = vmul.f32 %v6692_v28, %v3739_v51  ;;  %v3699_v56 = vpop.f32.mrf.mxu3 }
 0x47c   : > { %v3700_v34 = vadd.f32 %v3699_v56, %v6680_v55  ;;  %v3014_v55 = vmul.f32 %v6690_v39, %v2977_v26 }
 0x47d   : > { %v3755_v6 = vsel %vm3746_vm15, %v3739_v51, %v3751_v36 }
 0x47e   : > { %3876 = vmatpush.msra.mxu2 %v3755_v6  ;;  %v3727_v8 = vpop.f32.mrf.mxu1  ;;  %v3713_v52 = vadd.f32 %v3712_v62, %v3700_v34  ;;  %v3714_v20 = vpop.f32.mrf.mxu2  ;;  %v3018_v46 = vsel %vm3009_vm0, %v2977_v26, %v3014_v55 }
 0x480   : > { %3877 = vmatpush.msra.mxu2 %v3019_v41  ;;  %vm3745_vm4 = vcmp.gt.f32.partialorder %v3713_v52, 0.0  ;;  %v3750_v17 = vmul.f32 %v6692_v28, %v3713_v52  ;;  %4637 = vmatmul.msk.f32.gmra.mxu3 %vm697_vm11, %v6718_v33 }
 0x482   : > { %3878 = vmatpush.msra.mxu2 %v2361_v48  ;;  %v3754_v25 = vsel %vm3745_vm4, %v3713_v52, %v3750_v17 }
 0x483   : > { %3853 = vmatpush.msrb.mxu0 %v3754_v25  ;;  %4800 = vmatpush.msrb.mxu1 %v3754_v25  ;;  %v3701_v12 = vpop.f32.mrf.mxu3 }
 0x484   : > { %3879 = vmatpush.msra.mxu2 %v1625_v49 }
 0x485   : > { %3854 = vmatpush.msrb.mxu0 %v3018_v46  ;;  %4801 = vmatpush.msrb.mxu1 %v3018_v46 }
 0x486   : > { %4640 = vmatmul.msk.f32.vlgmr.msra.gmra.mxu2 %vm697_vm11, %v6712_v11 }
 0x487   : > { %3855 = vmatpush.msrb.mxu0 %v2360_v61  ;;  %4802 = vmatpush.msrb.mxu1 %v2360_v61 }
 0x489   : > { %3856 = vmatpush.msrb.mxu0 %v1624_v44  ;;  %4803 = vmatpush.msrb.mxu1 %v1624_v44 }
 0x48a   : > { %4638 = vmatmul.msk.f32.vlgmr.msrb.gmra.mxu0 %vm697_vm11, %v6712_v11  ;;  %4639 = vmatmul.msk.f32.vlgmr.msrb.gmra.mxu1 %vm697_vm11, %v6718_v33 }
 0x48e   : > { %4641 = vmatmul.msk.f32.gmra.mxu2 %vm697_vm11, %v6718_v33 }
 0x4ab   : > { %v1516_v24 = vpop.xlane.xlu1 %1515  ;;  %v1519_v1 = vpop.xlane.xlu0 %1518 }
 0x4ac   : > { %v1520_v39 = vadd.f32 %v1516_v24, %v1507_v47  ;;  %v1521_v28 = vadd.f32 %v1519_v1, %v1508_v38 }
 0x4ae   : > { %3780 = vperm.xlu2 %4883, %v1520_v39   ;;  %3785 = vperm.xlu1 %4882, %v1521_v28  }
 0x4f3   : > { %v3815_v50 = vpop.f32.mrf.mxu3  ;;  %v3812_v53 = vpop.f32.mrf.mxu2 }
 0x4fb   : > { %v3835_v2 = vpop.f32.mrf.mxu3 }
 0x503   : > { %v3838_v29 = vpop.f32.mrf.mxu3 }
 0x507   : > { %v3858_v54 = vpop.f32.mrf.mxu0  ;;  %v3861_v45 = vpop.f32.mrf.mxu1 }
 0x508   : > { %v3781_v0 = vpop.permute.xlu2 %3780 }
 0x509   : > { %v3881_v9 = vpop.f32.mrf.mxu2  ;;  %v3813_v30 = vadd.f32 %v3812_v53, %v3781_v0  ;;  %v3836_v40 = vadd.f32 %v3835_v2, %v3781_v0  ;;  %v3859_v18 = vadd.f32 %v3858_v54, %v3781_v0 }
 0x50a   : > { %v3882_v57 = vadd.f32 %v3881_v9, %v3781_v0 }
 0x50b   : > { %vm3888_vm11 = vcmp.gt.f32.partialorder %v3813_v30, 0.0  ;;  %v3897_v42 = vmul.f32 %v3896_v7, %v3813_v30  ;;  %vm3889_vm6 = vcmp.gt.f32.partialorder %v3836_v40, 0.0  ;;  %v3898_v58 = vmul.f32 %v3896_v7, %v3836_v40 }
 0x50c   : > { %vm3890_vm7 = vcmp.gt.f32.partialorder %v3859_v18, 0.0  ;;  %v3899_v16 = vmul.f32 %v3896_v7, %v3859_v18  ;;  %vm3891_vm8 = vcmp.gt.f32.partialorder %v3882_v57, 0.0  ;;  %v3900_v19 = vmul.f32 %v3896_v7, %v3882_v57 }
 0x50d   : > { %v3905_v11 = vsel %vm3888_vm11, %v3813_v30, %v3897_v42  ;;  %v3906_v32 = vsel %vm3889_vm6, %v3836_v40, %v3898_v58 }
 0x50e   : > { %3913 = vst [vmem:[%s6774_s20] sm:$0xff] %v3905_v11  ;;  %v3907_v43 = vsel %vm3890_vm7, %v3859_v18, %v3899_v16  ;;  %v3908_v33 = vsel %vm3891_vm8, %v3882_v57, %v3900_v19 }
 0x50f   : > { %3914 = vst [vmem:[%s6774_s20 + $0x8] sm:$0xff] %v3906_v32 }
 0x510   : > { %3915 = vst [vmem:[%s6774_s20 + $0x10] sm:$0xff] %v3907_v43 }
 0x511   : > { %3916 = vst [vmem:[%s6774_s20 + $0x18] sm:$0xff] %v3908_v33  ;;  %v3884_v23 = vpop.f32.mrf.mxu2 }
 0x520   : > { %v3786_v35 = vpop.permute.xlu1 %3785 }
 0x521   : > { %v3816_v37 = vadd.f32 %v3815_v50, %v3786_v35  ;;  %v3839_v59 = vadd.f32 %v3838_v29, %v3786_v35  ;;  %v3862_v10 = vadd.f32 %v3861_v45, %v3786_v35  ;;  %v3885_v15 = vadd.f32 %v3884_v23, %v3786_v35 }
 0x523   : > { %vm3892_vm9 = vcmp.gt.f32.partialorder %v3816_v37, 0.0  ;;  %v3901_v27 = vmul.f32 %v3896_v7, %v3816_v37  ;;  %vm3893_vm10 = vcmp.gt.f32.partialorder %v3839_v59, 0.0  ;;  %v3902_v51 = vmul.f32 %v3896_v7, %v3839_v59 }
 0x524   : > { %vm3894_vm12 = vcmp.gt.f32.partialorder %v3862_v10, 0.0  ;;  %v3903_v62 = vmul.f32 %v3896_v7, %v3862_v10  ;;  %vm3895_vm14 = vcmp.gt.f32.partialorder %v3885_v15, 0.0  ;;  %v3904_v14 = vmul.f32 %v3896_v7, %v3885_v15 }
 0x525   : > { %v3909_v22 = vsel %vm3892_vm9, %v3816_v37, %v3901_v27  ;;  %v3910_v36 = vsel %vm3893_vm10, %v3839_v59, %v3902_v51 }
 0x526   : > { %3917 = vst [vmem:[%s6774_s20 + $0x20] sm:$0xff] %v3909_v22  ;;  %v3911_v31 = vsel %vm3894_vm12, %v3862_v10, %v3903_v62  ;;  %v3912_v3 = vsel %vm3895_vm14, %v3885_v15, %v3904_v14 }
 0x527   : > { %3918 = vst [vmem:[%s6774_s20 + $0x28] sm:$0xff] %v3910_v36 }
 0x528   : > { %3919 = vst [vmem:[%s6774_s20 + $0x30] sm:$0xff] %v3911_v31 }
 0x529   : > { %3920 = vst [vmem:[%s6774_s20 + $0x38] sm:$0xff] %v3912_v3 }
 0x52a   : > { %5003 = shalt.err (!%p5000_p8)
}
 0x52b   : > { %s5073_s24 = smov 512   ;;  %s7017_s20 = smov 32  }
 0x52c   : > { %4808 = dma.vmem_to_hbm [thread:$0]  (%p5182_p5), %s3935_s22, 1024, %s3937_s29, %s3922_s16, %s5073_s24, %s5073_s24, %s7017_s20  }
 0x52d PF: > { %p4820_p9 = scmp.ge.s32.totalorder %s5042_s28, 2  ;;  %s3951_s30 = sand.u32 1, %s5030_s25  }
 0x52e   : > { %s3952_s21 = scalar_lea.sflag [#allocation7], %s3951_s30 }
 0x52f   : > { %p4815_p10 = pnand %p4820_p9, %p5186_p6 }
 0x531   : > { %p4816_p11 = pneg %p4815_p10 }
 0x533   : > { %5025 = dma.done.wait (%p4816_p11), %s3952_s21, 1024  }
 0x534   : > { %5027 = vsyncadd (%p4816_p11), %s3952_s21, 4294966272  ;;  %p24_p12 = scmp.ge.s32.totalorder %s5169_s14, 4   ;;  %s7018_s25 = smov %s5034_s26 }
 0x535   : > { %s7019_s26 = smov %s5038_s27  ;;  %s7020_s27 = smov %s5180_s17 }
 0x536   : > { %s7021_s28 = smov %s5169_s14  ;;  %26 = sbr.rel (!%p24_p12) target bundleno = 8 (0x8), region = 117 }
 0x53b   :  { %3958 = vsyncpa [#allocation7], 1 }
 0x53c   :  { %3960 = vsyncpa [#allocation7 + $0x1], 1 }
 0x53d   :  { %3961 = vsyncpa [#allocation8], 1 }
 0x53e   :  { %3963 = vsyncpa [#allocation8 + $0x1], 1 }

</bundles_post_ra>
